<compile_context>
chip_gen: v5e
topology: v5e:2x2
jax: 0.10.0
libtpu: 0.0.40
codegen_flags: <defaults>
</compile_context>

<pallas_src>
import numpy as np
import jax
import jax.numpy as jnp
from jax.experimental import pallas as pl
from jax.experimental.pallas import tpu as pltpu

BN_EPS = 1e-5
LANE = 128
TRUNK_DIMS = (1024, 512, 256, 128)


# ---------------------------------------------------------------------------
# Fused kernel (built as a closure over static layer dims)
# ---------------------------------------------------------------------------
def _make_kernel(dims, padded_out):
    d1, d2, d3, d4 = dims

    def kernel(x_ref, w1_ref, w2_ref, w3_ref, w4_ref, wh_ref, aux_ref, o_ref):
        def bn_relu(y_f32, gamma, beta):
            # BatchNorm1d training-mode stats over the batch dim
            # (two-pass, biased variance, eps=1e-5) + affine, then ReLU.
            mean = jnp.mean(y_f32, axis=0, keepdims=True)
            centered = y_f32 - mean
            var = jnp.mean(centered * centered, axis=0, keepdims=True)
            y = centered * jax.lax.rsqrt(var + BN_EPS) * gamma + beta
            return jnp.maximum(y, 0.0).astype(jnp.bfloat16)

        h = x_ref[...].astype(jnp.bfloat16)

        # Trunk: Linear (bias cancelled by BN mean-subtraction) -> BN -> ReLU.
        # bf16 operands, f32 MXU accumulation.  Gammas/betas come from static
        # (8,128)-tile-aligned slices of the single packed aux array.
        h = bn_relu(jnp.dot(h, w1_ref[...], preferred_element_type=jnp.float32),
                    aux_ref[0:1, :d1], aux_ref[1:2, :d1])
        h = bn_relu(jnp.dot(h, w2_ref[...], preferred_element_type=jnp.float32),
                    aux_ref[2:3, :d2], aux_ref[3:4, :d2])
        h = bn_relu(jnp.dot(h, w3_ref[...], preferred_element_type=jnp.float32),
                    aux_ref[4:5, :d3], aux_ref[5:6, :d3])
        h = bn_relu(jnp.dot(h, w4_ref[...], preferred_element_type=jnp.float32),
                    aux_ref[6:7, :d4], aux_ref[7:8, :d4])

        # Merged heads: one matmul + bias, one lane-dense (batch, padded) store.
        y = jnp.dot(h, wh_ref[...], preferred_element_type=jnp.float32)
        o_ref[...] = y + aux_ref[8:9, :padded_out]

    return kernel


# ---------------------------------------------------------------------------
# Wrapper
# ---------------------------------------------------------------------------
@jax.jit
def _fused_call(x, params):
    w1, w2, w3, w4 = params["w"]
    wh = params["wh"]
    aux = params["aux"]

    batch, in_dim = x.shape
    dims = (w1.shape[1], w2.shape[1], w3.shape[1], w4.shape[1])
    padded_out = wh.shape[1]

    kernel = _make_kernel(dims, padded_out)

    # Advisory cost hint so XLA can schedule/overlap the input DMAs.
    flops = 2 * batch * (in_dim * dims[0] + dims[0] * dims[1]
                         + dims[1] * dims[2] + dims[2] * dims[3]
                         + dims[3] * padded_out)
    transcendentals = sum(dims)                       # one rsqrt per BN feature
    operands = (x, w1, w2, w3, w4, wh, aux)
    bytes_accessed = (sum(int(a.size) * a.dtype.itemsize for a in operands)
                      + batch * padded_out * 4)

    vmem = pl.BlockSpec(memory_space=pltpu.VMEM)
    return pl.pallas_call(
        kernel,
        out_shape=jax.ShapeDtypeStruct((batch, padded_out), jnp.float32),
        in_specs=[vmem] * len(operands),
        out_specs=vmem,
        cost_estimate=pl.CostEstimate(flops=flops,
                                      transcendentals=transcendentals,
                                      bytes_accessed=bytes_accessed),
        compiler_params=pltpu.CompilerParams(),
    )(*operands)


def multisoftmax_ffnn_big_forward(params, x, output_vector):
    """Replicates Multisoftmax_ffnn_big.forward: returns list of head logits.

    Note: the kernel itself produces one lane-dense (batch, padded) slab; if
    the consumer can slice at the point of use (e.g. inside a loss), prefer
    consuming the slab directly and skip this per-head slicing.
    """
    slab = _fused_call(x, params)            # (batch, padded_total), lane-dense
    outs, off = [], 0
    for d in output_vector:
        outs.append(slab[:, off:off + d])
        off += d
    return outs


# ---------------------------------------------------------------------------
# Parameter construction (deterministic, PyTorch-Linear-like uniform init)
# ---------------------------------------------------------------------------
def make_params(key, input_size, output_vector):
    dims = (input_size,) + TRUNK_DIMS
    n_trunk = len(dims) - 1
    keys = jax.random.split(key, n_trunk + len(output_vector))

    trunk_w, gammas, betas = [], [], []
    for i in range(n_trunk):
        bound = 1.0 / float(np.sqrt(dims[i]))
        w = jax.random.uniform(keys[i], (dims[i], dims[i + 1]), jnp.float32,
                               -bound, bound)
        trunk_w.append(w.astype(jnp.bfloat16))
        # PyTorch BatchNorm1d default init: weight=1, bias=0.
        gammas.append(jnp.ones((dims[i + 1],), jnp.float32))
        betas.append(jnp.zeros((dims[i + 1],), jnp.float32))
        # Trunk Linear biases intentionally omitted (cancelled by training BN).

    head_ws, head_bs = [], []
    bound = 1.0 / float(np.sqrt(TRUNK_DIMS[-1]))
    for j, out_dim in enumerate(output_vector):
        kw, kb = jax.random.split(keys[n_trunk + j])
        head_ws.append(jax.random.uniform(kw, (TRUNK_DIMS[-1], out_dim),
                                          jnp.float32, -bound, bound))
        head_bs.append(jax.random.uniform(kb, (out_dim,),
                                          jnp.float32, -bound, bound))

    total = sum(output_vector)
    padded_out = max(LANE, ((total + LANE - 1) // LANE) * LANE)
    wh = jnp.pad(jnp.concatenate(head_ws, axis=1),
                 ((0, 0), (0, padded_out - total))).astype(jnp.bfloat16)
    bh = jnp.pad(jnp.concatenate(head_bs, axis=0), (0, padded_out - total))

    # Pack the 9 tiny per-feature vectors into ONE (9, aux_cols) f32 array:
    # rows 0..7 = g1,b1,g2,b2,g3,b3,g4,b4 ; row 8 = merged head bias.
    aux_cols = max(TRUNK_DIMS[0], padded_out)
    rows = []
    for g, b in zip(gammas, betas):
        rows.append(jnp.pad(g, (0, aux_cols - g.shape[0])))
        rows.append(jnp.pad(b, (0, aux_cols - b.shape[0])))
    rows.append(jnp.pad(bh, (0, aux_cols - bh.shape[0])))
    aux = jnp.stack(rows, axis=0)            # (9, aux_cols) f32

    return {"w": tuple(trunk_w), "wh": wh, "aux": aux}


# ---------------------------------------------------------------------------
# Pure-JAX reference (same numerics path) for correctness checking
# ---------------------------------------------------------------------------
def _reference_forward(params, x, output_vector):
    w_list, wh, aux = params["w"], params["wh"], params["aux"]
    h = x.astype(jnp.bfloat16)
    for i, w in enumerate(w_list):
        d = w.shape[1]
        y = jnp.dot(h, w, preferred_element_type=jnp.float32)
        mean = jnp.mean(y, axis=0, keepdims=True)
        centered = y - mean
        var = jnp.mean(centered * centered, axis=0, keepdims=True)
        y = (centered * jax.lax.rsqrt(var + BN_EPS)
             * aux[2 * i:2 * i + 1, :d] + aux[2 * i + 1:2 * i + 2, :d])
        h = jnp.maximum(y, 0.0).astype(jnp.bfloat16)
    y = jnp.dot(h, wh, preferred_element_type=jnp.float32) + aux[8:9, :wh.shape[1]]
    outs, off = [], 0
    for d in output_vector:
        outs.append(y[:, off:off + d])
        off += d
    return outs


# ---------------------------------------------------------------------------
if __name__ == "__main__":
    key = jax.random.PRNGKey(0)
    k_params, k_x = jax.random.split(key)

    input_size = 32
    output_vector = [8, 16, 4]     # one Linear(128, i) head per entry
    batch = 8

    params = make_params(k_params, input_size, output_vector)
    x = jax.random.normal(k_x, (batch, input_size), jnp.float32)

    yhat = multisoftmax_ffnn_big_forward(params, x, output_vector)
    yhat = [jax.block_until_ready(y) for y in yhat]

    # shape / finiteness checks
    assert len(yhat) == len(output_vector)
    for y, d in zip(yhat, output_vector):
        assert y.shape == (batch, d), (y.shape, d)
        assert bool(jnp.all(jnp.isfinite(y)))

    # numerical check against a pure-JAX reference of the same computation
    ref = _reference_forward(params, x, output_vector)
    for y, r in zip(yhat, ref):
        assert bool(jnp.allclose(y, r, rtol=2e-2, atol=2e-2)), (
            float(jnp.max(jnp.abs(y - r))))

    print("KERNEL_OK")
</pallas_src>

<mosaic_0001>
module attributes {stable_mosaic.version = 11 : i64} {
  func.func @kernel(%arg0: memref<8x32xf32, #tpu.memory_space<vmem>>, %arg1: memref<32x1024xbf16, #tpu.memory_space<vmem>>, %arg2: memref<1024x512xbf16, #tpu.memory_space<vmem>>, %arg3: memref<512x256xbf16, #tpu.memory_space<vmem>>, %arg4: memref<256x128xbf16, #tpu.memory_space<vmem>>, %arg5: memref<128x128xbf16, #tpu.memory_space<vmem>>, %arg6: memref<9x1024xf32, #tpu.memory_space<vmem>>, %arg7: memref<8x128xf32, #tpu.memory_space<vmem>>) attributes {dimension_semantics = [], scalar_prefetch = 0 : i64, scratch_operands = 0 : i64, tpu.core_type = #tpu.core_type<tc>} {
    %c0 = arith.constant 0 : index
    %c0_0 = arith.constant 0 : index
    %0 = vector.load %arg0[%c0, %c0_0] : memref<8x32xf32, #tpu.memory_space<vmem>>, vector<8x32xf32>
    %1 = arith.truncf %0 : vector<8x32xf32> to vector<8x32xbf16>
    %c0_1 = arith.constant 0 : index
    %c0_2 = arith.constant 0 : index
    %2 = vector.load %arg1[%c0_1, %c0_2] : memref<32x1024xbf16, #tpu.memory_space<vmem>>, vector<32x1024xbf16>
    %cst = arith.constant dense<0.000000e+00> : vector<8x1024xf32>
    %3 = tpu.matmul %1, %2, %cst {dimension_numbers = #tpu.dot_dimension_numbers<[1], [0], [0], [1], [0, 0, 1, 1], [], []>} : vector<8x32xbf16>, vector<32x1024xbf16>, vector<8x1024xf32> -> vector<8x1024xf32>
    %c0_3 = arith.constant 0 : index
    %c0_4 = arith.constant 0 : index
    %4 = vector.load %arg6[%c0_3, %c0_4] : memref<9x1024xf32, #tpu.memory_space<vmem>>, vector<1x1024xf32>
    %c1 = arith.constant 1 : index
    %c0_5 = arith.constant 0 : index
    %5 = vector.load %arg6[%c1, %c0_5] : memref<9x1024xf32, #tpu.memory_space<vmem>>, vector<1x1024xf32>
    %cst_6 = arith.constant dense<0.000000e+00> : vector<1024xf32>
    %6 = vector.multi_reduction <add>, %3, %cst_6 [0] : vector<8x1024xf32> to vector<1024xf32>
    %7 = vector.shape_cast %6 : vector<1024xf32> to vector<1x1024xf32>
    %cst_7 = arith.constant 8.000000e+00 : f32
    %8 = vector.broadcast %cst_7 : f32 to vector<1x1024xf32>
    %9 = arith.divf %7, %8 : vector<1x1024xf32>
    %10 = vector.broadcast %9 : vector<1x1024xf32> to vector<8x1024xf32>
    %11 = arith.subf %3, %10 : vector<8x1024xf32>
    %12 = arith.mulf %11, %11 : vector<8x1024xf32>
    %cst_8 = arith.constant dense<0.000000e+00> : vector<1024xf32>
    %13 = vector.multi_reduction <add>, %12, %cst_8 [0] : vector<8x1024xf32> to vector<1024xf32>
    %14 = vector.shape_cast %13 : vector<1024xf32> to vector<1x1024xf32>
    %cst_9 = arith.constant 8.000000e+00 : f32
    %15 = vector.broadcast %cst_9 : f32 to vector<1x1024xf32>
    %16 = arith.divf %14, %15 : vector<1x1024xf32>
    %cst_10 = arith.constant 9.99999974E-6 : f32
    %17 = vector.broadcast %cst_10 : f32 to vector<1x1024xf32>
    %18 = arith.addf %16, %17 : vector<1x1024xf32>
    %19 = math.rsqrt %18 : vector<1x1024xf32>
    %20 = vector.broadcast %19 : vector<1x1024xf32> to vector<8x1024xf32>
    %21 = arith.mulf %11, %20 : vector<8x1024xf32>
    %22 = vector.broadcast %4 : vector<1x1024xf32> to vector<8x1024xf32>
    %23 = arith.mulf %21, %22 : vector<8x1024xf32>
    %24 = vector.broadcast %5 : vector<1x1024xf32> to vector<8x1024xf32>
    %25 = arith.addf %23, %24 : vector<8x1024xf32>
    %cst_11 = arith.constant 0.000000e+00 : f32
    %26 = vector.broadcast %cst_11 : f32 to vector<8x1024xf32>
    %27 = arith.maximumf %25, %26 : vector<8x1024xf32>
    %28 = arith.truncf %27 : vector<8x1024xf32> to vector<8x1024xbf16>
    %c0_12 = arith.constant 0 : index
    %c0_13 = arith.constant 0 : index
    %29 = vector.load %arg2[%c0_12, %c0_13] : memref<1024x512xbf16, #tpu.memory_space<vmem>>, vector<1024x512xbf16>
    %cst_14 = arith.constant dense<0.000000e+00> : vector<8x512xf32>
    %30 = tpu.matmul %28, %29, %cst_14 {dimension_numbers = #tpu.dot_dimension_numbers<[1], [0], [0], [1], [0, 0, 1, 1], [], []>} : vector<8x1024xbf16>, vector<1024x512xbf16>, vector<8x512xf32> -> vector<8x512xf32>
    %c2 = arith.constant 2 : index
    %c0_15 = arith.constant 0 : index
    %31 = vector.load %arg6[%c2, %c0_15] : memref<9x1024xf32, #tpu.memory_space<vmem>>, vector<1x512xf32>
    %c3 = arith.constant 3 : index
    %c0_16 = arith.constant 0 : index
    %32 = vector.load %arg6[%c3, %c0_16] : memref<9x1024xf32, #tpu.memory_space<vmem>>, vector<1x512xf32>
    %cst_17 = arith.constant dense<0.000000e+00> : vector<512xf32>
    %33 = vector.multi_reduction <add>, %30, %cst_17 [0] : vector<8x512xf32> to vector<512xf32>
    %34 = vector.shape_cast %33 : vector<512xf32> to vector<1x512xf32>
    %cst_18 = arith.constant 8.000000e+00 : f32
    %35 = vector.broadcast %cst_18 : f32 to vector<1x512xf32>
    %36 = arith.divf %34, %35 : vector<1x512xf32>
    %37 = vector.broadcast %36 : vector<1x512xf32> to vector<8x512xf32>
    %38 = arith.subf %30, %37 : vector<8x512xf32>
    %39 = arith.mulf %38, %38 : vector<8x512xf32>
    %cst_19 = arith.constant dense<0.000000e+00> : vector<512xf32>
    %40 = vector.multi_reduction <add>, %39, %cst_19 [0] : vector<8x512xf32> to vector<512xf32>
    %41 = vector.shape_cast %40 : vector<512xf32> to vector<1x512xf32>
    %cst_20 = arith.constant 8.000000e+00 : f32
    %42 = vector.broadcast %cst_20 : f32 to vector<1x512xf32>
    %43 = arith.divf %41, %42 : vector<1x512xf32>
    %cst_21 = arith.constant 9.99999974E-6 : f32
    %44 = vector.broadcast %cst_21 : f32 to vector<1x512xf32>
    %45 = arith.addf %43, %44 : vector<1x512xf32>
    %46 = math.rsqrt %45 : vector<1x512xf32>
    %47 = vector.broadcast %46 : vector<1x512xf32> to vector<8x512xf32>
    %48 = arith.mulf %38, %47 : vector<8x512xf32>
    %49 = vector.broadcast %31 : vector<1x512xf32> to vector<8x512xf32>
    %50 = arith.mulf %48, %49 : vector<8x512xf32>
    %51 = vector.broadcast %32 : vector<1x512xf32> to vector<8x512xf32>
    %52 = arith.addf %50, %51 : vector<8x512xf32>
    %cst_22 = arith.constant 0.000000e+00 : f32
    %53 = vector.broadcast %cst_22 : f32 to vector<8x512xf32>
    %54 = arith.maximumf %52, %53 : vector<8x512xf32>
    %55 = arith.truncf %54 : vector<8x512xf32> to vector<8x512xbf16>
    %c0_23 = arith.constant 0 : index
    %c0_24 = arith.constant 0 : index
    %56 = vector.load %arg3[%c0_23, %c0_24] : memref<512x256xbf16, #tpu.memory_space<vmem>>, vector<512x256xbf16>
    %cst_25 = arith.constant dense<0.000000e+00> : vector<8x256xf32>
    %57 = tpu.matmul %55, %56, %cst_25 {dimension_numbers = #tpu.dot_dimension_numbers<[1], [0], [0], [1], [0, 0, 1, 1], [], []>} : vector<8x512xbf16>, vector<512x256xbf16>, vector<8x256xf32> -> vector<8x256xf32>
    %c4 = arith.constant 4 : index
    %c0_26 = arith.constant 0 : index
    %58 = vector.load %arg6[%c4, %c0_26] : memref<9x1024xf32, #tpu.memory_space<vmem>>, vector<1x256xf32>
    %c5 = arith.constant 5 : index
    %c0_27 = arith.constant 0 : index
    %59 = vector.load %arg6[%c5, %c0_27] : memref<9x1024xf32, #tpu.memory_space<vmem>>, vector<1x256xf32>
    %cst_28 = arith.constant dense<0.000000e+00> : vector<256xf32>
    %60 = vector.multi_reduction <add>, %57, %cst_28 [0] : vector<8x256xf32> to vector<256xf32>
    %61 = vector.shape_cast %60 : vector<256xf32> to vector<1x256xf32>
    %cst_29 = arith.constant 8.000000e+00 : f32
    %62 = vector.broadcast %cst_29 : f32 to vector<1x256xf32>
    %63 = arith.divf %61, %62 : vector<1x256xf32>
    %64 = vector.broadcast %63 : vector<1x256xf32> to vector<8x256xf32>
    %65 = arith.subf %57, %64 : vector<8x256xf32>
    %66 = arith.mulf %65, %65 : vector<8x256xf32>
    %cst_30 = arith.constant dense<0.000000e+00> : vector<256xf32>
    %67 = vector.multi_reduction <add>, %66, %cst_30 [0] : vector<8x256xf32> to vector<256xf32>
    %68 = vector.shape_cast %67 : vector<256xf32> to vector<1x256xf32>
    %cst_31 = arith.constant 8.000000e+00 : f32
    %69 = vector.broadcast %cst_31 : f32 to vector<1x256xf32>
    %70 = arith.divf %68, %69 : vector<1x256xf32>
    %cst_32 = arith.constant 9.99999974E-6 : f32
    %71 = vector.broadcast %cst_32 : f32 to vector<1x256xf32>
    %72 = arith.addf %70, %71 : vector<1x256xf32>
    %73 = math.rsqrt %72 : vector<1x256xf32>
    %74 = vector.broadcast %73 : vector<1x256xf32> to vector<8x256xf32>
    %75 = arith.mulf %65, %74 : vector<8x256xf32>
    %76 = vector.broadcast %58 : vector<1x256xf32> to vector<8x256xf32>
    %77 = arith.mulf %75, %76 : vector<8x256xf32>
    %78 = vector.broadcast %59 : vector<1x256xf32> to vector<8x256xf32>
    %79 = arith.addf %77, %78 : vector<8x256xf32>
    %cst_33 = arith.constant 0.000000e+00 : f32
    %80 = vector.broadcast %cst_33 : f32 to vector<8x256xf32>
    %81 = arith.maximumf %79, %80 : vector<8x256xf32>
    %82 = arith.truncf %81 : vector<8x256xf32> to vector<8x256xbf16>
    %c0_34 = arith.constant 0 : index
    %c0_35 = arith.constant 0 : index
    %83 = vector.load %arg4[%c0_34, %c0_35] : memref<256x128xbf16, #tpu.memory_space<vmem>>, vector<256x128xbf16>
    %cst_36 = arith.constant dense<0.000000e+00> : vector<8x128xf32>
    %84 = tpu.matmul %82, %83, %cst_36 {dimension_numbers = #tpu.dot_dimension_numbers<[1], [0], [0], [1], [0, 0, 1, 1], [], []>} : vector<8x256xbf16>, vector<256x128xbf16>, vector<8x128xf32> -> vector<8x128xf32>
    %c6 = arith.constant 6 : index
    %c0_37 = arith.constant 0 : index
    %85 = vector.load %arg6[%c6, %c0_37] : memref<9x1024xf32, #tpu.memory_space<vmem>>, vector<1x128xf32>
    %c7 = arith.constant 7 : index
    %c0_38 = arith.constant 0 : index
    %86 = vector.load %arg6[%c7, %c0_38] : memref<9x1024xf32, #tpu.memory_space<vmem>>, vector<1x128xf32>
    %cst_39 = arith.constant dense<0.000000e+00> : vector<128xf32>
    %87 = vector.multi_reduction <add>, %84, %cst_39 [0] : vector<8x128xf32> to vector<128xf32>
    %88 = vector.shape_cast %87 : vector<128xf32> to vector<1x128xf32>
    %cst_40 = arith.constant 8.000000e+00 : f32
    %89 = vector.broadcast %cst_40 : f32 to vector<1x128xf32>
    %90 = arith.divf %88, %89 : vector<1x128xf32>
    %91 = vector.broadcast %90 : vector<1x128xf32> to vector<8x128xf32>
    %92 = arith.subf %84, %91 : vector<8x128xf32>
    %93 = arith.mulf %92, %92 : vector<8x128xf32>
    %cst_41 = arith.constant dense<0.000000e+00> : vector<128xf32>
    %94 = vector.multi_reduction <add>, %93, %cst_41 [0] : vector<8x128xf32> to vector<128xf32>
    %95 = vector.shape_cast %94 : vector<128xf32> to vector<1x128xf32>
    %cst_42 = arith.constant 8.000000e+00 : f32
    %96 = vector.broadcast %cst_42 : f32 to vector<1x128xf32>
    %97 = arith.divf %95, %96 : vector<1x128xf32>
    %cst_43 = arith.constant 9.99999974E-6 : f32
    %98 = vector.broadcast %cst_43 : f32 to vector<1x128xf32>
    %99 = arith.addf %97, %98 : vector<1x128xf32>
    %100 = math.rsqrt %99 : vector<1x128xf32>
    %101 = vector.broadcast %100 : vector<1x128xf32> to vector<8x128xf32>
    %102 = arith.mulf %92, %101 : vector<8x128xf32>
    %103 = vector.broadcast %85 : vector<1x128xf32> to vector<8x128xf32>
    %104 = arith.mulf %102, %103 : vector<8x128xf32>
    %105 = vector.broadcast %86 : vector<1x128xf32> to vector<8x128xf32>
    %106 = arith.addf %104, %105 : vector<8x128xf32>
    %cst_44 = arith.constant 0.000000e+00 : f32
    %107 = vector.broadcast %cst_44 : f32 to vector<8x128xf32>
    %108 = arith.maximumf %106, %107 : vector<8x128xf32>
    %109 = arith.truncf %108 : vector<8x128xf32> to vector<8x128xbf16>
    %c0_45 = arith.constant 0 : index
    %c0_46 = arith.constant 0 : index
    %110 = vector.load %arg5[%c0_45, %c0_46] : memref<128x128xbf16, #tpu.memory_space<vmem>>, vector<128x128xbf16>
    %cst_47 = arith.constant dense<0.000000e+00> : vector<8x128xf32>
    %111 = tpu.matmul %109, %110, %cst_47 {dimension_numbers = #tpu.dot_dimension_numbers<[1], [0], [0], [1], [0, 0, 1, 1], [], []>} : vector<8x128xbf16>, vector<128x128xbf16>, vector<8x128xf32> -> vector<8x128xf32>
    %c8 = arith.constant 8 : index
    %c0_48 = arith.constant 0 : index
    %112 = vector.load %arg6[%c8, %c0_48] : memref<9x1024xf32, #tpu.memory_space<vmem>>, vector<1x128xf32>
    %113 = vector.broadcast %112 : vector<1x128xf32> to vector<8x128xf32>
    %114 = arith.addf %111, %113 : vector<8x128xf32>
    %c0_49 = arith.constant 0 : index
    %c0_50 = arith.constant 0 : index
    %115 = vector.load %arg7[%c0_49, %c0_50] : memref<8x128xf32, #tpu.memory_space<vmem>>, vector<8x128xf32>
    tpu.vector_store %arg7[%c0_49, %c0_50], %114 {strides = array<i32>} : memref<8x128xf32, #tpu.memory_space<vmem>>, vector<8x128xf32>,
    return
  }
}

</mosaic_0001>

<bundles_post_ra>
// kernel: _fused_call.1
= control target key start
LH: loop header
LB: loop body
LE: loop exit
PB: predicated region body
PF: predicated region fallthrough
CT: control target
= control target key end

     0   :  { %12 = vsyncpa [#allocation3], 0  ;;  %s6227_s0 = inlined_call_operand.hbm [shape: f32[8,32], index: 0, kind: input, shape index: {}]   ;;  %s6228_s1 = inlined_call_operand.hbm [shape: bf16[32,1024], index: 1, kind: input, shape index: {}]   ;;  %s6229_s2 = inlined_call_operand.hbm [shape: bf16[1024,512], index: 2, kind: input, shape index: {}]   ;;  %s6230_s3 = inlined_call_operand.hbm [shape: bf16[512,256], index: 3, kind: input, shape index: {}]   ;;  %s6231_s4 = inlined_call_operand.hbm [shape: bf16[256,128], index: 4, kind: input, shape index: {}]   ;;  %s6232_s5 = inlined_call_operand.hbm [shape: bf16[128,128], index: 5, kind: input, shape index: {}]   ;;  %s6233_s6 = inlined_call_operand.hbm [shape: f32[9,1024], index: 6, kind: input, shape index: {}]   ;;  %s6234_s7 = inlined_call_operand.hbm [shape: f32[8,128], index: 7, kind: output, shape index: {}]  }
   0x1   :  { %13 = vsyncpa [#allocation6], 0 }
   0x2   :  { %14 = vsyncpa [#allocation9], 0 }
   0x3   :  { %15 = vsyncpa [#allocation12], 0  ;;  %s32_s26 = sshll.u32 %s6228_s1, 4  ;;  %s33_s26 = int_to_ptr.hbm [resolvable:$true] %s32_s26 }
   0x4   :  { %16 = vsyncpa [#allocation4], 0  ;;  %s5660_s27 = smov [#allocation5]   ;;  %s58_s8 = sshll.u32 %s6230_s3, 4  ;;  %s59_s8 = int_to_ptr.hbm [resolvable:$true] %s58_s8 }
   0x5   :  { %s34_s28 = sshll.u32 %s5660_s27, 4  ;;  %s5661_s9 = smov 512   ;;  %s35_s28 = int_to_ptr.vmem [resolvable:$true] %s34_s28 }
   0x6   :  { %s5662_s10 = smov 32   ;;  %s5663_s11 = smov [#allocation8]  }
   0x7   :  { %40 = dma.hbm_to_vmem [thread:$0]  %s33_s26, 2048, %s35_s28, [#allocation6], %s5661_s9, %s5661_s9, %s5662_s10  }
   0x8   :  { %s60_s12 = sshll.u32 %s5663_s11, 4  ;;  %s5664_s13 = smov 128   ;;  %s61_s12 = int_to_ptr.vmem [resolvable:$true] %s60_s12 }
   0x9   :  { %s5665_s14 = smov 8   ;;  %s84_s16 = sshll.u32 %s6232_s5, 4  ;;  %s85_s16 = int_to_ptr.hbm [resolvable:$true] %s84_s16 }
   0xa   :  { %66 = dma.hbm_to_vmem [thread:$0]  %s59_s8, 8192, %s61_s12, [#allocation9], %s5664_s13, %s5664_s13, %s5665_s14  }
   0xb   :  { %s5666_s17 = smov [#allocation11]   ;;  %s22_s20 = sshll.u32 %s6227_s0, 4  ;;  %s23_s20 = int_to_ptr.hbm [resolvable:$true] %s22_s20 }
   0xc   :  { %s86_s18 = sshll.u32 %s5666_s17, 4  ;;  %s5667_s21 = smov 64   ;;  %s87_s18 = int_to_ptr.vmem [resolvable:$true] %s86_s18 }
   0xd   :  { %s5668_s22 = smov 4   ;;  %s5669_s23 = smov [#allocation2]  }
   0xe   :  { %92 = dma.hbm_to_vmem [thread:$0]  %s85_s16, 1024, %s87_s18, [#allocation12], %s5667_s21, %s5667_s21, %s5668_s22  }
   0xf   :  { %s24_s24 = sshll.u32 %s5669_s23, 4  ;;  %s45_s5 = sshll.u32 %s6229_s2, 4  ;;  %s25_s24 = int_to_ptr.vmem [resolvable:$true] %s24_s24  ;;  %s46_s5 = int_to_ptr.hbm [resolvable:$true] %s45_s5 }
  0x10   :  { %27 = dma.hbm_to_vmem [thread:$0]  %s23_s20, 128, %s25_s24, [#allocation3]  }
  0x11   :  { %s5670_s27 = smov [#allocation7]   ;;  %s71_s30 = sshll.u32 %s6231_s4, 4  ;;  %s72_s30 = int_to_ptr.hbm [resolvable:$true] %s71_s30 }
  0x12   :  { %s47_s28 = sshll.u32 %s5670_s27, 4  ;;  %s5671_s8 = smov 256   ;;  %s48_s28 = int_to_ptr.vmem [resolvable:$true] %s47_s28 }
  0x13   :  { %s5672_s9 = smov 16   ;;  %s5673_s10 = smov [#allocation10]  }
  0x14   :  { %53 = dma.hbm_to_vmem [thread:$0]  %s46_s5, 32768, %s48_s28, [#allocation6], %s5671_s8, %s5671_s8, %s5672_s9  }
  0x15   :  { %s73_s11 = sshll.u32 %s5673_s10, 4  ;;  %s97_s2 = sshll.u32 %s6233_s6, 4  ;;  %s74_s11 = int_to_ptr.vmem [resolvable:$true] %s73_s11  ;;  %s98_s2 = int_to_ptr.hbm [resolvable:$true] %s97_s2 }
  0x16   :  { %79 = dma.hbm_to_vmem [thread:$0]  %s72_s30, 2048, %s74_s11, [#allocation9], %s5667_s21, %s5667_s21, %s5668_s22  }
  0x17   :  { %s5674_s14 = smov [#allocation13]   ;;  %s5675_s15 = smov 1024  }
  0x18   :  { %s99_s1 = sshll.u32 %s5674_s14, 4  ;;  %s100_s1 = int_to_ptr.vmem [resolvable:$true] %s99_s1 }
  0x19   :  { %105 = dma.hbm_to_vmem [thread:$0]  %s98_s2, 2048, %s100_s1, [#allocation12], %s5675_s15, %s5675_s15, %s5667_s21  }
  0x1a   :  { %5650 = dma.done.wait [#allocation3], 128  }
  0x1b   :  { %5651 = vsyncadd [#allocation3], 4294967168 }
  0x1c   :  { %5652 = dma.done.wait [#allocation6], 34816  }
  0x1d   :  { %5653 = vsyncadd [#allocation6], 4294932480 }
  0x1e   :  { %5654 = dma.done.wait [#allocation9], 10240  }
  0x1f   :  { %5655 = vsyncadd [#allocation9], 4294957056 }
  0x20   :  { %5656 = dma.done.wait [#allocation12], 3072  }
  0x21   :  { %5657 = vsyncadd [#allocation12], 4294964224  ;;  %v3634_v0 = vld [vmem:[#allocation5 + $0x40] sm:$0xf]  ;;  %v5056_v2 = vld [vmem:[#allocation5 + $0x44] sm:$0xf] }
  0x22   :  { %v5060_v1 = vld [vmem:[#allocation5 + $0x5c] sm:$0xf0]  ;;  %v3636_v4 = vld [vmem:[#allocation5 + $0x60] sm:$0xf0]  ;;  %v3642_v5 = vld [vmem:[#allocation5 + $0x48] sm:$0xf] }
  0x23   :  { %v3635_v3 = vor.u32 %v5060_v1, %v3634_v0  ;;  %v5061_v6 = vld [vmem:[#allocation5 + $0x64] sm:$0xf0]  ;;  %v3639_v7 = vor.u32 %v5056_v2, %v3636_v4  ;;  %v3650_v9 = vld [vmem:[#allocation5 + $0x50] sm:$0xf]  ;;  %v3602_v11 = vld [vmem:[#allocation5] sm:$0xf] }
  0x24   :  { %v3643_v8 = vor.u32 %v5061_v6, %v3642_v5  ;;  %v5062_v10 = vld [vmem:[#allocation5 + $0x6c] sm:$0xf0]  ;;  %v5052_v13 = vld [vmem:[#allocation5 + $0x1c] sm:$0xf0]  ;;  %v5048_v14 = vld [vmem:[#allocation5 + $0x4] sm:$0xf] }
  0x25   :  { %243 = vmatpush.bf16.msra.mxu3 %v3635_v3  ;;  %v3651_v12 = vor.u32 %v5062_v10, %v3650_v9  ;;  %v3604_v15 = vld [vmem:[#allocation5 + $0x20] sm:$0xf0]  ;;  %256 = vmatpush.bf16.msra.mxu1 %v3639_v7  ;;  %v3603_v16 = vor.u32 %v5052_v13, %v3602_v11  ;;  %v3610_v18 = vld [vmem:[#allocation5 + $0x8] sm:$0xf]  ;;  %v3618_v20 = vld [vmem:[#allocation5 + $0x10] sm:$0xf] }
  0x26   :  { %269 = vmatpush.bf16.msra.mxu2 %v3643_v8  ;;  %v3607_v17 = vor.u32 %v5048_v14, %v3604_v15  ;;  %v5053_v19 = vld [vmem:[#allocation5 + $0x24] sm:$0xf0]  ;;  %v5054_v22 = vld [vmem:[#allocation5 + $0x2c] sm:$0xf0]  ;;  %v135_v23 = vld [vmem:[#allocation2] sm:$0xff]  ;;  %vm233_vm0 = vcmask 261120  }
  0x27   :  { %295 = vmatpush.bf16.msra.mxu0 %v3651_v12  ;;  %v3611_v21 = vor.u32 %v5053_v19, %v3610_v18  ;;  %v5057_v24 = vld [vmem:[#allocation5 + $0x4c] sm:$0xf]  ;;  %v3619_v25 = vor.u32 %v5054_v22, %v3618_v20  ;;  %v136_v26 = vpack.c.bf16 %v135_v23, %v135_v23  ;;  %v5058_v28 = vld [vmem:[#allocation5 + $0x54] sm:$0xf]  ;;  %v3658_v32 = vld [vmem:[#allocation5 + $0x58] sm:$0xf] }
  0x28   :  { %v3644_v27 = vld [vmem:[#allocation5 + $0x68] sm:$0xf0]  ;;  %v3652_v29 = vld [vmem:[#allocation5 + $0x70] sm:$0xf0]  ;;  %v5063_v33 = vld [vmem:[#allocation5 + $0x74] sm:$0xf0] }
  0x29   :  { %244 = vmatpush.bf16.msra.mxu3 %v3603_v16  ;;  %v3647_v30 = vor.u32 %v5057_v24, %v3644_v27  ;;  %v3655_v31 = vor.u32 %v5058_v28, %v3652_v29  ;;  %v5049_v34 = vld [vmem:[#allocation5 + $0xc] sm:$0xf]  ;;  %257 = vmatpush.bf16.msra.mxu1 %v3607_v17  ;;  %v3659_v35 = vor.u32 %v5063_v33, %v3658_v32  ;;  %v5050_v37 = vld [vmem:[#allocation5 + $0x14] sm:$0xf]  ;;  %v3626_v40 = vld [vmem:[#allocation5 + $0x18] sm:$0xf] }
  0x2a   :  { %270 = vmatpush.bf16.msra.mxu2 %v3611_v21  ;;  %v3612_v36 = vld [vmem:[#allocation5 + $0x28] sm:$0xf0]  ;;  %v3620_v38 = vld [vmem:[#allocation5 + $0x30] sm:$0xf0]  ;;  %v5055_v41 = vld [vmem:[#allocation5 + $0x34] sm:$0xf0] }
  0x2b   :  { %296 = vmatpush.bf16.msra.mxu0 %v3619_v25  ;;  %v3615_v39 = vor.u32 %v5049_v34, %v3612_v36  ;;  %v5059_v42 = vld [vmem:[#allocation5 + $0x5c] sm:$0xf]  ;;  %v3623_v43 = vor.u32 %v5050_v37, %v3620_v38  ;;  %v3627_v48 = vor.u32 %v5055_v41, %v3626_v40  ;;  %v3914_v50 = vld [vmem:[#allocation7 + $0x1e0] sm:$0xf]  ;;  %v5126_v51 = vld [vmem:[#allocation7 + $0x1ec] sm:$0xf0] }
  0x2c   :  { %3664 = vmatmul.msk.bf16.vlgmr.msra.gmra.mxu3 %vm233_vm0, %v136_v26  ;;  %v3660_v44 = vld [vmem:[#allocation5 + $0x78] sm:$0xf0]  ;;  %3665 = vmatmul.msk.bf16.vlgmr.msra.gmra.mxu1 %vm233_vm0, %v136_v26  ;;  %v3915_v52 = vor.u32 %v5126_v51, %v3914_v50  ;;  %v3898_v53 = vld [vmem:[#allocation7 + $0x1c0] sm:$0xf]  ;;  %v5122_v54 = vld [vmem:[#allocation7 + $0x1cc] sm:$0xf0] }
  0x2d   :  { %282 = vmatpush.bf16.msrb.mxu3 %v3647_v30  ;;  %308 = vmatpush.bf16.msrb.mxu1 %v3655_v31  ;;  %v3663_v45 = vor.u32 %v5059_v42, %v3660_v44  ;;  %v5051_v46 = vld [vmem:[#allocation5 + $0x1c] sm:$0xf]  ;;  %v3899_v55 = vor.u32 %v5122_v54, %v3898_v53  ;;  %v3786_v56 = vld [vmem:[#allocation7 + $0xe0] sm:$0xf]  ;;  %v5094_v57 = vld [vmem:[#allocation7 + $0xec] sm:$0xf0] }
  0x2e   :  { %3666 = vmatmul.msk.bf16.vlgmr.msra.gmra.mxu2 %vm233_vm0, %v136_v26  ;;  %v3628_v47 = vld [vmem:[#allocation5 + $0x38] sm:$0xf0]  ;;  %3668 = vmatmul.msk.bf16.vlgmr.msra.gmra.mxu0 %vm233_vm0, %v136_v26  ;;  %v4042_v58 = vld [vmem:[#allocation7 + $0x2e0] sm:$0xf]  ;;  %v3787_v59 = vor.u32 %v5094_v57, %v3786_v56  ;;  %v5158_v60 = vld [vmem:[#allocation7 + $0x2ec] sm:$0xf0] }
  0x2f   :  { %321 = vmatpush.bf16.msrb.mxu2 %v3659_v35  ;;  %v3631_v49 = vor.u32 %v5051_v46, %v3628_v47  ;;  %v4043_v61 = vor.u32 %v5158_v60, %v4042_v58  ;;  %v3882_v62 = vld [vmem:[#allocation7 + $0x1a0] sm:$0xf]  ;;  %v5118_v63 = vld [vmem:[#allocation7 + $0x1ac] sm:$0xf0]  ;;  %v5676_v10 = vmov 8.0   ;;  %s5677_s4 = smov [#allocation14]  }
  0x30   :  { %2181 = vmatpush.bf16.msrb.mxu0 %v3787_v59  ;;  %v3883_v0 = vor.u32 %v5118_v63, %v3882_v62  ;;  %v3770_v1 = vld [vmem:[#allocation7 + $0xc0] sm:$0xf]  ;;  %v5090_v2 = vld [vmem:[#allocation7 + $0xcc] sm:$0xf0]  ;;  %5426 = vrcp.f32 %v5676_v10  ;;  %s3585_s6 = sshll.u32 %s5677_s4, 4  ;;  %s3587_s18 = sshll.u32 %s6234_s7, 4  ;;  %s3586_s6 = int_to_ptr.vmem [resolvable:$true] %s3585_s6  ;;  %s3588_s18 = int_to_ptr.hbm [resolvable:$true] %s3587_s18 }
  0x31   :  { %283 = vmatpush.bf16.msrb.mxu3 %v3615_v39  ;;  %309 = vmatpush.bf16.msrb.mxu1 %v3623_v43  ;;  %v4026_v3 = vld [vmem:[#allocation7 + $0x2c0] sm:$0xf]  ;;  %v3771_v4 = vor.u32 %v5090_v2, %v3770_v1  ;;  %v5154_v5 = vld [vmem:[#allocation7 + $0x2cc] sm:$0xf0] }
  0x32   :  { %v4027_v6 = vor.u32 %v5154_v5, %v4026_v3  ;;  %v3866_v7 = vld [vmem:[#allocation7 + $0x180] sm:$0xf]  ;;  %v5114_v8 = vld [vmem:[#allocation7 + $0x18c] sm:$0xf0] }
  0x33   :  { %322 = vmatpush.bf16.msrb.mxu2 %v3627_v48  ;;  %v3867_v9 = vor.u32 %v5114_v8, %v3866_v7  ;;  %v3754_v11 = vld [vmem:[#allocation7 + $0xa0] sm:$0xf]  ;;  %v5086_v12 = vld [vmem:[#allocation7 + $0xac] sm:$0xf0] }
  0x34   :  { %2182 = vmatpush.bf16.msrb.mxu0 %v3771_v4  ;;  %v4010_v13 = vld [vmem:[#allocation7 + $0x2a0] sm:$0xf]  ;;  %v3755_v14 = vor.u32 %v5086_v12, %v3754_v11  ;;  %v5150_v15 = vld [vmem:[#allocation7 + $0x2ac] sm:$0xf0] }
  0x35   :  { %334 = vmatpush.bf16.msra.mxu3 %v3663_v45  ;;  %2194 = vmatpush.bf16.msra.mxu1 %v3915_v52  ;;  %v4011_v16 = vor.u32 %v5150_v15, %v4010_v13  ;;  %v3850_v17 = vld [vmem:[#allocation7 + $0x160] sm:$0xf]  ;;  %v5110_v18 = vld [vmem:[#allocation7 + $0x16c] sm:$0xf0] }
  0x36   :  { %v3851_v19 = vor.u32 %v5110_v18, %v3850_v17  ;;  %v5752_v20 = vpop.eup %5426  ;;  %v3738_v22 = vld [vmem:[#allocation7 + $0x80] sm:$0xf]  ;;  %v5082_v23 = vld [vmem:[#allocation7 + $0x8c] sm:$0xf0] }
  0x37   :  { %2207 = vmatpush.bf16.msra.mxu2 %v4043_v61  ;;  %v397_v21 = vmul.f32 8.0, %v5752_v20  ;;  %v3994_v24 = vld [vmem:[#allocation7 + $0x280] sm:$0xf]  ;;  %v3739_v25 = vor.u32 %v5082_v23, %v3738_v22  ;;  %v5106_v29 = vld [vmem:[#allocation7 + $0x14c] sm:$0xf0]  ;;  %vm401_vm1 = vweird.f32 %v5752_v20 }
  0x38   :  { %2183 = vmatpush.bf16.msrb.mxu0 %v3755_v14  ;;  %v3834_v28 = vld [vmem:[#allocation7 + $0x140] sm:$0xf]  ;;  %v5078_v33 = vld [vmem:[#allocation7 + $0x6c] sm:$0xf0] }
  0x39   :  { %335 = vmatpush.bf16.msra.mxu3 %v3631_v49  ;;  %2195 = vmatpush.bf16.msra.mxu1 %v3899_v55  ;;  %v398_v30 = vsub.f32 1.0, %v397_v21  ;;  %v3835_v31 = vor.u32 %v5106_v29, %v3834_v28  ;;  %v3722_v32 = vld [vmem:[#allocation7 + $0x60] sm:$0xf]  ;;  %v5142_v36 = vld [vmem:[#allocation7 + $0x26c] sm:$0xf0] }
  0x3a   :  { %v3978_v34 = vld [vmem:[#allocation7 + $0x260] sm:$0xf]  ;;  %v3723_v35 = vor.u32 %v5078_v33, %v3722_v32  ;;  %v5190_v38 = vld [vmem:[#allocation7 + $0x3ec] sm:$0xf0] }
  0x3b   :  { %2208 = vmatpush.bf16.msra.mxu2 %v4027_v6  ;;  %v4170_v37 = vld [vmem:[#allocation7 + $0x3e0] sm:$0xf]  ;;  %v3979_v40 = vor.u32 %v5142_v36, %v3978_v34  ;;  %v5102_v43 = vld [vmem:[#allocation7 + $0x12c] sm:$0xf0]  ;;  %v399_v47 = vmul.f32 %v5752_v20, %v398_v30 }
  0x3c   :  { %3667 = vmatmul.msk.bf16.vlgmr.msrb.gmra.mxu3 %vm233_vm0, %v136_v26  ;;  %3669 = vmatmul.msk.bf16.vlgmr.msrb.gmra.mxu1 %vm233_vm0, %v136_v26  ;;  %v4171_v41 = vor.u32 %v5190_v38, %v4170_v37  ;;  %v3818_v42 = vld [vmem:[#allocation7 + $0x120] sm:$0xf]  ;;  %v5074_v50 = vld [vmem:[#allocation7 + $0x4c] sm:$0xf0] }
  0x3d   :  { %2196 = vmatpush.bf16.msra.mxu1 %v3883_v0  ;;  %2184 = vmatpush.bf16.msrb.mxu0 %v3739_v25  ;;  %v3819_v46 = vor.u32 %v5102_v43, %v3818_v42  ;;  %v3706_v49 = vld [vmem:[#allocation7 + $0x40] sm:$0xf]  ;;  %v5138_v54 = vld [vmem:[#allocation7 + $0x24c] sm:$0xf0]  ;;  %v400_v3 = vadd.f32 %v5752_v20, %v399_v47 }
  0x3e   :  { %3670 = vmatmul.msk.bf16.vlgmr.msrb.gmra.mxu2 %vm233_vm0, %v136_v26  ;;  %2220 = vmatpush.bf16.msrb.mxu3 %v4171_v41  ;;  %v3707_v52 = vor.u32 %v5074_v50, %v3706_v49  ;;  %v3962_v53 = vld [vmem:[#allocation7 + $0x240] sm:$0xf]  ;;  %v5186_v58 = vld [vmem:[#allocation7 + $0x3cc] sm:$0xf0] }
  0x3f   :  { %2209 = vmatpush.bf16.msra.mxu2 %v4011_v16  ;;  %v4154_v55 = vld [vmem:[#allocation7 + $0x3c0] sm:$0xf]  ;;  %v3963_v57 = vor.u32 %v5138_v54, %v3962_v53  ;;  %v5098_v60 = vld [vmem:[#allocation7 + $0x10c] sm:$0xf0] }
  0x40   :  { %v3802_v59 = vld [vmem:[#allocation7 + $0x100] sm:$0xf]  ;;  %v4155_v63 = vor.u32 %v5186_v58, %v4154_v55  ;;  %v5254_v2 = vld [vmem:[#allocation7 + $0x5ec] sm:$0xf0] }
  0x41   :  { %2197 = vmatpush.bf16.msra.mxu1 %v3867_v9  ;;  %2185 = vmatpush.bf16.msrb.mxu0 %v3723_v35  ;;  %v3803_v0 = vor.u32 %v5098_v60, %v3802_v59  ;;  %v4426_v1 = vld [vmem:[#allocation7 + $0x5e0] sm:$0xf]  ;;  %v5070_v9 = vld [vmem:[#allocation7 + $0x2c] sm:$0xf0] }
  0x42   :  { %v4427_v7 = vor.u32 %v5254_v2, %v4426_v1  ;;  %v3690_v8 = vld [vmem:[#allocation7 + $0x20] sm:$0xf]  ;;  %2221 = vmatpush.bf16.msrb.mxu3 %v4155_v63  ;;  %v5134_v14 = vld [vmem:[#allocation7 + $0x22c] sm:$0xf0] }
  0x43   :  { %v3691_v12 = vor.u32 %v5070_v9, %v3690_v8  ;;  %v3946_v13 = vld [vmem:[#allocation7 + $0x220] sm:$0xf]  ;;  %v5182_v21 = vld [vmem:[#allocation7 + $0x3ac] sm:$0xf0] }
  0x44   :  { %v3947_v18 = vor.u32 %v5134_v14, %v3946_v13  ;;  %v4410_v29 = vld [vmem:[#allocation7 + $0x5c0] sm:$0xf]  ;;  %v5250_v30 = vld [vmem:[#allocation7 + $0x5cc] sm:$0xf0] }
  0x45   :  { %2198 = vmatpush.bf16.msra.mxu1 %v3851_v19  ;;  %2186 = vmatpush.bf16.msrb.mxu0 %v3707_v52  ;;  %v4138_v19 = vld [vmem:[#allocation7 + $0x3a0] sm:$0xf]  ;;  %v4411_v33 = vor.u32 %v5250_v30, %v4410_v29  ;;  %v5066_v35 = vld [vmem:[#allocation7 + $0xc] sm:$0xf0] }
  0x46   :  { %v3674_v34 = vld [vmem:[#allocation7] sm:$0xf]  ;;  %v5130_v41 = vld [vmem:[#allocation7 + $0x20c] sm:$0xf0] }
  0x47   :  { %v3675_v38 = vor.u32 %v5066_v35, %v3674_v34  ;;  %v4122_v42 = vld [vmem:[#allocation7 + $0x380] sm:$0xf]  ;;  %v5178_v47 = vld [vmem:[#allocation7 + $0x38c] sm:$0xf0] }
  0x48   :  { %v5222_v49 = vld [vmem:[#allocation7 + $0x4ec] sm:$0xf0]  ;;  %v4123_v53 = vor.u32 %v5178_v47, %v4122_v42  ;;  %v4554_v55 = vld [vmem:[#allocation7 + $0x6e0] sm:$0xf] }
  0x49   :  { %2199 = vmatpush.bf16.msra.mxu1 %v3835_v31  ;;  %2187 = vmatpush.bf16.msrb.mxu0 %v3691_v12  ;;  %v4394_v60 = vld [vmem:[#allocation7 + $0x5a0] sm:$0xf]  ;;  %v5282_v14 = vld [vmem:[#allocation7 + $0x6cc] sm:$0xf0] }
  0x4a   :  { %v5214_v34 = vld [vmem:[#allocation7 + $0x4ac] sm:$0xf0] }
  0x4c   :  { %3671 = vmatmul.msk.bf16.vlgmr.msra.gmra.mxu3 %vm233_vm0, %v136_v26  ;;  %v5146_v26 = vld [vmem:[#allocation7 + $0x28c] sm:$0xf0] }
  0x4d   :  { %v3995_v27 = vor.u32 %v5146_v26, %v3994_v24  ;;  %2200 = vmatpush.bf16.msra.mxu1 %v3819_v46  ;;  %v4139_v24 = vor.u32 %v5182_v21, %v4138_v19  ;;  %v5777_v26 = vsel %vm401_vm1, %v5752_v20, %v400_v3  ;;  %2188 = vmatpush.bf16.msrb.mxu0 %v3675_v38  ;;  %v4106_v3 = vld [vmem:[#allocation7 + $0x360] sm:$0xf] }
  0x4f   :  { %2210 = vmatpush.bf16.msra.mxu2 %v3995_v27  ;;  %2222 = vmatpush.bf16.msrb.mxu3 %v4139_v24 }
  0x51   :  { %2201 = vmatpush.bf16.msra.mxu1 %v3803_v0 }
  0x53   :  { %2211 = vmatpush.bf16.msra.mxu2 %v3979_v40  ;;  %v3930_v40 = vld [vmem:[#allocation7 + $0x200] sm:$0xf]  ;;  %2223 = vmatpush.bf16.msrb.mxu3 %v4123_v53 }
  0x54   :  { %v3931_v46 = vor.u32 %v5130_v41, %v3930_v40 }
  0x55   :  { %2246 = vmatpush.bf16.msrb.mxu1 %v4427_v7 }
  0x57   :  { %2212 = vmatpush.bf16.msra.mxu2 %v3963_v57 }
  0x59   :  { %2247 = vmatpush.bf16.msrb.mxu1 %v4411_v33  ;;  %v4266_v33 = vld [vmem:[#allocation7 + $0x4a0] sm:$0xf] }
  0x5b   :  { %2213 = vmatpush.bf16.msra.mxu2 %v3947_v18 }
  0x5f   :  { %2214 = vmatpush.bf16.msra.mxu2 %v3931_v46 }
  0xa9   :  { %v5755_v39 = vpop.f32.mrf.mxu1 }
  0xaa   :  { %v354_v44 = vrot.slane %v5755_v39, 4 }
  0xab   :  { %v5758_v45 = vpop.f32.mrf.mxu0 }
  0xac   :  { %v372_v48 = vrot.slane %v5758_v45, 4  ;;  %v355_v51 = vadd.f32 %v354_v44, %v5755_v39 }
  0xae   :  { %v373_v56 = vadd.f32 %v372_v48, %v5758_v45  ;;  %v356_v61 = vrot.slane %v355_v51, 2  ;;  %v4298_v48 = vld [vmem:[#allocation7 + $0x4e0] sm:$0xf] }
  0xaf   :  { %v5764_v62 = vpop.f32.mrf.mxu3  ;;  %v4299_v54 = vor.u32 %v5222_v49, %v4298_v48 }
  0xb0   :  { %v374_v4 = vrot.slane %v373_v56, 2  ;;  %v348_v5 = vrot.slane %v5764_v62, 4  ;;  %v357_v10 = vadd.f32 %v356_v61, %v355_v51  ;;  %v5246_v61 = vld [vmem:[#allocation7 + $0x5ac] sm:$0xf0] }
  0xb1   :  { %v5768_v6 = vpop.f32.mrf.mxu2  ;;  %v261_v17 = vpop.f32.mrf.mxu1  ;;  %2233 = vmatpush.bf16.msra.mxu0 %v4299_v54  ;;  %v4395_v2 = vor.u32 %v5246_v61, %v4394_v60  ;;  %v4522_v54 = vld [vmem:[#allocation7 + $0x6a0] sm:$0xf] }
  0xb2   :  { %v360_v11 = vrot.slane %v5768_v6, 4  ;;  %v375_v15 = vadd.f32 %v374_v4, %v373_v56  ;;  %v349_v16 = vadd.f32 %v348_v5, %v5764_v62  ;;  %v358_v22 = vrot.slane %v357_v10, 1  ;;  %v5286_v56 = vld [vmem:[#allocation7 + $0x6ec] sm:$0xf0]  ;;  %v4282_v5 = vld [vmem:[#allocation7 + $0x4c0] sm:$0xf] }
  0xb3   :  { %v300_v25 = vpop.f32.mrf.mxu0  ;;  %v4555_v59 = vor.u32 %v5286_v56, %v4554_v55  ;;  %v5174_v4 = vld [vmem:[#allocation7 + $0x36c] sm:$0xf0]  ;;  %2248 = vmatpush.bf16.msrb.mxu1 %v4395_v2  ;;  %v4362_v60 = vld [vmem:[#allocation7 + $0x560] sm:$0xf] }
  0xb4   :  { %v361_v23 = vadd.f32 %v360_v11, %v5768_v6  ;;  %v376_v27 = vrot.slane %v375_v15, 1  ;;  %v350_v28 = vrot.slane %v349_v16, 2  ;;  %v359_v31 = vadd.f32 %v358_v22, %v357_v10  ;;  %v5218_v10 = vld [vmem:[#allocation7 + $0x4cc] sm:$0xf0]  ;;  %v4090_v22 = vld [vmem:[#allocation7 + $0x340] sm:$0xf] }
  0xb5   :  { %2259 = vmatpush.bf16.msrb.mxu2 %v4555_v59  ;;  %v4107_v9 = vor.u32 %v5174_v4, %v4106_v3  ;;  %v4283_v13 = vor.u32 %v5218_v10, %v4282_v5  ;;  %v5278_v55 = vld [vmem:[#allocation7 + $0x6ac] sm:$0xf0] }
  0xb6   :  { %v362_v32 = vrot.slane %v361_v23, 2  ;;  %v377_v36 = vadd.f32 %v376_v27, %v375_v15  ;;  %v351_v37 = vadd.f32 %v350_v28, %v349_v16  ;;  %v404_v20 = vmul.f32 %v5777_v26, %v359_v31  ;;  %v4378_v15 = vld [vmem:[#allocation7 + $0x580] sm:$0xf]  ;;  %v5242_v16 = vld [vmem:[#allocation7 + $0x58c] sm:$0xf0] }
  0xb7   :  { %v248_v44 = vpop.f32.mrf.mxu3  ;;  %2224 = vmatpush.bf16.msrb.mxu3 %v4107_v9  ;;  %2234 = vmatpush.bf16.msra.mxu0 %v4283_v13  ;;  %v4379_v27 = vor.u32 %v5242_v16, %v4378_v15  ;;  %v5238_v4 = vld [vmem:[#allocation7 + $0x56c] sm:$0xf0]  ;;  %v4523_v9 = vor.u32 %v5278_v55, %v4522_v54 }
  0xb8   :  { %v363_v43 = vadd.f32 %v362_v32, %v361_v23  ;;  %v407_v50 = vmul.f32 %v5777_v26, %v377_v36  ;;  %v352_v51 = vrot.slane %v351_v37, 1  ;;  %v5782_v57 = vsub.f32 %v5755_v39, %v404_v20  ;;  %v5170_v23 = vld [vmem:[#allocation7 + $0x34c] sm:$0xf0] }
  0xb9   :  { %v274_v52 = vpop.f32.mrf.mxu2  ;;  %v5787_v1 = vpop.f32.mrf.mxu1  ;;  %v4091_v28 = vor.u32 %v5170_v23, %v4090_v22  ;;  %2249 = vmatpush.bf16.msrb.mxu1 %v4379_v27  ;;  %v4267_v44 = vor.u32 %v5214_v34, %v4266_v33  ;;  %v5166_v15 = vld [vmem:[#allocation7 + $0x32c] sm:$0xf0] }
  0xba   :  { %v364_v58 = vrot.slane %v363_v43, 1  ;;  %v5785_v63 = vsub.f32 %v5758_v45, %v407_v50  ;;  %v353_v0 = vadd.f32 %v352_v51, %v351_v37  ;;  %v420_v39 = vmul.f32 %v5782_v57, %v5782_v57  ;;  %v4538_v45 = vld [vmem:[#allocation7 + $0x6c0] sm:$0xf] }
  0xbb   :  { %v378_v8 = vrot.slane %v5787_v1, 4  ;;  %v4539_v21 = vor.u32 %v5282_v14, %v4538_v45  ;;  %2225 = vmatpush.bf16.msrb.mxu3 %v4091_v28  ;;  %2235 = vmatpush.bf16.msra.mxu0 %v4267_v44  ;;  %v4074_v14 = vld [vmem:[#allocation7 + $0x320] sm:$0xf] }
  0xbc   :  { %v365_v7 = vadd.f32 %v364_v58, %v363_v43  ;;  %v423_v11 = vmul.f32 %v5785_v63, %v5785_v63  ;;  %v403_v12 = vmul.f32 %v5777_v26, %v353_v0  ;;  %v433_v17 = vrot.slane %v420_v39, 4  ;;  %v342_v28 = vld [vmem:[#allocation13] ss:$8 sm:$0xf0] }
  0xbd   :  { %v379_v19 = vadd.f32 %v378_v8, %v5787_v1  ;;  %2260 = vmatpush.bf16.msrb.mxu2 %v4539_v21  ;;  %v341_v21 = vld [vmem:[#allocation13] ss:$8 sm:$0xf]  ;;  %v4075_v34 = vor.u32 %v5166_v15, %v4074_v14 }
  0xbe   :  { %v405_v18 = vmul.f32 %v5777_v26, %v365_v7  ;;  %v451_v24 = vrot.slane %v423_v11, 4  ;;  %v5798_v25 = vsub.f32 %v5764_v62, %v403_v12  ;;  %v434_v29 = vadd.f32 %v433_v17, %v420_v39  ;;  %v4506_v44 = vld [vmem:[#allocation7 + $0x680] sm:$0xf] }
  0xbf   :  { %v380_v31 = vrot.slane %v379_v19, 2  ;;  %v5803_v32 = vpop.f32.mrf.mxu3  ;;  %2226 = vmatpush.bf16.msrb.mxu3 %v4075_v34  ;;  %v4234_v15 = vld [vmem:[#allocation7 + $0x460] sm:$0xf] }
  0xc0   :  { %v5801_v30 = vsub.f32 %v5768_v6, %v405_v18  ;;  %v452_v35 = vadd.f32 %v451_v24, %v423_v11  ;;  %v419_v36 = vmul.f32 %v5798_v25, %v5798_v25  ;;  %v366_v62 = vrot.slane %v5803_v32, 4 }
  0xc1   :  { %v5808_v37 = vpop.f32.mrf.mxu2  ;;  %v435_v38 = vrot.slane %v434_v29, 2  ;;  %v381_v40 = vadd.f32 %v380_v31, %v379_v19  ;;  %v313_v46 = vpop.f32.mrf.mxu1  ;;  %2261 = vmatpush.bf16.msrb.mxu2 %v4523_v9  ;;  %v4363_v19 = vor.u32 %v5238_v4, %v4362_v60  ;;  %v4346_v4 = vld [vmem:[#allocation7 + $0x540] sm:$0xf] }
  0xc2   :  { %v421_v6 = vmul.f32 %v5801_v30, %v5801_v30  ;;  %v384_v41 = vrot.slane %v5808_v37, 4  ;;  %v453_v42 = vrot.slane %v452_v35, 2  ;;  %v427_v20 = vrot.slane %v419_v36, 4  ;;  %v5274_v46 = vld [vmem:[#allocation7 + $0x68c] sm:$0xf0] }
  0xc3   :  { %v367_v43 = vadd.f32 %v366_v62, %v5803_v32  ;;  %v436_v47 = vadd.f32 %v435_v38, %v434_v29  ;;  %v382_v49 = vrot.slane %v381_v40, 1  ;;  %2250 = vmatpush.bf16.msrb.mxu1 %v4363_v19 }
  0xc4   :  { %v439_v48 = vrot.slane %v421_v6, 4  ;;  %v385_v50 = vadd.f32 %v384_v41, %v5808_v37  ;;  %v454_v51 = vadd.f32 %v453_v42, %v452_v35  ;;  %v428_v52 = vadd.f32 %v427_v20, %v419_v36  ;;  %v5210_v41 = vld [vmem:[#allocation7 + $0x48c] sm:$0xf0] }
  0xc5   :  { %v368_v53 = vrot.slane %v367_v43, 2  ;;  %v437_v56 = vrot.slane %v436_v47, 1  ;;  %v383_v59 = vadd.f32 %v382_v49, %v381_v40  ;;  %v4250_v40 = vld [vmem:[#allocation7 + $0x480] sm:$0xf]  ;;  %v5829_v42 = vor.u32 %v342_v28, %v341_v21 }
  0xc6   :  { %v440_v58 = vadd.f32 %v439_v48, %v421_v6  ;;  %v455_v61 = vrot.slane %v454_v51, 1  ;;  %v429_v0 = vrot.slane %v428_v52, 2  ;;  %v386_v3 = vrot.slane %v385_v50, 2 }
  0xc7   :  { %v369_v2 = vadd.f32 %v368_v53, %v367_v43  ;;  %v438_v5 = vadd.f32 %v437_v56, %v436_v47  ;;  %v408_v7 = vmul.f32 %v5777_v26, %v383_v59  ;;  %v287_v8 = vpop.f32.mrf.mxu3  ;;  %v4251_v54 = vor.u32 %v5210_v41, %v4250_v40 }
  0xc8   :  { %v441_v39 = vrot.slane %v440_v58, 2  ;;  %v456_v10 = vadd.f32 %v455_v61, %v454_v51  ;;  %v430_v45 = vadd.f32 %v429_v0, %v428_v52  ;;  %v387_v12 = vadd.f32 %v386_v3, %v385_v50 }
  0xc9   :  { %v370_v11 = vrot.slane %v369_v2, 1  ;;  %v326_v13 = vpop.f32.mrf.mxu2  ;;  %v476_v16 = vmul.f32 %v438_v5, %v5777_v26  ;;  %v5818_v18 = vsub.f32 %v5787_v1, %v408_v7  ;;  %v581_v59 = vperm.slane %v5829_v42, 1  ;;  %2236 = vmatpush.bf16.msra.mxu0 %v4251_v54  ;;  %v5234_v5 = vld [vmem:[#allocation7 + $0x54c] sm:$0xf0] }
  0xca   :  { %v442_v17 = vadd.f32 %v441_v39, %v440_v58  ;;  %v479_v22 = vmul.f32 %v456_v10, %v5777_v26  ;;  %v431_v23 = vrot.slane %v430_v45, 1  ;;  %v388_v27 = vrot.slane %v387_v12, 1 }
  0xcb   :  { %v371_v24 = vadd.f32 %v370_v11, %v369_v2  ;;  %v5821_v29 = vadd.f32 1e-05, %v476_v16  ;;  %v424_v33 = vmul.f32 %v5818_v18, %v5818_v18  ;;  %v4507_v58 = vor.u32 %v5274_v46, %v4506_v44  ;;  %v5162_v11 = vld [vmem:[#allocation7 + $0x30c] sm:$0xf0] }
  0xcc   :  { %v443_v31 = vrot.slane %v442_v17, 1  ;;  %v5825_v35 = vadd.f32 1e-05, %v479_v22  ;;  %v432_v1 = vadd.f32 %v431_v23, %v430_v45  ;;  %v389_v62 = vadd.f32 %v388_v27, %v387_v12  ;;  %v4058_v45 = vld [vmem:[#allocation7 + $0x300] sm:$0xf] }
  0xcd   :  { %v406_v36 = vmul.f32 %v5777_v26, %v371_v24  ;;  %5428 = vrsqrt.f32 %v5821_v29  ;;  %v457_v6 = vrot.slane %v424_v33, 4  ;;  %v584_v60 = vperm.slane %v5829_v42, 4  ;;  %2262 = vmatpush.bf16.msrb.mxu2 %v4507_v58  ;;  %v5206_v16 = vld [vmem:[#allocation7 + $0x46c] sm:$0xf0] }
  0xce   :  { %v444_v38 = vadd.f32 %v443_v31, %v442_v17  ;;  %5430 = vrsqrt.f32 %v5825_v35  ;;  %v475_v20 = vmul.f32 %v432_v1, %v5777_v26  ;;  %v409_v49 = vmul.f32 %v5777_v26, %v389_v62 }
  0xcf   :  { %v5834_v43 = vsub.f32 %v5803_v32, %v406_v36  ;;  %v458_v48 = vadd.f32 %v457_v6, %v424_v33  ;;  %v5838_v50 = vpop.f32.mrf.mxu3  ;;  %v580_v8 = vperm.slane %v5829_v42, 0  ;;  %v582_v9 = vperm.slane %v5829_v42, 2 }
  0xd0   :  { %v477_v47 = vmul.f32 %v444_v38, %v5777_v26  ;;  %v5840_v51 = vadd.f32 1e-05, %v475_v20  ;;  %v390_v53 = vrot.slane %v5838_v50, 4  ;;  %v5848_v56 = vsub.f32 %v5808_v37, %v409_v49 }
  0xd1   :  { %v422_v52 = vmul.f32 %v5834_v43, %v5834_v43  ;;  %v459_v32 = vrot.slane %v458_v48, 2  ;;  %vm507_vm2 = vweird.f32 %v5821_v29  ;;  %v4347_v21 = vor.u32 %v5234_v5, %v4346_v4  ;;  %v4490_v5 = vld [vmem:[#allocation7 + $0x660] sm:$0xf] }
  0xd2   :  { %v5845_v55 = vadd.f32 1e-05, %v477_v47  ;;  %5432 = vrsqrt.f32 %v5840_v51  ;;  %v425_v3 = vmul.f32 %v5848_v56, %v5848_v56  ;;  %v391_v37 = vadd.f32 %v390_v53, %v5838_v50 }
  0xd3   :  { %v445_v61 = vrot.slane %v422_v52, 4  ;;  %v5853_v0 = vpop.eup %5428  ;;  %v460_v2 = vadd.f32 %v459_v32, %v458_v48  ;;  %v4059_v28 = vor.u32 %v5162_v11, %v4058_v45  ;;  %2251 = vmatpush.bf16.msrb.mxu1 %v4347_v21  ;;  %v4235_v36 = vor.u32 %v5206_v16, %v4234_v15  ;;  %v4682_v11 = vld [vmem:[#allocation7 + $0x7e0] sm:$0xf] }
  0xd4   :  { %5434 = vrsqrt.f32 %v5845_v55  ;;  %v5859_v39 = vpop.eup %5430  ;;  %v502_v7 = vmul.f32 %v5853_v0, %v5821_v29  ;;  %v463_v14 = vrot.slane %v425_v3, 4  ;;  %v392_v24 = vrot.slane %v391_v37, 2 }
  0xd5   :  { %v446_v10 = vadd.f32 %v445_v61, %v422_v52  ;;  %v532_v12 = vmul.f32 %v5859_v39, %v5825_v35  ;;  %v461_v13 = vrot.slane %v460_v2, 1  ;;  %vm497_vm3 = vweird.f32 %v5840_v51  ;;  %2227 = vmatpush.bf16.msrb.mxu3 %v4059_v28  ;;  %2237 = vmatpush.bf16.msra.mxu0 %v4235_v36  ;;  %v5266_v36 = vld [vmem:[#allocation7 + $0x64c] sm:$0xf0] }
  0xd6   :  { %v503_v17 = vmul.f32 %v5853_v0, %v502_v7  ;;  %v464_v23 = vadd.f32 %v463_v14, %v425_v3  ;;  %v585_v40 = vperm.slane %v5829_v42, 5  ;;  %vm508_vm4 = vweird.f32 %v5853_v0  ;;  %v5270_v7 = vld [vmem:[#allocation7 + $0x66c] sm:$0xf0] }
  0xd7   :  { %v447_v19 = vrot.slane %v446_v10, 2  ;;  %v462_v22 = vadd.f32 %v461_v13, %v460_v2  ;;  %v339_v27 = vpop.f32.mrf.mxu3  ;;  %v533_v34 = vmul.f32 %v5859_v39, %v532_v12  ;;  %vm537_vm5 = vweird.f32 %v5825_v35  ;;  %vm5895_vm7 = vmor %vm507_vm2, %vm508_vm4  ;;  %v5318_v12 = vld [vmem:[#allocation7 + $0x7ec] sm:$0xf0]  ;;  %v5965_v35 = vld [vmem:[#allocation7 + $0x1e4] sm:$0xf] }
  0xd8   :  { %v5869_v31 = vpop.eup %5432  ;;  %v504_v33 = vmul.f32 0.5, %v503_v17  ;;  %v465_v48 = vrot.slane %v464_v23, 2  ;;  %v393_v49 = vadd.f32 %v392_v24, %v391_v37  ;;  %vm517_vm6 = vweird.f32 %v5845_v55  ;;  %v4330_v17 = vld [vmem:[#allocation7 + $0x520] sm:$0xf]  ;;  %v5202_v24 = vld [vmem:[#allocation7 + $0x44c] sm:$0xf0] }
  0xd9   :  { %v448_v1 = vadd.f32 %v447_v19, %v446_v10  ;;  %v492_v38 = vmul.f32 %v5869_v31, %v5840_v51  ;;  %v480_v6 = vmul.f32 %v462_v22, %v5777_v26  ;;  %v534_v53 = vmul.f32 0.5, %v533_v34  ;;  %v5230_v19 = vld [vmem:[#allocation7 + $0x52c] sm:$0xf0]  ;;  %v4474_v27 = vld [vmem:[#allocation7 + $0x640] sm:$0xf] }
  0xda   :  { %v5872_v62 = vpop.eup %5434  ;;  %v505_v41 = vsub.f32 1.5, %v504_v33  ;;  %v583_v61 = vperm.slane %v5829_v42, 3  ;;  %vm498_vm8 = vweird.f32 %v5869_v31  ;;  %v466_v4 = vadd.f32 %v465_v48, %v464_v23  ;;  %v4314_v48 = vld [vmem:[#allocation7 + $0x500] sm:$0xf]  ;;  %v5258_v33 = vld [vmem:[#allocation7 + $0x60c] sm:$0xf0] }
  0xdb   :  { %v512_v20 = vmul.f32 %v5872_v62, %v5845_v55  ;;  %v449_v44 = vrot.slane %v448_v1, 1  ;;  %v493_v46 = vmul.f32 %v5869_v31, %v492_v38  ;;  %v5884_v47 = vadd.f32 1e-05, %v480_v6  ;;  %vm5914_vm11 = vmor %vm497_vm3, %vm498_vm8  ;;  %v4666_v38 = vld [vmem:[#allocation7 + $0x7c0] sm:$0xf] }
  0xdc   :  { %v506_v52 = vmul.f32 %v5853_v0, %v505_v41  ;;  %vm518_vm9 = vweird.f32 %v5872_v62  ;;  %v394_v29 = vrot.slane %v393_v49, 1  ;;  %v535_v13 = vsub.f32 1.5, %v534_v53  ;;  %v346_v53 = vld [vmem:[#allocation13 + $0x1] ss:$8 sm:$0xf0] }
  0xdd   :  { %v513_v54 = vmul.f32 %v5872_v62, %v512_v20  ;;  %v450_v32 = vadd.f32 %v449_v44, %v448_v1  ;;  %v494_v58 = vmul.f32 0.5, %v493_v46  ;;  %5436 = vrsqrt.f32 %v5884_v47  ;;  %vm5930_vm12 = vmor %vm517_vm6, %vm518_vm9  ;;  %v5314_v46 = vld [vmem:[#allocation7 + $0x7cc] sm:$0xf0] }
  0xde   :  { %v510_v10 = vsel %vm5895_vm7, %v5853_v0, %v506_v52  ;;  %v467_v16 = vrot.slane %v466_v4, 1  ;;  %vm538_vm10 = vweird.f32 %v5859_v39  ;;  %v395_v22 = vadd.f32 %v394_v29, %v393_v49  ;;  %v4218_v0 = vld [vmem:[#allocation7 + $0x440] sm:$0xf] }
  0xdf   :  { %v514_v3 = vmul.f32 0.5, %v513_v54  ;;  %v478_v37 = vmul.f32 %v450_v32, %v5777_v26  ;;  %v495_v45 = vsub.f32 1.5, %v494_v58  ;;  %v4491_v23 = vor.u32 %v5270_v7, %v4490_v5  ;;  %v345_v52 = vld [vmem:[#allocation13 + $0x1] ss:$8 sm:$0xf]  ;;  %vm5955_vm14 = vmor %vm537_vm5, %vm538_vm10 }
  0xe0   :  { %v572_v28 = vmul.f32 %v510_v10, %v5782_v57  ;;  %v586_v1 = vperm.slane %v5829_v42, 6  ;;  %v468_v41 = vadd.f32 %v467_v16, %v466_v4  ;;  %v410_v20 = vmul.f32 %v5777_v26, %v395_v22  ;;  %v5198_v4 = vld [vmem:[#allocation7 + $0x42c] sm:$0xf0]  ;;  %v4458_v10 = vld [vmem:[#allocation7 + $0x620] sm:$0xf] }
  0xe1   :  { %v515_v14 = vsub.f32 1.5, %v514_v3  ;;  %v5905_v15 = vadd.f32 1e-05, %v478_v37  ;;  %v496_v21 = vmul.f32 %v5869_v31, %v495_v45  ;;  %2263 = vmatpush.bf16.msrb.mxu2 %v4491_v23  ;;  %v4683_v44 = vor.u32 %v5318_v12, %v4682_v11  ;;  %v5226_v3 = vld [vmem:[#allocation7 + $0x50c] sm:$0xf0] }
  0xe2   :  { %v5936_v49 = vmul.f32 %v5859_v39, %v535_v13  ;;  %vm547_vm13 = vweird.f32 %v5884_v47  ;;  %v481_v32 = vmul.f32 %v468_v41, %v5777_v26  ;;  %v5947_v58 = vsub.f32 %v5838_v50, %v410_v20  ;;  %v4202_v37 = vld [vmem:[#allocation7 + $0x420] sm:$0xf]  ;;  %v5262_v45 = vld [vmem:[#allocation7 + $0x62c] sm:$0xf0]  ;;  %v5967_v13 = vld [vmem:[#allocation7 + $0x1f0] sm:$0xf0] }
  0xe3   :  { %v516_v34 = vmul.f32 %v5872_v62, %v515_v14  ;;  %5438 = vrsqrt.f32 %v5905_v15  ;;  %v5921_v6 = vpop.eup %5436  ;;  %v500_v57 = vsel %vm5914_vm11, %v5869_v31, %v496_v21  ;;  %2272 = vmatpush.bf16.msra.mxu3 %v4683_v44  ;;  %v4331_v2 = vor.u32 %v5230_v19, %v4330_v17  ;;  %v4650_v14 = vld [vmem:[#allocation7 + $0x7a0] sm:$0xf]  ;;  %v5310_v16 = vld [vmem:[#allocation7 + $0x7ac] sm:$0xf0] }
  0xe4   :  { %v542_v55 = vmul.f32 %v5921_v6, %v5884_v47  ;;  %v571_v54 = vmul.f32 %v500_v57, %v5798_v25  ;;  %v4219_v50 = vor.u32 %v5202_v24, %v4218_v0  ;;  %v4475_v7 = vor.u32 %v5266_v36, %v4474_v27  ;;  %v4186_v22 = vld [vmem:[#allocation7 + $0x400] sm:$0xf]  ;;  %v5194_v23 = vld [vmem:[#allocation7 + $0x40c] sm:$0xf0] }
  0xe5   :  { %v520_v31 = vsel %vm5930_vm12, %v5872_v62, %v516_v34  ;;  %v597_v62 = vmul.f32 %v581_v59, %v572_v28  ;;  %v5961_v11 = vadd.f32 1e-05, %v481_v32  ;;  %v426_v59 = vmul.f32 %v5947_v58, %v5947_v58  ;;  %2252 = vmatpush.bf16.msrb.mxu1 %v4331_v2  ;;  %v4442_v28 = vld [vmem:[#allocation7 + $0x600] sm:$0xf]  ;;  %v5306_v41 = vld [vmem:[#allocation7 + $0x78c] sm:$0xf0] }
  0xe6   :  { %v543_v25 = vmul.f32 %v5921_v6, %v542_v55  ;;  %v573_v29 = vmul.f32 %v520_v31, %v5801_v30  ;;  %v4667_v12 = vor.u32 %v5314_v46, %v4666_v38  ;;  %vm548_vm15 = vweird.f32 %v5921_v6  ;;  %2238 = vmatpush.bf16.msra.mxu0 %v4219_v50  ;;  %2264 = vmatpush.bf16.msrb.mxu2 %v4475_v7  ;;  %v4634_v34 = vld [vmem:[#allocation7 + $0x780] sm:$0xf]  ;;  %v6008_v7 = vld [vmem:[#allocation7 + $0xf0] sm:$0xf0] }
  0xe7   :  { %v4315_v30 = vor.u32 %v5226_v3, %v4314_v48  ;;  %v5972_v21 = vor.u32 %v346_v53, %v345_v52  ;;  %v540_v0 = vsel %vm5955_vm14, %v5859_v39, %v5936_v49  ;;  %v596_v24 = vmul.f32 %v580_v8, %v571_v54  ;;  %vm5990_vm0 = vmor %vm547_vm13, %vm548_vm15  ;;  %v5998_v53 = vld [vmem:[#allocation7 + $0x1c4] sm:$0xf]  ;;  %v6000_v54 = vld [vmem:[#allocation7 + $0x1d0] sm:$0xf0] }
  0xe8   :  { %v544_v19 = vmul.f32 0.5, %v543_v25  ;;  %5440 = vrsqrt.f32 %v5961_v11  ;;  %2273 = vmatpush.bf16.msra.mxu3 %v4667_v12  ;;  %v469_v38 = vrot.slane %v426_v59, 4  ;;  %v4203_v51 = vor.u32 %v5198_v4, %v4202_v37  ;;  %v6002_v37 = vld [vmem:[#allocation7 + $0xe4] sm:$0xf]  ;;  %v4586_v5 = vld [vmem:[#allocation7 + $0x720] sm:$0xf] }
  0xe9   :  { %v5969_v17 = vpop.eup %5438  ;;  %v606_v57 = vperm.slane %v5972_v21, 1  ;;  %v598_v20 = vmul.f32 %v582_v9, %v573_v29  ;;  %2253 = vmatpush.bf16.msrb.mxu1 %v4315_v30  ;;  %v4459_v46 = vor.u32 %v5262_v45, %v4458_v10  ;;  %v4651_v48 = vor.u32 %v5310_v16, %v4650_v14  ;;  %v4618_v14 = vld [vmem:[#allocation7 + $0x760] sm:$0xf]  ;;  %v5302_v16 = vld [vmem:[#allocation7 + $0x76c] sm:$0xf0] }
  0xea   :  { %v522_v27 = vmul.f32 %v5969_v17, %v5905_v15  ;;  %v545_v36 = vsub.f32 1.5, %v544_v19  ;;  %v470_v55 = vadd.f32 %v469_v38, %v426_v59  ;;  %v3919_v9 = vor.u32 %v5965_v35, %v5967_v13  ;;  %2239 = vmatpush.bf16.msra.mxu0 %v4203_v51  ;;  %v3884_v38 = vld [vmem:[#allocation7 + $0x1b0] sm:$0xf0]  ;;  %v5088_v51 = vld [vmem:[#allocation7 + $0xc4] sm:$0xf] }
  0xeb   :  { %v622_v52 = vadd.f32 %v606_v57, %v597_v62  ;;  %2265 = vmatpush.bf16.msrb.mxu2 %v4459_v46  ;;  %v4187_v32 = vor.u32 %v5194_v23, %v4186_v22  ;;  %v4443_v2 = vor.u32 %v5258_v33, %v4442_v28  ;;  %v4635_v3 = vor.u32 %v5306_v41, %v4634_v34  ;;  %v5156_v22 = vld [vmem:[#allocation7 + $0x2e4] sm:$0xf] }
  0xec   :  { %v523_v44 = vmul.f32 %v5969_v17, %v522_v27  ;;  %v546_v31 = vmul.f32 %v5921_v6, %v545_v36  ;;  %2274 = vmatpush.bf16.msra.mxu3 %v4651_v48  ;;  %v471_v62 = vrot.slane %v470_v55, 2  ;;  %v605_v50 = vperm.slane %v5972_v21, 0  ;;  %v5116_v34 = vld [vmem:[#allocation7 + $0x1a4] sm:$0xf]  ;;  %v4602_v48 = vld [vmem:[#allocation7 + $0x740] sm:$0xf] }
  0xed   :  { %v630_v25 = vmax.f32 %v622_v52, 0.0  ;;  %vm528_vm1 = vweird.f32 %v5969_v17  ;;  %v607_v59 = vperm.slane %v5972_v21, 2  ;;  %v3903_v13 = vor.u32 %v5998_v53, %v6000_v54  ;;  %v3772_v52 = vld [vmem:[#allocation7 + $0xd0] sm:$0xf0]  ;;  %v5112_v49 = vld [vmem:[#allocation7 + $0x184] sm:$0xf] }
  0xee   :  { %v524_v47 = vmul.f32 0.5, %v523_v44  ;;  %v550_v4 = vsel %vm5990_vm0, %v5921_v6, %v546_v31  ;;  %v6010_v10 = vpop.eup %5440  ;;  %v472_v35 = vadd.f32 %v471_v62, %v470_v55  ;;  %2240 = vmatpush.bf16.msra.mxu0 %v4187_v32  ;;  %vm527_vm2 = vweird.f32 %v5905_v15  ;;  %v4044_v15 = vld [vmem:[#allocation7 + $0x2f0] sm:$0xf0]  ;;  %v5298_v31 = vld [vmem:[#allocation7 + $0x74c] sm:$0xf0] }
  0xef   :  { %v576_v45 = vmul.f32 %v550_v4, %v5818_v18  ;;  %v552_v12 = vmul.f32 %v6010_v10, %v5961_v11  ;;  %v6017_v6 = vpack.c.bf16 %v630_v25, %v630_v25  ;;  %2266 = vmatpush.bf16.msrb.mxu2 %v4443_v2  ;;  %v621_v18 = vadd.f32 %v605_v50, %v596_v24  ;;  %vm529_vm3 = vmor %vm527_vm2, %vm528_vm1  ;;  %v5294_v32 = vld [vmem:[#allocation7 + $0x72c] sm:$0xf0]  ;;  %v5084_v25 = vld [vmem:[#allocation7 + $0xa4] sm:$0xf] }
  0xf0   :  { %v525_v29 = vsub.f32 1.5, %v524_v47  ;;  %2275 = vmatpush.bf16.msra.mxu3 %v4635_v3  ;;  %v3791_v30 = vor.u32 %v6002_v37, %v6008_v7  ;;  %v473_v28 = vrot.slane %v472_v35, 1  ;;  %v623_v33 = vadd.f32 %v607_v59, %v598_v20  ;;  %v3756_v50 = vld [vmem:[#allocation7 + $0xb0] sm:$0xf0] }
  0xf1   :  { %v601_v23 = vmul.f32 %v585_v40, %v576_v45  ;;  %v553_v27 = vmul.f32 %v6010_v10, %v552_v12  ;;  %2202 = vmatmul.bf16.vlgmr.msra.gmra.mxu1 %v6017_v6  ;;  %v629_v36 = vmax.f32 %v621_v18, 0.0  ;;  %v4619_v57 = vor.u32 %v5302_v16, %v4618_v14  ;;  %v4012_v59 = vld [vmem:[#allocation7 + $0x2b0] sm:$0xf0]  ;;  %v4570_v16 = vld [vmem:[#allocation7 + $0x700] sm:$0xf] }
  0xf2   :  { %v526_v19 = vmul.f32 %v5969_v17, %v525_v29  ;;  %2298 = vmatpush.bf16.msra.mxu1 %v3919_v9  ;;  %v610_v40 = vperm.slane %v5972_v21, 5  ;;  %v474_v44 = vadd.f32 %v473_v28, %v472_v35  ;;  %v631_v46 = vmax.f32 %v623_v33, 0.0  ;;  %v4028_v9 = vld [vmem:[#allocation7 + $0x2d0] sm:$0xf0]  ;;  %v5148_v29 = vld [vmem:[#allocation7 + $0x2a4] sm:$0xf] }
  0xf3   :  { %v554_v8 = vmul.f32 0.5, %v553_v27  ;;  %vm557_vm4 = vweird.f32 %v5961_v11  ;;  %v6041_v20 = vpack.c.bf16 %v629_v36, %v629_v36  ;;  %v4047_v55 = vor.u32 %v5156_v22, %v4044_v15  ;;  %v5108_v18 = vld [vmem:[#allocation7 + $0x164] sm:$0xf]  ;;  %v4172_v15 = vld [vmem:[#allocation7 + $0x3f0] sm:$0xf0] }
  0xf4   :  { %v530_v24 = vsel %vm529_vm3, %v5969_v17, %v526_v19  ;;  %v575_v17 = vmul.f32 %v540_v0, %v5785_v63  ;;  %2276 = vmatpush.bf16.msra.mxu3 %v4619_v57  ;;  %vm558_vm5 = vweird.f32 %v6010_v10  ;;  %v482_v47 = vmul.f32 %v474_v44, %v5777_v26  ;;  %v3868_v0 = vld [vmem:[#allocation7 + $0x190] sm:$0xf0]  ;;  %v5188_v33 = vld [vmem:[#allocation7 + $0x3e4] sm:$0xf] }
  0xf5   :  { %v574_v41 = vmul.f32 %v530_v24, %v5834_v43  ;;  %v5152_v43 = vld [vmem:[#allocation7 + $0x2c4] sm:$0xf]  ;;  %v555_v53 = vsub.f32 1.5, %v554_v8  ;;  %v6045_v54 = vpack.c.bf16 %v631_v46, %v631_v46  ;;  %2189 = vmatmul.bf16.vlgmr.msrb.gmra.mxu0 %v6041_v20  ;;  %v3887_v39 = vor.u32 %v5116_v34, %v3884_v38  ;;  %vm559_vm6 = vmor %vm557_vm4, %vm558_vm5  ;;  %v3740_v24 = vld [vmem:[#allocation7 + $0x90] sm:$0xf0] }
  0xf6   :  { %2299 = vmatpush.bf16.msra.mxu1 %v3903_v13  ;;  %v4603_v2 = vor.u32 %v5298_v31, %v4602_v48  ;;  %v608_v3 = vperm.slane %v5972_v21, 3  ;;  %v6052_v4 = vadd.f32 1e-05, %v482_v47  ;;  %2285 = vmatpush.bf16.msrb.mxu0 %v3791_v30  ;;  %v3775_v62 = vor.u32 %v5088_v51, %v3772_v52  ;;  %v3852_v30 = vld [vmem:[#allocation7 + $0x170] sm:$0xf0] }
  0xf7   :  { %v599_v63 = vmul.f32 %v583_v61, %v574_v41  ;;  %v556_v37 = vmul.f32 %v6010_v10, %v555_v53  ;;  %2215 = vmatmul.bf16.vlgmr.msra.gmra.mxu2 %v6045_v54  ;;  %v626_v61 = vadd.f32 %v610_v40, %v601_v23  ;;  %v600_v7 = vmul.f32 %v584_v60, %v575_v17  ;;  %v5290_v60 = vld [vmem:[#allocation7 + $0x70c] sm:$0xf0]  ;;  %v5080_v34 = vld [vmem:[#allocation7 + $0x84] sm:$0xf]  ;;  %v3996_v40 = vld [vmem:[#allocation7 + $0x290] sm:$0xf0] }
  0xf8   :  { %2311 = vmatpush.bf16.msra.mxu2 %v4047_v55  ;;  %v4031_v45 = vor.u32 %v5152_v43, %v4028_v9  ;;  %2277 = vmatpush.bf16.msra.mxu3 %v4603_v2  ;;  %v4587_v12 = vor.u32 %v5294_v32, %v4586_v5  ;;  %v609_v35 = vperm.slane %v5972_v21, 4  ;;  %5442 = vrsqrt.f32 %v6052_v4  ;;  %v5144_v51 = vld [vmem:[#allocation7 + $0x284] sm:$0xf]  ;;  %v3836_v17 = vld [vmem:[#allocation7 + $0x150] sm:$0xf0] }
  0xf9   :  { %v560_v13 = vsel %vm559_vm6, %v6010_v10, %v556_v37  ;;  %v634_v14 = vmax.f32 %v626_v61, 0.0  ;;  %v3871_v11 = vor.u32 %v5112_v49, %v3868_v0  ;;  %v624_v22 = vadd.f32 %v608_v3, %v599_v63  ;;  %v5104_v31 = vld [vmem:[#allocation7 + $0x144] sm:$0xf]  ;;  %v3724_v47 = vld [vmem:[#allocation7 + $0x70] sm:$0xf0] }
  0xfa   :  { %v577_v19 = vmul.f32 %v560_v13, %v5848_v56  ;;  %2300 = vmatpush.bf16.msra.mxu1 %v3887_v39  ;;  %2286 = vmatpush.bf16.msrb.mxu0 %v3775_v62  ;;  %v3759_v23 = vor.u32 %v5084_v25, %v3756_v50  ;;  %v4015_v27 = vor.u32 %v5148_v29, %v4012_v59  ;;  %v611_v28 = vperm.slane %v5972_v21, 6  ;;  %v5076_v55 = vld [vmem:[#allocation7 + $0x64] sm:$0xf]  ;;  %v3980_v32 = vld [vmem:[#allocation7 + $0x270] sm:$0xf0] }
  0xfb   :  { %v4571_v56 = vor.u32 %v5290_v60, %v4570_v16  ;;  %v632_v36 = vmax.f32 %v624_v22, 0.0  ;;  %v625_v38 = vadd.f32 %v609_v35, %v600_v7  ;;  %v6068_v57 = vpack.c.bf16 %v634_v14, %v634_v14  ;;  %v5140_v5 = vld [vmem:[#allocation7 + $0x264] sm:$0xf]  ;;  %v4156_v39 = vld [vmem:[#allocation7 + $0x3d0] sm:$0xf0] }
  0xfc   :  { %v602_v10 = vmul.f32 %v586_v1, %v577_v19  ;;  %2312 = vmatpush.bf16.msra.mxu2 %v4031_v45  ;;  %2278 = vmatpush.bf16.msra.mxu3 %v4587_v12  ;;  %v3855_v41 = vor.u32 %v5108_v18, %v3852_v30  ;;  %v4175_v46 = vor.u32 %v5188_v33, %v4172_v15  ;;  %v5184_v63 = vld [vmem:[#allocation7 + $0x3c4] sm:$0xf]  ;;  %v3820_v62 = vld [vmem:[#allocation7 + $0x130] sm:$0xf0]  ;;  %vm567_vm8 = vweird.f32 %v6052_v4 }
  0xfd   :  { %v6070_v8 = vpack.c.bf16 %v632_v36, %v632_v36  ;;  %v3743_v1 = vor.u32 %v5080_v34, %v3740_v24  ;;  %v3999_v43 = vor.u32 %v5144_v51, %v3996_v40  ;;  %v633_v9 = vmax.f32 %v625_v38, 0.0  ;;  %v5100_v37 = vld [vmem:[#allocation7 + $0x124] sm:$0xf]  ;;  %v3708_v45 = vld [vmem:[#allocation7 + $0x50] sm:$0xf0] }
  0xfe   :  { %2301 = vmatpush.bf16.msra.mxu1 %v3871_v11  ;;  %v627_v44 = vadd.f32 %v611_v28, %v602_v10  ;;  %v6072_v48 = vpop.eup %5442  ;;  %2287 = vmatpush.bf16.msrb.mxu0 %v3759_v23  ;;  %v3839_v0 = vor.u32 %v5104_v31, %v3836_v17  ;;  %v3727_v3 = vor.u32 %v5076_v55, %v3724_v47  ;;  %v5072_v25 = vld [vmem:[#allocation7 + $0x44] sm:$0xf]  ;;  %v3964_v12 = vld [vmem:[#allocation7 + $0x250] sm:$0xf0]  ;;  %v587_v34 = vperm.slane %v5829_v42, 7 }
  0xff   :  { %v562_v52 = vmul.f32 %v6072_v48, %v6052_v4  ;;  %2228 = vmatmul.bf16.vlgmr.msrb.gmra.mxu3 %v6070_v8  ;;  %v6081_v61 = vpack.c.bf16 %v633_v9, %v633_v9  ;;  %v3983_v7 = vor.u32 %v5140_v5, %v3980_v32  ;;  %v5136_v29 = vld [vmem:[#allocation7 + $0x244] sm:$0xf]  ;;  %v4159_v59 = vor.u32 %v5184_v63, %v4156_v39  ;;  %v4140_v13 = vld [vmem:[#allocation7 + $0x3b0] sm:$0xf0] }
 0x100   :  { %2313 = vmatpush.bf16.msra.mxu2 %v4015_v27  ;;  %2279 = vmatpush.bf16.msra.mxu3 %v4571_v56  ;;  %v635_v53 = vmax.f32 %v627_v44, 0.0  ;;  %v5180_v35 = vld [vmem:[#allocation7 + $0x3a4] sm:$0xf]  ;;  %vm568_vm7 = vweird.f32 %v6072_v48  ;;  %v3823_v16 = vor.u32 %v5100_v37, %v3820_v62  ;;  %v3804_v19 = vld [vmem:[#allocation7 + $0x110] sm:$0xf0]  ;;  %v3711_v11 = vor.u32 %v5072_v25, %v3708_v45 }
 0x101   :  { %2254 = vmatmul.bf16.vlgmr.msrb.gmra.mxu1 %v6068_v57  ;;  %v563_v49 = vmul.f32 %v6072_v48, %v562_v52  ;;  %v5096_v60 = vld [vmem:[#allocation7 + $0x104] sm:$0xf]  ;;  %v4428_v30 = vld [vmem:[#allocation7 + $0x5f0] sm:$0xf0]  ;;  %v3967_v27 = vor.u32 %v5136_v29, %v3964_v12  ;;  %v4143_v10 = vor.u32 %v5180_v35, %v4140_v13  ;;  %vm569_vm9 = vmor %vm567_vm8, %vm568_vm7 }
 0x102   :  { %2302 = vmatpush.bf16.msra.mxu1 %v3855_v41  ;;  %2288 = vmatpush.bf16.msrb.mxu0 %v3743_v1  ;;  %v6079_v2 = vpack.c.bf16 %v635_v53, %v635_v53  ;;  %v5252_v18 = vld [vmem:[#allocation7 + $0x5e4] sm:$0xf]  ;;  %v3692_v28 = vld [vmem:[#allocation7 + $0x30] sm:$0xf0]  ;;  %v3807_v38 = vor.u32 %v5096_v60, %v3804_v19 }
 0x103   :  { %v564_v50 = vmul.f32 0.5, %v563_v49  ;;  %v5068_v22 = vld [vmem:[#allocation7 + $0x24] sm:$0xf]  ;;  %v3948_v15 = vld [vmem:[#allocation7 + $0x230] sm:$0xf0]  ;;  %v4431_v51 = vor.u32 %v5252_v18, %v4428_v30 }
 0x104   :  { %2324 = vmatpush.bf16.msrb.mxu3 %v4175_v46  ;;  %2314 = vmatpush.bf16.msra.mxu2 %v3999_v43  ;;  %v5132_v33 = vld [vmem:[#allocation7 + $0x224] sm:$0xf]  ;;  %v4124_v56 = vld [vmem:[#allocation7 + $0x390] sm:$0xf0]  ;;  %v3695_v40 = vor.u32 %v5068_v22, %v3692_v28  ;;  %v612_v46 = vperm.slane %v5972_v21, 7 }
 0x105   :  { %v565_v14 = vsub.f32 1.5, %v564_v50  ;;  %2241 = vmatmul.bf16.vlgmr.msra.gmra.mxu0 %v6081_v61  ;;  %v5176_v24 = vld [vmem:[#allocation7 + $0x384] sm:$0xf]  ;;  %v4412_v44 = vld [vmem:[#allocation7 + $0x5d0] sm:$0xf0]  ;;  %v3951_v1 = vor.u32 %v5132_v33, %v3948_v15 }
 0x106   :  { %2303 = vmatpush.bf16.msra.mxu1 %v3839_v0  ;;  %2289 = vmatpush.bf16.msrb.mxu0 %v3727_v3  ;;  %v5248_v41 = vld [vmem:[#allocation7 + $0x5c4] sm:$0xf]  ;;  %v3676_v42 = vld [vmem:[#allocation7 + $0x10] sm:$0xf0]  ;;  %v4127_v55 = vor.u32 %v5176_v24, %v4124_v56 }
 0x107   :  { %2267 = vmatmul.bf16.vlgmr.msrb.gmra.mxu2 %v6079_v2  ;;  %v566_v23 = vmul.f32 %v6072_v48, %v565_v14  ;;  %v5064_v31 = vld [vmem:[#allocation7 + $0x4] sm:$0xf]  ;;  %v4300_v9 = vld [vmem:[#allocation7 + $0x4f0] sm:$0xf0]  ;;  %v4415_v47 = vor.u32 %v5248_v41, %v4412_v44 }
 0x108   :  { %2315 = vmatpush.bf16.msra.mxu2 %v3983_v7  ;;  %2325 = vmatpush.bf16.msrb.mxu3 %v4159_v59  ;;  %v5128_v17 = vld [vmem:[#allocation7 + $0x204] sm:$0xf]  ;;  %v4556_v53 = vld [vmem:[#allocation7 + $0x6f0] sm:$0xf0]  ;;  %v3679_v5 = vor.u32 %v5064_v31, %v3676_v42 }
 0x109   :  { %v570_v36 = vsel %vm569_vm9, %v6072_v48, %v566_v23  ;;  %v3932_v48 = vld [vmem:[#allocation7 + $0x210] sm:$0xf0]  ;;  %v5220_v43 = vld [vmem:[#allocation7 + $0x4e4] sm:$0xf] }
 0x10a   :  { %2304 = vmatpush.bf16.msra.mxu1 %v3823_v16  ;;  %v578_v4 = vmul.f32 %v570_v36, %v5947_v58  ;;  %2290 = vmatpush.bf16.msrb.mxu0 %v3711_v11  ;;  %v5284_v58 = vld [vmem:[#allocation7 + $0x6e4] sm:$0xf]  ;;  %v4108_v63 = vld [vmem:[#allocation7 + $0x370] sm:$0xf0]  ;;  %v3935_v39 = vor.u32 %v5128_v17, %v3932_v48  ;;  %v4303_v49 = vor.u32 %v5220_v43, %v4300_v9 }
 0x10b   :  { %v5172_v21 = vld [vmem:[#allocation7 + $0x364] sm:$0xf]  ;;  %v4396_v3 = vld [vmem:[#allocation7 + $0x5b0] sm:$0xf0]  ;;  %v4559_v37 = vor.u32 %v5284_v58, %v4556_v53 }
 0x10c   :  { %2316 = vmatpush.bf16.msra.mxu2 %v3967_v27  ;;  %2326 = vmatpush.bf16.msrb.mxu3 %v4143_v10  ;;  %v603_v52 = vmul.f32 %v587_v34, %v578_v4  ;;  %v5244_v0 = vld [vmem:[#allocation7 + $0x5a4] sm:$0xf]  ;;  %v4284_v50 = vld [vmem:[#allocation7 + $0x4d0] sm:$0xf0]  ;;  %v4111_v7 = vor.u32 %v5172_v21, %v4108_v63 }
 0x10d   :  { %v5216_v25 = vld [vmem:[#allocation7 + $0x4c4] sm:$0xf]  ;;  %v4540_v29 = vld [vmem:[#allocation7 + $0x6d0] sm:$0xf0]  ;;  %v4399_v59 = vor.u32 %v5244_v0, %v4396_v3 }
 0x10e   :  { %2305 = vmatpush.bf16.msra.mxu1 %v3807_v38  ;;  %2291 = vmatpush.bf16.msrb.mxu0 %v3695_v40  ;;  %v628_v32 = vadd.f32 %v612_v46, %v603_v52  ;;  %v5280_v45 = vld [vmem:[#allocation7 + $0x6c4] sm:$0xf]  ;;  %v4092_v13 = vld [vmem:[#allocation7 + $0x350] sm:$0xf0]  ;;  %v4287_v14 = vor.u32 %v5216_v25, %v4284_v50 }
 0x10f   :  { %v5168_v35 = vld [vmem:[#allocation7 + $0x344] sm:$0xf]  ;;  %v4380_v60 = vld [vmem:[#allocation7 + $0x590] sm:$0xf0]  ;;  %v4543_v19 = vor.u32 %v5280_v45, %v4540_v29 }
 0x110   :  { %2317 = vmatpush.bf16.msra.mxu2 %v3951_v1  ;;  %2327 = vmatpush.bf16.msrb.mxu3 %v4127_v55  ;;  %v636_v62 = vmax.f32 %v628_v32, 0.0  ;;  %v5240_v16 = vld [vmem:[#allocation7 + $0x584] sm:$0xf]  ;;  %v4268_v18 = vld [vmem:[#allocation7 + $0x4b0] sm:$0xf0]  ;;  %v4095_v30 = vor.u32 %v5168_v35, %v4092_v13 }
 0x111   :  { %2306 = vmatmul.bf16.vlgmr.msra.gmra.mxu1 %v6017_v6  ;;  %v5212_v11 = vld [vmem:[#allocation7 + $0x4a4] sm:$0xf]  ;;  %v4524_v23 = vld [vmem:[#allocation7 + $0x6b0] sm:$0xf0]  ;;  %v4383_v27 = vor.u32 %v5240_v16, %v4380_v60  ;;  %v5127_v16 = vld [vmem:[#allocation7 + $0x1f4] sm:$0xf0] }
 0x112   :  { %2350 = vmatpush.bf16.msrb.mxu1 %v4431_v51  ;;  %2292 = vmatpush.bf16.msrb.mxu0 %v3679_v5  ;;  %v6095_v12 = vpack.c.bf16 %v636_v62, %v636_v62  ;;  %v5276_v22 = vld [vmem:[#allocation7 + $0x6a4] sm:$0xf]  ;;  %v4076_v33 = vld [vmem:[#allocation7 + $0x330] sm:$0xf0]  ;;  %v4271_v15 = vor.u32 %v5212_v11, %v4268_v18 }
 0x113   :  { %v5164_v28 = vld [vmem:[#allocation7 + $0x324] sm:$0xf]  ;;  %v4364_v34 = vld [vmem:[#allocation7 + $0x570] sm:$0xf0]  ;;  %v4527_v24 = vor.u32 %v5276_v22, %v4524_v23  ;;  %v3906_v23 = vld [vmem:[#allocation7 + $0x1c8] sm:$0xf] }
 0x114   :  { %2318 = vmatpush.bf16.msra.mxu2 %v3935_v39  ;;  %2280 = vmatmul.bf16.vlgmr.msra.gmra.mxu3 %v6095_v12  ;;  %v5236_v10 = vld [vmem:[#allocation7 + $0x564] sm:$0xf]  ;;  %v4252_v36 = vld [vmem:[#allocation7 + $0x490] sm:$0xf0]  ;;  %v4079_v38 = vor.u32 %v5164_v28, %v4076_v33  ;;  %v5123_v33 = vld [vmem:[#allocation7 + $0x1d4] sm:$0xf0] }
 0x115   :  { %2293 = vmatmul.bf16.vlgmr.msrb.gmra.mxu0 %v6041_v20  ;;  %2328 = vmatpush.bf16.msrb.mxu3 %v4111_v7  ;;  %v5208_v56 = vld [vmem:[#allocation7 + $0x484] sm:$0xf]  ;;  %v4508_v51 = vld [vmem:[#allocation7 + $0x690] sm:$0xf0]  ;;  %v4367_v40 = vor.u32 %v5236_v10, %v4364_v34 }
 0x116   :  { %2351 = vmatpush.bf16.msrb.mxu1 %v4415_v47  ;;  %2337 = vmatpush.bf16.msra.mxu0 %v4303_v49  ;;  %v5272_v4 = vld [vmem:[#allocation7 + $0x684] sm:$0xf]  ;;  %v4060_v46 = vld [vmem:[#allocation7 + $0x310] sm:$0xf0]  ;;  %v4255_v1 = vor.u32 %v5208_v56, %v4252_v36 }
 0x117   :  { %2319 = vmatmul.bf16.vlgmr.msra.gmra.mxu2 %v6045_v54  ;;  %v5232_v41 = vld [vmem:[#allocation7 + $0x544] sm:$0xf]  ;;  %v4348_v31 = vld [vmem:[#allocation7 + $0x550] sm:$0xf0]  ;;  %v4511_v55 = vor.u32 %v5272_v4, %v4508_v51  ;;  %v3794_v4 = vld [vmem:[#allocation7 + $0xe8] sm:$0xf] }
 0x118   :  { %2363 = vmatpush.bf16.msrb.mxu2 %v4559_v37  ;;  %v5160_v44 = vld [vmem:[#allocation7 + $0x304] sm:$0xf]  ;;  %v4684_v17 = vld [vmem:[#allocation7 + $0x7f0] sm:$0xf0]  ;;  %v4351_v53 = vor.u32 %v5232_v41, %v4348_v31  ;;  %v5095_v51 = vld [vmem:[#allocation7 + $0xf4] sm:$0xf0] }
 0x119   :  { %2329 = vmatpush.bf16.msrb.mxu3 %v4095_v30  ;;  %v5316_v42 = vld [vmem:[#allocation7 + $0x7e4] sm:$0xf]  ;;  %v4236_v48 = vld [vmem:[#allocation7 + $0x470] sm:$0xf0]  ;;  %v4063_v43 = vor.u32 %v5160_v44, %v4060_v46  ;;  %v4050_v41 = vld [vmem:[#allocation7 + $0x2e8] sm:$0xf]  ;;  %v3907_v46 = vor.u32 %v5123_v33, %v3906_v23 }
 0x11a   :  { %2352 = vmatpush.bf16.msrb.mxu1 %v4399_v59  ;;  %2338 = vmatpush.bf16.msra.mxu0 %v4287_v14  ;;  %v5204_v52 = vld [vmem:[#allocation7 + $0x464] sm:$0xf]  ;;  %v4492_v58 = vld [vmem:[#allocation7 + $0x670] sm:$0xf0]  ;;  %v4687_v47 = vor.u32 %v5316_v42, %v4684_v17  ;;  %v3922_v59 = vld [vmem:[#allocation7 + $0x1e8] sm:$0xf] }
 0x11b   :  { %v5268_v9 = vld [vmem:[#allocation7 + $0x664] sm:$0xf]  ;;  %v4239_v32 = vor.u32 %v5204_v52, %v4236_v48  ;;  %v4332_v21 = vld [vmem:[#allocation7 + $0x530] sm:$0xf0]  ;;  %v5159_v44 = vld [vmem:[#allocation7 + $0x2f4] sm:$0xf0] }
 0x11c   :  { %2364 = vmatpush.bf16.msrb.mxu2 %v4543_v19  ;;  %v5228_v5 = vld [vmem:[#allocation7 + $0x524] sm:$0xf]  ;;  %v4668_v39 = vld [vmem:[#allocation7 + $0x7d0] sm:$0xf0]  ;;  %v4495_v49 = vor.u32 %v5268_v9, %v4492_v58  ;;  %v3890_v52 = vld [vmem:[#allocation7 + $0x1a8] sm:$0xf] }
 0x11d   :  { %2330 = vmatpush.bf16.msrb.mxu3 %v4079_v38  ;;  %v5312_v63 = vld [vmem:[#allocation7 + $0x7c4] sm:$0xf]  ;;  %v4220_v3 = vld [vmem:[#allocation7 + $0x450] sm:$0xf0]  ;;  %v4335_v25 = vor.u32 %v5228_v5, %v4332_v21  ;;  %v5119_v48 = vld [vmem:[#allocation7 + $0x1b4] sm:$0xf0] }
 0x11e   :  { %2353 = vmatpush.bf16.msrb.mxu1 %v4383_v27  ;;  %2339 = vmatpush.bf16.msra.mxu0 %v4271_v15  ;;  %v5200_v0 = vld [vmem:[#allocation7 + $0x444] sm:$0xf]  ;;  %v4476_v62 = vld [vmem:[#allocation7 + $0x650] sm:$0xf0]  ;;  %v4671_v50 = vor.u32 %v5312_v63, %v4668_v39  ;;  %v3923_v27 = vor.u32 %v5127_v16, %v3922_v59  ;;  %v3778_v9 = vld [vmem:[#allocation7 + $0xc8] sm:$0xf] }
 0x11f   :  { %v5264_v37 = vld [vmem:[#allocation7 + $0x644] sm:$0xf]  ;;  %v4316_v45 = vld [vmem:[#allocation7 + $0x510] sm:$0xf0]  ;;  %v4223_v29 = vor.u32 %v5200_v0, %v4220_v3  ;;  %v5091_v58 = vld [vmem:[#allocation7 + $0xd4] sm:$0xf0] }
 0x120   :  { %2365 = vmatpush.bf16.msrb.mxu2 %v4527_v24  ;;  %v5224_v7 = vld [vmem:[#allocation7 + $0x504] sm:$0xf]  ;;  %v4652_v13 = vld [vmem:[#allocation7 + $0x7b0] sm:$0xf0]  ;;  %v4479_v14 = vor.u32 %v5264_v37, %v4476_v62  ;;  %v5155_v5 = vld [vmem:[#allocation7 + $0x2d4] sm:$0xf0]  ;;  %v3779_v39 = vor.u32 %v5091_v58, %v3778_v9 }
 0x121   :  { %2331 = vmatpush.bf16.msrb.mxu3 %v4063_v43  ;;  %v5308_v35 = vld [vmem:[#allocation7 + $0x7a4] sm:$0xf]  ;;  %v4204_v19 = vld [vmem:[#allocation7 + $0x430] sm:$0xf0]  ;;  %v4319_v30 = vor.u32 %v5224_v7, %v4316_v45  ;;  %v4051_v43 = vor.u32 %v5159_v44, %v4050_v41  ;;  %v5115_v0 = vld [vmem:[#allocation7 + $0x194] sm:$0xf0] }
 0x122   :  { %2354 = vmatpush.bf16.msrb.mxu1 %v4367_v40  ;;  %2340 = vmatpush.bf16.msra.mxu0 %v4255_v1  ;;  %v5196_v60 = vld [vmem:[#allocation7 + $0x424] sm:$0xf]  ;;  %v4460_v18 = vld [vmem:[#allocation7 + $0x630] sm:$0xf0]  ;;  %v4655_v22 = vor.u32 %v5308_v35, %v4652_v13  ;;  %v3762_v37 = vld [vmem:[#allocation7 + $0xa8] sm:$0xf] }
 0x123   :  { %v5260_v11 = vld [vmem:[#allocation7 + $0x624] sm:$0xf]  ;;  %v4207_v28 = vor.u32 %v5196_v60, %v4204_v19  ;;  %v4636_v10 = vld [vmem:[#allocation7 + $0x790] sm:$0xf0]  ;;  %v5087_v62 = vld [vmem:[#allocation7 + $0xb4] sm:$0xf0] }
 0x124   :  { %2366 = vmatpush.bf16.msrb.mxu2 %v4511_v55  ;;  %2332 = vmatmul.bf16.vlgmr.msrb.gmra.mxu3 %v6070_v8  ;;  %v5304_v15 = vld [vmem:[#allocation7 + $0x784] sm:$0xf]  ;;  %v4463_v34 = vor.u32 %v5260_v11, %v4460_v18  ;;  %v4188_v56 = vld [vmem:[#allocation7 + $0x410] sm:$0xf0]  ;;  %v3795_v55 = vor.u32 %v5095_v51, %v3794_v4  ;;  %v5151_v7 = vld [vmem:[#allocation7 + $0x2b4] sm:$0xf0]  ;;  %v3763_v35 = vor.u32 %v5087_v62, %v3762_v37 }
 0x125   :  { %2376 = vmatpush.bf16.msra.mxu3 %v4687_v47  ;;  %v5192_v24 = vld [vmem:[#allocation7 + $0x404] sm:$0xf]  ;;  %v4444_v38 = vld [vmem:[#allocation7 + $0x610] sm:$0xf0]  ;;  %v4639_v40 = vor.u32 %v5304_v15, %v4636_v10  ;;  %v4034_v47 = vld [vmem:[#allocation7 + $0x2c8] sm:$0xf] }
 0x126   :  { %2355 = vmatpush.bf16.msrb.mxu1 %v4351_v53  ;;  %2341 = vmatpush.bf16.msra.mxu0 %v4239_v32  ;;  %v5256_v36 = vld [vmem:[#allocation7 + $0x604] sm:$0xf]  ;;  %v4191_v1 = vor.u32 %v5192_v24, %v4188_v56  ;;  %v4620_v42 = vld [vmem:[#allocation7 + $0x770] sm:$0xf0]  ;;  %v3891_v32 = vor.u32 %v5119_v48, %v3890_v52  ;;  %v4035_v3 = vor.u32 %v5155_v5, %v4034_v47  ;;  %v3858_v13 = vld [vmem:[#allocation7 + $0x168] sm:$0xf] }
 0x127   :  { %v5300_v31 = vld [vmem:[#allocation7 + $0x764] sm:$0xf]  ;;  %v4447_v17 = vor.u32 %v5256_v36, %v4444_v38  ;;  %v4604_v63 = vld [vmem:[#allocation7 + $0x750] sm:$0xf0]  ;;  %v3746_v60 = vld [vmem:[#allocation7 + $0x88] sm:$0xf] }
 0x128   :  { %2367 = vmatpush.bf16.msrb.mxu2 %v4495_v49  ;;  %v4623_v53 = vor.u32 %v5300_v31, %v4620_v42  ;;  %v5296_v21 = vld [vmem:[#allocation7 + $0x744] sm:$0xf]  ;;  %v3874_v49 = vld [vmem:[#allocation7 + $0x188] sm:$0xf]  ;;  %v4588_v59 = vld [vmem:[#allocation7 + $0x730] sm:$0xf0] }
 0x129   :  { %2377 = vmatpush.bf16.msra.mxu3 %v4671_v50  ;;  %v4018_v50 = vld [vmem:[#allocation7 + $0x2a8] sm:$0xf]  ;;  %v3875_v45 = vor.u32 %v5115_v0, %v3874_v49  ;;  %v5083_v19 = vld [vmem:[#allocation7 + $0x94] sm:$0xf0] }
 0x12a   :  { %2356 = vmatpush.bf16.msrb.mxu1 %v4335_v25  ;;  %2342 = vmatpush.bf16.msra.mxu0 %v4223_v29  ;;  %v4607_v25 = vor.u32 %v5296_v21, %v4604_v63  ;;  %v5292_v29 = vld [vmem:[#allocation7 + $0x724] sm:$0xf]  ;;  %v4019_v16 = vor.u32 %v5151_v7, %v4018_v50  ;;  %v4002_v18 = vld [vmem:[#allocation7 + $0x288] sm:$0xf]  ;;  %v3747_v33 = vor.u32 %v5083_v19, %v3746_v60  ;;  %v5107_v15 = vld [vmem:[#allocation7 + $0x154] sm:$0xf0] }
 0x12b   :  { %v4591_v11 = vor.u32 %v5292_v29, %v4588_v59  ;;  %v3842_v23 = vld [vmem:[#allocation7 + $0x148] sm:$0xf]  ;;  %v5079_v36 = vld [vmem:[#allocation7 + $0x74] sm:$0xf0] }
 0x12c   :  { %2368 = vmatpush.bf16.msrb.mxu2 %v4479_v14  ;;  %v5111_v14 = vld [vmem:[#allocation7 + $0x174] sm:$0xf0]  ;;  %v4178_v10 = vld [vmem:[#allocation7 + $0x3e8] sm:$0xf] }
 0x12d   :  { %2378 = vmatpush.bf16.msra.mxu3 %v4655_v22  ;;  %v3859_v22 = vor.u32 %v5111_v14, %v3858_v13  ;;  %v3730_v56 = vld [vmem:[#allocation7 + $0x68] sm:$0xf]  ;;  %v5143_v51 = vld [vmem:[#allocation7 + $0x274] sm:$0xf0] }
 0x12e   :  { %2357 = vmatpush.bf16.msrb.mxu1 %v4319_v30  ;;  %2343 = vmatpush.bf16.msra.mxu0 %v4207_v28  ;;  %v5147_v30 = vld [vmem:[#allocation7 + $0x294] sm:$0xf0]  ;;  %v4572_v28 = vld [vmem:[#allocation7 + $0x710] sm:$0xf0]  ;;  %v3986_v4 = vld [vmem:[#allocation7 + $0x268] sm:$0xf] }
 0x12f   :  { %v4003_v24 = vor.u32 %v5147_v30, %v4002_v18  ;;  %v3826_v44 = vld [vmem:[#allocation7 + $0x128] sm:$0xf]  ;;  %v5187_v42 = vld [vmem:[#allocation7 + $0x3d4] sm:$0xf0] }
 0x130   :  { %2369 = vmatpush.bf16.msrb.mxu2 %v4463_v34  ;;  %v5191_v34 = vld [vmem:[#allocation7 + $0x3f4] sm:$0xf0]  ;;  %v4162_v31 = vld [vmem:[#allocation7 + $0x3c8] sm:$0xf] }
 0x131   :  { %2358 = vmatmul.bf16.vlgmr.msrb.gmra.mxu1 %v6068_v57  ;;  %2379 = vmatpush.bf16.msra.mxu3 %v4639_v40  ;;  %v3843_v40 = vor.u32 %v5107_v15, %v3842_v23  ;;  %v4179_v41 = vor.u32 %v5191_v34, %v4178_v10  ;;  %v5075_v52 = vld [vmem:[#allocation7 + $0x54] sm:$0xf0]  ;;  %v3970_v48 = vld [vmem:[#allocation7 + $0x248] sm:$0xf]  ;;  %v4163_v58 = vor.u32 %v5187_v42, %v4162_v31 }
 0x132   :  { %2402 = vmatpush.bf16.msra.mxu1 %v3923_v27  ;;  %2344 = vmatpush.bf16.msra.mxu0 %v4191_v1  ;;  %v5288_v27 = vld [vmem:[#allocation7 + $0x704] sm:$0xf]  ;;  %v5103_v1 = vld [vmem:[#allocation7 + $0x134] sm:$0xf0]  ;;  %v4146_v21 = vld [vmem:[#allocation7 + $0x3a8] sm:$0xf] }
 0x133   :  { %v4575_v38 = vor.u32 %v5288_v27, %v4572_v28  ;;  %v3827_v9 = vor.u32 %v5103_v1, %v3826_v44  ;;  %v5099_v47 = vld [vmem:[#allocation7 + $0x114] sm:$0xf0]  ;;  %v3698_v0 = vld [vmem:[#allocation7 + $0x28] sm:$0xf] }
 0x134   :  { %2370 = vmatpush.bf16.msrb.mxu2 %v4447_v17  ;;  %v3987_v17 = vor.u32 %v5143_v51, %v3986_v4  ;;  %v5183_v63 = vld [vmem:[#allocation7 + $0x3b4] sm:$0xf0]  ;;  %v3954_v37 = vld [vmem:[#allocation7 + $0x228] sm:$0xf] }
 0x135   :  { %2345 = vmatmul.bf16.vlgmr.msra.gmra.mxu0 %v6081_v61  ;;  %2380 = vmatpush.bf16.msra.mxu3 %v4623_v53  ;;  %v3810_v53 = vld [vmem:[#allocation7 + $0x108] sm:$0xf]  ;;  %v5255_v49 = vld [vmem:[#allocation7 + $0x5f4] sm:$0xf0]  ;;  %v4147_v50 = vor.u32 %v5183_v63, %v4146_v21 }
 0x136   :  { %2403 = vmatpush.bf16.msra.mxu1 %v3907_v46  ;;  %2389 = vmatpush.bf16.msrb.mxu0 %v3795_v55  ;;  %v3731_v46 = vor.u32 %v5079_v36, %v3730_v56  ;;  %v3714_v55 = vld [vmem:[#allocation7 + $0x48] sm:$0xf]  ;;  %v5135_v62 = vld [vmem:[#allocation7 + $0x234] sm:$0xf0] }
 0x137   :  { %2371 = vmatmul.bf16.vlgmr.msrb.gmra.mxu2 %v6079_v2  ;;  %v3715_v5 = vor.u32 %v5075_v52, %v3714_v55  ;;  %v4418_v7 = vld [vmem:[#allocation7 + $0x5c8] sm:$0xf]  ;;  %v5251_v59 = vld [vmem:[#allocation7 + $0x5d4] sm:$0xf0]  ;;  %v3955_v14 = vor.u32 %v5135_v62, %v3954_v37 }
 0x138   :  { %2415 = vmatpush.bf16.msra.mxu2 %v4051_v43  ;;  %v5139_v43 = vld [vmem:[#allocation7 + $0x254] sm:$0xf0]  ;;  %v3938_v19 = vld [vmem:[#allocation7 + $0x208] sm:$0xf]  ;;  %v4419_v28 = vor.u32 %v5251_v59, %v4418_v7 }
 0x139   :  { %2381 = vmatpush.bf16.msra.mxu3 %v4607_v25  ;;  %v3811_v25 = vor.u32 %v5099_v47, %v3810_v53  ;;  %v5179_v13 = vld [vmem:[#allocation7 + $0x394] sm:$0xf0]  ;;  %v4306_v18 = vld [vmem:[#allocation7 + $0x4e8] sm:$0xf] }
 0x13a   :  { %2404 = vmatpush.bf16.msra.mxu1 %v3891_v32  ;;  %2390 = vmatpush.bf16.msrb.mxu0 %v3779_v39  ;;  %v4434_v32 = vld [vmem:[#allocation7 + $0x5e8] sm:$0xf]  ;;  %v3971_v39 = vor.u32 %v5139_v43, %v3970_v48  ;;  %v5067_v60 = vld [vmem:[#allocation7 + $0x14] sm:$0xf0] }
 0x13b   :  { %v5223_v30 = vld [vmem:[#allocation7 + $0x4f4] sm:$0xf0]  ;;  %v4562_v23 = vld [vmem:[#allocation7 + $0x6e8] sm:$0xf] }
 0x13c   :  { %2416 = vmatpush.bf16.msra.mxu2 %v4035_v3  ;;  %v5071_v3 = vld [vmem:[#allocation7 + $0x34] sm:$0xf0]  ;;  %v4114_v15 = vld [vmem:[#allocation7 + $0x368] sm:$0xf] }
 0x13d   :  { %2382 = vmatpush.bf16.msra.mxu3 %v4591_v11  ;;  %v3699_v29 = vor.u32 %v5071_v3, %v3698_v0  ;;  %v5131_v11 = vld [vmem:[#allocation7 + $0x214] sm:$0xf0]  ;;  %v4402_v56 = vld [vmem:[#allocation7 + $0x5a8] sm:$0xf] }
 0x13e   :  { %2405 = vmatpush.bf16.msra.mxu1 %v3875_v45  ;;  %2391 = vmatpush.bf16.msrb.mxu0 %v3763_v35  ;;  %v4435_v45 = vor.u32 %v5255_v49, %v4434_v32  ;;  %v4130_v35 = vld [vmem:[#allocation7 + $0x388] sm:$0xf]  ;;  %v5287_v27 = vld [vmem:[#allocation7 + $0x6f4] sm:$0xf0]  ;;  %v3939_v34 = vor.u32 %v5131_v11, %v3938_v19 }
 0x13f   :  { %v5175_v10 = vld [vmem:[#allocation7 + $0x374] sm:$0xf0]  ;;  %v4290_v4 = vld [vmem:[#allocation7 + $0x4c8] sm:$0xf] }
 0x140   :  { %2417 = vmatpush.bf16.msra.mxu2 %v4019_v16  ;;  %v3682_v16 = vld [vmem:[#allocation7 + $0x8] sm:$0xf]  ;;  %v5247_v36 = vld [vmem:[#allocation7 + $0x5b4] sm:$0xf0] }
 0x141   :  { %2383 = vmatpush.bf16.msra.mxu3 %v4575_v38  ;;  %v4563_v38 = vor.u32 %v5287_v27, %v4562_v23  ;;  %v5219_v51 = vld [vmem:[#allocation7 + $0x4d4] sm:$0xf0]  ;;  %v4098_v1 = vld [vmem:[#allocation7 + $0x348] sm:$0xf] }
 0x142   :  { %2406 = vmatpush.bf16.msra.mxu1 %v3859_v22  ;;  %2392 = vmatpush.bf16.msrb.mxu0 %v3747_v33  ;;  %v4131_v22 = vor.u32 %v5179_v13, %v4130_v35  ;;  %v3683_v33 = vor.u32 %v5067_v60, %v3682_v16  ;;  %v5283_v44 = vld [vmem:[#allocation7 + $0x6d4] sm:$0xf0]  ;;  %v4291_v42 = vor.u32 %v5219_v51, %v4290_v4  ;;  %v4274_v48 = vld [vmem:[#allocation7 + $0x4a8] sm:$0xf] }
 0x143   :  { %v5171_v31 = vld [vmem:[#allocation7 + $0x354] sm:$0xf0]  ;;  %v4370_v63 = vld [vmem:[#allocation7 + $0x568] sm:$0xf] }
 0x144   :  { %2418 = vmatpush.bf16.msra.mxu2 %v4003_v24  ;;  %2384 = vmatmul.bf16.vlgmr.msra.gmra.mxu3 %v6095_v12  ;;  %v4307_v24 = vor.u32 %v5223_v30, %v4306_v18  ;;  %v5243_v55 = vld [vmem:[#allocation7 + $0x594] sm:$0xf0]  ;;  %v4258_v0 = vld [vmem:[#allocation7 + $0x488] sm:$0xf] }
 0x145   :  { %2428 = vmatpush.bf16.msrb.mxu3 %v4179_v41  ;;  %v4546_v41 = vld [vmem:[#allocation7 + $0x6c8] sm:$0xf]  ;;  %v5215_v43 = vld [vmem:[#allocation7 + $0x4b4] sm:$0xf0] }
 0x146   :  { %2407 = vmatpush.bf16.msra.mxu1 %v3843_v40  ;;  %2393 = vmatpush.bf16.msrb.mxu0 %v3731_v46  ;;  %v4115_v40 = vor.u32 %v5175_v10, %v4114_v15  ;;  %v4403_v46 = vor.u32 %v5247_v36, %v4402_v56  ;;  %v4547_v52 = vor.u32 %v5283_v44, %v4546_v41  ;;  %v5279_v53 = vld [vmem:[#allocation7 + $0x6b4] sm:$0xf0]  ;;  %v4514_v62 = vld [vmem:[#allocation7 + $0x688] sm:$0xf] }
 0x147   :  { %v5167_v32 = vld [vmem:[#allocation7 + $0x334] sm:$0xf0]  ;;  %v4275_v21 = vor.u32 %v5215_v43, %v4274_v48  ;;  %v4354_v7 = vld [vmem:[#allocation7 + $0x548] sm:$0xf] }
 0x148   :  { %2419 = vmatpush.bf16.msra.mxu2 %v3987_v17  ;;  %v4386_v17 = vld [vmem:[#allocation7 + $0x588] sm:$0xf]  ;;  %v5211_v3 = vld [vmem:[#allocation7 + $0x494] sm:$0xf0] }
 0x149   :  { %2429 = vmatpush.bf16.msrb.mxu3 %v4163_v58  ;;  %v4530_v58 = vld [vmem:[#allocation7 + $0x6a8] sm:$0xf]  ;;  %v4387_v47 = vor.u32 %v5243_v55, %v4386_v17  ;;  %v4259_v59 = vor.u32 %v5211_v3, %v4258_v0  ;;  %v5235_v35 = vld [vmem:[#allocation7 + $0x554] sm:$0xf0]  ;;  %v3924_v17 = vld [vmem:[#allocation7 + $0x1f8] sm:$0xf0] }
 0x14a   :  { %2408 = vmatpush.bf16.msra.mxu1 %v3827_v9  ;;  %2394 = vmatpush.bf16.msrb.mxu0 %v3715_v5  ;;  %v4099_v9 = vor.u32 %v5171_v31, %v4098_v1  ;;  %v4082_v5 = vld [vmem:[#allocation7 + $0x328] sm:$0xf]  ;;  %v4531_v49 = vor.u32 %v5279_v53, %v4530_v58  ;;  %v5207_v19 = vld [vmem:[#allocation7 + $0x474] sm:$0xf0]  ;;  %v5121_v53 = vld [vmem:[#allocation7 + $0x1cc] sm:$0xf] }
 0x14b   :  { %v4083_v37 = vor.u32 %v5167_v32, %v4082_v5  ;;  %v4690_v13 = vld [vmem:[#allocation7 + $0x7e8] sm:$0xf]  ;;  %v5271_v30 = vld [vmem:[#allocation7 + $0x674] sm:$0xf0]  ;;  %v3908_v32 = vld [vmem:[#allocation7 + $0x1d8] sm:$0xf0] }
 0x14c   :  { %2420 = vmatpush.bf16.msra.mxu2 %v3971_v39  ;;  %v5239_v39 = vld [vmem:[#allocation7 + $0x574] sm:$0xf0]  ;;  %v4242_v60 = vld [vmem:[#allocation7 + $0x468] sm:$0xf] }
 0x14d   :  { %2430 = vmatpush.bf16.msrb.mxu3 %v4147_v50  ;;  %v4371_v50 = vor.u32 %v5239_v39, %v4370_v63  ;;  %v4498_v18 = vld [vmem:[#allocation7 + $0x668] sm:$0xf]  ;;  %v5315_v10 = vld [vmem:[#allocation7 + $0x7d4] sm:$0xf0] }
 0x14e   :  { %2409 = vmatpush.bf16.msra.mxu1 %v3811_v25  ;;  %2395 = vmatpush.bf16.msrb.mxu0 %v3699_v29  ;;  %v5275_v25 = vld [vmem:[#allocation7 + $0x694] sm:$0xf0]  ;;  %v4338_v27 = vld [vmem:[#allocation7 + $0x528] sm:$0xf] }
 0x14f   :  { %v5163_v29 = vld [vmem:[#allocation7 + $0x314] sm:$0xf0]  ;;  %v4515_v16 = vor.u32 %v5275_v25, %v4514_v62  ;;  %v4674_v15 = vld [vmem:[#allocation7 + $0x7c8] sm:$0xf]  ;;  %v5093_v62 = vld [vmem:[#allocation7 + $0xec] sm:$0xf] }
 0x150   :  { %2421 = vmatpush.bf16.msra.mxu2 %v3955_v14  ;;  %v5319_v14 = vld [vmem:[#allocation7 + $0x7f4] sm:$0xf0]  ;;  %v4482_v36 = vld [vmem:[#allocation7 + $0x648] sm:$0xf]  ;;  %v4675_v51 = vor.u32 %v5315_v10, %v4674_v15  ;;  %v3796_v25 = vld [vmem:[#allocation7 + $0xf8] sm:$0xf0] }
 0x151   :  { %2410 = vmatmul.bf16.vlgmr.msra.gmra.mxu1 %v6017_v6  ;;  %2431 = vmatpush.bf16.msrb.mxu3 %v4131_v22  ;;  %v4355_v22 = vor.u32 %v5235_v35, %v4354_v7  ;;  %v4691_v23 = vor.u32 %v5319_v14, %v4690_v13  ;;  %v5203_v56 = vld [vmem:[#allocation7 + $0x454] sm:$0xf0]  ;;  %v4658_v1 = vld [vmem:[#allocation7 + $0x7a8] sm:$0xf]  ;;  %v5157_v7 = vld [vmem:[#allocation7 + $0x2ec] sm:$0xf] }
 0x152   :  { %2454 = vmatpush.bf16.msrb.mxu1 %v4435_v45  ;;  %2396 = vmatpush.bf16.msrb.mxu0 %v3683_v33  ;;  %v4066_v45 = vld [vmem:[#allocation7 + $0x308] sm:$0xf]  ;;  %v5231_v33 = vld [vmem:[#allocation7 + $0x534] sm:$0xf0] }
 0x153   :  { %v4067_v11 = vor.u32 %v5163_v29, %v4066_v45  ;;  %v4339_v4 = vor.u32 %v5231_v33, %v4338_v27  ;;  %v5227_v41 = vld [vmem:[#allocation7 + $0x514] sm:$0xf0]  ;;  %v4210_v55 = vld [vmem:[#allocation7 + $0x428] sm:$0xf]  ;;  %v4052_v45 = vld [vmem:[#allocation7 + $0x2f8] sm:$0xf0]  ;;  %v3911_v29 = vor.u32 %v5121_v53, %v3908_v32 }
 0x154   :  { %2422 = vmatpush.bf16.msra.mxu2 %v3939_v34  ;;  %v4499_v34 = vor.u32 %v5271_v30, %v4498_v18  ;;  %v5311_v31 = vld [vmem:[#allocation7 + $0x7b4] sm:$0xf0]  ;;  %v4466_v48 = vld [vmem:[#allocation7 + $0x628] sm:$0xf]  ;;  %v5089_v18 = vld [vmem:[#allocation7 + $0xcc] sm:$0xf] }
 0x155   :  { %2397 = vmatmul.bf16.vlgmr.msrb.gmra.mxu0 %v6041_v20  ;;  %2432 = vmatpush.bf16.msrb.mxu3 %v4115_v40  ;;  %v4322_v40 = vld [vmem:[#allocation7 + $0x508] sm:$0xf]  ;;  %v5263_v43 = vld [vmem:[#allocation7 + $0x634] sm:$0xf0]  ;;  %v4659_v58 = vor.u32 %v5311_v31, %v4658_v1  ;;  %v3780_v30 = vld [vmem:[#allocation7 + $0xd8] sm:$0xf0] }
 0x156   :  { %2455 = vmatpush.bf16.msrb.mxu1 %v4419_v28  ;;  %2441 = vmatpush.bf16.msra.mxu0 %v4307_v24  ;;  %v4243_v28 = vor.u32 %v5207_v19, %v4242_v60  ;;  %v4226_v24 = vld [vmem:[#allocation7 + $0x448] sm:$0xf]  ;;  %v5307_v63 = vld [vmem:[#allocation7 + $0x794] sm:$0xf0]  ;;  %v4467_v39 = vor.u32 %v5263_v43, %v4466_v48  ;;  %v5117_v60 = vld [vmem:[#allocation7 + $0x1ac] sm:$0xf]  ;;  %v3783_v10 = vor.u32 %v5089_v18, %v3780_v30 }
 0x157   :  { %2423 = vmatmul.bf16.vlgmr.msra.gmra.mxu2 %v6045_v54  ;;  %v4227_v44 = vor.u32 %v5203_v56, %v4226_v24  ;;  %v5195_v0 = vld [vmem:[#allocation7 + $0x414] sm:$0xf0]  ;;  %v4450_v3 = vld [vmem:[#allocation7 + $0x608] sm:$0xf]  ;;  %v3892_v19 = vld [vmem:[#allocation7 + $0x1b8] sm:$0xf0] }
 0x158   :  { %2467 = vmatpush.bf16.msrb.mxu2 %v4563_v38  ;;  %v5267_v38 = vld [vmem:[#allocation7 + $0x654] sm:$0xf0]  ;;  %v4626_v35 = vld [vmem:[#allocation7 + $0x768] sm:$0xf]  ;;  %v4036_v27 = vld [vmem:[#allocation7 + $0x2d8] sm:$0xf0] }
 0x159   :  { %2433 = vmatpush.bf16.msrb.mxu3 %v4099_v9  ;;  %v4323_v9 = vor.u32 %v5227_v41, %v4322_v40  ;;  %v5303_v13 = vld [vmem:[#allocation7 + $0x774] sm:$0xf0]  ;;  %v4610_v33 = vld [vmem:[#allocation7 + $0x748] sm:$0xf]  ;;  %v3876_v24 = vld [vmem:[#allocation7 + $0x198] sm:$0xf0] }
 0x15a   :  { %2456 = vmatpush.bf16.msrb.mxu1 %v4403_v46  ;;  %2442 = vmatpush.bf16.msra.mxu0 %v4291_v42  ;;  %v5125_v46 = vld [vmem:[#allocation7 + $0x1ec] sm:$0xf]  ;;  %v4483_v42 = vor.u32 %v5267_v38, %v4482_v36  ;;  %v5299_v15 = vld [vmem:[#allocation7 + $0x754] sm:$0xf0]  ;;  %v3764_v38 = vld [vmem:[#allocation7 + $0xb8] sm:$0xf0] }
 0x15b   :  { %v5085_v36 = vld [vmem:[#allocation7 + $0xac] sm:$0xf]  ;;  %v4020_v40 = vld [vmem:[#allocation7 + $0x2b8] sm:$0xf0]  ;;  %v5295_v1 = vld [vmem:[#allocation7 + $0x734] sm:$0xf0] }
 0x15c   :  { %2468 = vmatpush.bf16.msrb.mxu2 %v4547_v52  ;;  %v5199_v52 = vld [vmem:[#allocation7 + $0x434] sm:$0xf0]  ;;  %v3767_v31 = vor.u32 %v5085_v36, %v3764_v38  ;;  %v3748_v48 = vld [vmem:[#allocation7 + $0x98] sm:$0xf0]  ;;  %v5137_v30 = vld [vmem:[#allocation7 + $0x24c] sm:$0xf] }
 0x15d   :  { %2434 = vmatpush.bf16.msrb.mxu3 %v4083_v37  ;;  %v4211_v5 = vor.u32 %v5199_v52, %v4210_v55  ;;  %v5259_v37 = vld [vmem:[#allocation7 + $0x614] sm:$0xf0]  ;;  %v5081_v52 = vld [vmem:[#allocation7 + $0x8c] sm:$0xf]  ;;  %v3716_v18 = vld [vmem:[#allocation7 + $0x58] sm:$0xf0] }
 0x15e   :  { %2457 = vmatpush.bf16.msrb.mxu1 %v4387_v47  ;;  %2443 = vmatpush.bf16.msra.mxu0 %v4275_v21  ;;  %v3927_v47 = vor.u32 %v5125_v46, %v3924_v17  ;;  %v4642_v21 = vld [vmem:[#allocation7 + $0x788] sm:$0xf]  ;;  %v4451_v14 = vor.u32 %v5259_v37, %v4450_v3  ;;  %v3860_v17 = vld [vmem:[#allocation7 + $0x178] sm:$0xf0]  ;;  %v5291_v32 = vld [vmem:[#allocation7 + $0x714] sm:$0xf0] }
 0x15f   :  { %v4594_v46 = vld [vmem:[#allocation7 + $0x728] sm:$0xf]  ;;  %v5077_v37 = vld [vmem:[#allocation7 + $0x6c] sm:$0xf]  ;;  %v4148_v36 = vld [vmem:[#allocation7 + $0x3b8] sm:$0xf0] }
 0x160   :  { %2469 = vmatpush.bf16.msrb.mxu2 %v4531_v49  ;;  %v4194_v49 = vld [vmem:[#allocation7 + $0x408] sm:$0xf]  ;;  %v4595_v43 = vor.u32 %v5295_v1, %v4594_v46  ;;  %v3956_v46 = vld [vmem:[#allocation7 + $0x238] sm:$0xf0] }
 0x161   :  { %2435 = vmatpush.bf16.msrb.mxu3 %v4067_v11  ;;  %v4055_v11 = vor.u32 %v5157_v7, %v4052_v45  ;;  %v3988_v7 = vld [vmem:[#allocation7 + $0x278] sm:$0xf0] }
 0x162   :  { %2458 = vmatpush.bf16.msrb.mxu1 %v4371_v50  ;;  %2444 = vmatpush.bf16.msra.mxu0 %v4259_v59  ;;  %v4643_v50 = vor.u32 %v5307_v63, %v4642_v21  ;;  %v4195_v59 = vor.u32 %v5195_v0, %v4194_v49  ;;  %v3751_v63 = vor.u32 %v5081_v52, %v3748_v48  ;;  %v5189_v49 = vld [vmem:[#allocation7 + $0x3ec] sm:$0xf]  ;;  %v4180_v0 = vld [vmem:[#allocation7 + $0x3f8] sm:$0xf0] }
 0x163   :  { %v4420_v48 = vld [vmem:[#allocation7 + $0x5d8] sm:$0xf0] }
 0x164   :  { %2470 = vmatpush.bf16.msrb.mxu2 %v4515_v16  ;;  %2436 = vmatmul.bf16.vlgmr.msrb.gmra.mxu3 %v6070_v8  ;;  %v3799_v16 = vor.u32 %v5093_v62, %v3796_v25  ;;  %v3732_v62 = vld [vmem:[#allocation7 + $0x78] sm:$0xf0] }
 0x165   :  { %2480 = vmatpush.bf16.msra.mxu3 %v4691_v23  ;;  %v5153_v23 = vld [vmem:[#allocation7 + $0x2cc] sm:$0xf] }
 0x166   :  { %2459 = vmatpush.bf16.msrb.mxu1 %v4355_v22  ;;  %2445 = vmatpush.bf16.msra.mxu0 %v4243_v28  ;;  %v4627_v22 = vor.u32 %v5303_v13, %v4626_v35  ;;  %v3895_v28 = vor.u32 %v5117_v60, %v3892_v19  ;;  %v4039_v56 = vor.u32 %v5153_v23, %v4036_v27  ;;  %v5101_v35 = vld [vmem:[#allocation7 + $0x12c] sm:$0xf]  ;;  %v4164_v60 = vld [vmem:[#allocation7 + $0x3d8] sm:$0xf0] }
 0x167   :  { %v3735_v13 = vor.u32 %v5077_v37, %v3732_v62  ;;  %v4564_v37 = vld [vmem:[#allocation7 + $0x6f8] sm:$0xf0] }
 0x168   :  { %2471 = vmatpush.bf16.msrb.mxu2 %v4499_v34  ;;  %v5113_v34 = vld [vmem:[#allocation7 + $0x18c] sm:$0xf] }
 0x169   :  { %2481 = vmatpush.bf16.msra.mxu3 %v4675_v51  ;;  %v5149_v51 = vld [vmem:[#allocation7 + $0x2ac] sm:$0xf] }
 0x16a   :  { %2460 = vmatpush.bf16.msrb.mxu1 %v4339_v4  ;;  %2446 = vmatpush.bf16.msra.mxu0 %v4227_v44  ;;  %v4611_v4 = vor.u32 %v5299_v15, %v4610_v33  ;;  %v3879_v44 = vor.u32 %v5113_v34, %v3876_v24  ;;  %v4023_v55 = vor.u32 %v5149_v51, %v4020_v40  ;;  %v5097_v33 = vld [vmem:[#allocation7 + $0x10c] sm:$0xf]  ;;  %v3812_v15 = vld [vmem:[#allocation7 + $0x118] sm:$0xf0] }
 0x16b   :  { %v5253_v24 = vld [vmem:[#allocation7 + $0x5ec] sm:$0xf]  ;;  %v3700_v40 = vld [vmem:[#allocation7 + $0x38] sm:$0xf0] }
 0x16c   :  { %2472 = vmatpush.bf16.msrb.mxu2 %v4483_v42  ;;  %v5109_v42 = vld [vmem:[#allocation7 + $0x16c] sm:$0xf] }
 0x16d   :  { %2482 = vmatpush.bf16.msra.mxu3 %v4659_v58  ;;  %v4004_v58 = vld [vmem:[#allocation7 + $0x298] sm:$0xf0]  ;;  %v3863_v53 = vor.u32 %v5109_v42, %v3860_v17  ;;  %v5069_v51 = vld [vmem:[#allocation7 + $0x2c] sm:$0xf] }
 0x16e   :  { %2461 = vmatpush.bf16.msrb.mxu1 %v4323_v9  ;;  %2447 = vmatpush.bf16.msra.mxu0 %v4211_v5  ;;  %v6112_v41 = vpop.f32.mrf.mxu1  ;;  %v5145_v9 = vld [vmem:[#allocation7 + $0x28c] sm:$0xf]  ;;  %v4578_v5 = vld [vmem:[#allocation7 + $0x708] sm:$0xf]  ;;  %v3703_v52 = vor.u32 %v5069_v51, %v3700_v40  ;;  %v4532_v51 = vld [vmem:[#allocation7 + $0x6b8] sm:$0xf0] }
 0x16f   :  { %v4007_v3 = vor.u32 %v5145_v9, %v4004_v58  ;;  %v4579_v25 = vor.u32 %v5291_v32, %v4578_v5  ;;  %v5249_v17 = vld [vmem:[#allocation7 + $0x5cc] sm:$0xf]  ;;  %v4132_v9 = vld [vmem:[#allocation7 + $0x398] sm:$0xf0] }
 0x170   :  { %2473 = vmatpush.bf16.msrb.mxu2 %v4467_v39  ;;  %v3844_v39 = vld [vmem:[#allocation7 + $0x158] sm:$0xf0]  ;;  %v5129_v5 = vld [vmem:[#allocation7 + $0x20c] sm:$0xf] }
 0x171   :  { %2462 = vmatmul.bf16.vlgmr.msrb.gmra.mxu1 %v6068_v57  ;;  %2483 = vmatpush.bf16.msra.mxu3 %v4643_v50  ;;  %v5141_v50 = vld [vmem:[#allocation7 + $0x26c] sm:$0xf]  ;;  %v3940_v32 = vld [vmem:[#allocation7 + $0x218] sm:$0xf0] }
 0x172   :  { %2506 = vmatpush.bf16.msra.mxu1 %v3927_v47  ;;  %2448 = vmatpush.bf16.msra.mxu0 %v4195_v59  ;;  %v5105_v47 = vld [vmem:[#allocation7 + $0x14c] sm:$0xf]  ;;  %v6114_v21 = vpop.f32.mrf.mxu0  ;;  %v4183_v59 = vor.u32 %v5189_v49, %v4180_v0  ;;  %v3991_v19 = vor.u32 %v5141_v50, %v3988_v7 }
 0x173   :  { %v5173_v7 = vld [vmem:[#allocation7 + $0x36c] sm:$0xf] }
 0x174   :  { %2474 = vmatpush.bf16.msrb.mxu2 %v4451_v14  ;;  %v3828_v14 = vld [vmem:[#allocation7 + $0x138] sm:$0xf0] }
 0x175   :  { %2449 = vmatmul.bf16.vlgmr.msra.gmra.mxu0 %v6081_v61  ;;  %2484 = vmatpush.bf16.msra.mxu3 %v4627_v22  ;;  %v3972_v22 = vld [vmem:[#allocation7 + $0x258] sm:$0xf0]  ;;  %v3831_v27 = vor.u32 %v5101_v35, %v3828_v14 }
 0x176   :  { %2507 = vmatpush.bf16.msra.mxu1 %v3911_v29  ;;  %2493 = vmatpush.bf16.msrb.mxu0 %v3799_v16  ;;  %v2205_v45 = vpop.f32.mrf.mxu1  ;;  %v3847_v29 = vor.u32 %v5105_v47, %v3844_v39  ;;  %v5185_v16 = vld [vmem:[#allocation7 + $0x3cc] sm:$0xf]  ;;  %v3975_v38 = vor.u32 %v5137_v30, %v3972_v22  ;;  %v3684_v47 = vld [vmem:[#allocation7 + $0x18] sm:$0xf0] }
 0x177   :  { %2475 = vmatmul.bf16.vlgmr.msrb.gmra.mxu2 %v6079_v2  ;;  %v4308_v39 = vld [vmem:[#allocation7 + $0x4f8] sm:$0xf0]  ;;  %v5281_v30 = vld [vmem:[#allocation7 + $0x6cc] sm:$0xf] }
 0x178   :  { %2519 = vmatpush.bf16.msra.mxu2 %v4055_v11  ;;  %v5073_v11 = vld [vmem:[#allocation7 + $0x4c] sm:$0xf]  ;;  %v4116_v45 = vld [vmem:[#allocation7 + $0x378] sm:$0xf0] }
 0x179   :  { %2485 = vmatpush.bf16.msra.mxu3 %v4611_v4  ;;  %v3719_v34 = vor.u32 %v5073_v11, %v3716_v18  ;;  %v4436_v4 = vld [vmem:[#allocation7 + $0x5f8] sm:$0xf0]  ;;  %v4119_v18 = vor.u32 %v5173_v7, %v4116_v45 }
 0x17a   :  { %2508 = vmatpush.bf16.msra.mxu1 %v3895_v28  ;;  %2494 = vmatpush.bf16.msrb.mxu0 %v3783_v10  ;;  %v6116_v23 = vpop.f32.mrf.mxu2  ;;  %v4167_v28 = vor.u32 %v5185_v16, %v4164_v60  ;;  %v2192_v10 = vpop.f32.mrf.mxu0  ;;  %v4404_v14 = vld [vmem:[#allocation7 + $0x5b8] sm:$0xf0]  ;;  %v5217_v60 = vld [vmem:[#allocation7 + $0x4cc] sm:$0xf] }
 0x17b   :  { %v4548_v22 = vld [vmem:[#allocation7 + $0x6d8] sm:$0xf0] }
 0x17c   :  { %2520 = vmatpush.bf16.msra.mxu2 %v4039_v56  ;;  %v5181_v56 = vld [vmem:[#allocation7 + $0x3ac] sm:$0xf]  ;;  %v4244_v7 = vld [vmem:[#allocation7 + $0x478] sm:$0xf0] }
 0x17d   :  { %2486 = vmatpush.bf16.msra.mxu3 %v4595_v43  ;;  %v4151_v42 = vor.u32 %v5181_v56, %v4148_v36  ;;  %v5177_v43 = vld [vmem:[#allocation7 + $0x38c] sm:$0xf]  ;;  %v4551_v56 = vor.u32 %v5281_v30, %v4548_v22  ;;  %v4676_v30 = vld [vmem:[#allocation7 + $0x7d8] sm:$0xf0] }
 0x17e   :  { %2509 = vmatpush.bf16.msra.mxu1 %v3879_v44  ;;  %2495 = vmatpush.bf16.msrb.mxu0 %v3767_v31  ;;  %v5133_v44 = vld [vmem:[#allocation7 + $0x22c] sm:$0xf]  ;;  %v6119_v1 = vpop.f32.mrf.mxu1  ;;  %v3815_v31 = vor.u32 %v5097_v33, %v3812_v15  ;;  %v4135_v0 = vor.u32 %v5177_v43, %v4132_v9  ;;  %v4100_v15 = vld [vmem:[#allocation7 + $0x358] sm:$0xf0] }
 0x17f   :  { %v3959_v58 = vor.u32 %v5133_v44, %v3956_v46  ;;  %v5169_v33 = vld [vmem:[#allocation7 + $0x34c] sm:$0xf]  ;;  %v4260_v43 = vld [vmem:[#allocation7 + $0x498] sm:$0xf0] }
 0x180   :  { %2521 = vmatpush.bf16.msra.mxu2 %v4023_v55  ;;  %v4439_v55 = vor.u32 %v5253_v24, %v4436_v4  ;;  %v5213_v36 = vld [vmem:[#allocation7 + $0x4ac] sm:$0xf] }
 0x181   :  { %2487 = vmatpush.bf16.msra.mxu3 %v4579_v25  ;;  %v4423_v25 = vor.u32 %v5249_v17, %v4420_v48 }
 0x182   :  { %2510 = vmatpush.bf16.msra.mxu1 %v3863_v53  ;;  %2496 = vmatpush.bf16.msrb.mxu0 %v3751_v63  ;;  %v5065_v53 = vld [vmem:[#allocation7 + $0xc] sm:$0xf]  ;;  %v2218_v49 = vpop.f32.mrf.mxu2  ;;  %v6121_v62 = vpop.f32.mrf.mxu0 }
 0x183   :  { %v5221_v63 = vld [vmem:[#allocation7 + $0x4ec] sm:$0xf]  ;;  %v3687_v50 = vor.u32 %v5065_v53, %v3684_v47  ;;  %v2229_v35 = vpop.f32.mrf.mxu3 }
 0x184   :  { %2522 = vmatpush.bf16.msra.mxu2 %v4007_v3  ;;  %2488 = vmatmul.bf16.vlgmr.msra.gmra.mxu3 %v6095_v12  ;;  %v5285_v3 = vld [vmem:[#allocation7 + $0x6ec] sm:$0xf] }
 0x185   :  { %2532 = vmatpush.bf16.msrb.mxu3 %v4183_v59  ;;  %v4311_v59 = vor.u32 %v5221_v63, %v4308_v39  ;;  %v4567_v16 = vor.u32 %v5285_v3, %v4564_v37  ;;  %v5273_v53 = vld [vmem:[#allocation7 + $0x68c] sm:$0xf]  ;;  %v4068_v39 = vld [vmem:[#allocation7 + $0x318] sm:$0xf0] }
 0x186   :  { %2511 = vmatpush.bf16.msra.mxu1 %v3847_v29  ;;  %2497 = vmatpush.bf16.msrb.mxu0 %v3735_v13  ;;  %v3943_v29 = vor.u32 %v5129_v5, %v3940_v32  ;;  %v5245_v13 = vld [vmem:[#allocation7 + $0x5ac] sm:$0xf]  ;;  %v2257_v11 = vpop.f32.mrf.mxu1  ;;  %v4692_v37 = vld [vmem:[#allocation7 + $0x7f8] sm:$0xf0] }
 0x187   :  { %v5233_v32 = vld [vmem:[#allocation7 + $0x54c] sm:$0xf]  ;;  %v4340_v11 = vld [vmem:[#allocation7 + $0x538] sm:$0xf0] }
 0x188   :  { %2523 = vmatpush.bf16.msra.mxu2 %v3991_v19  ;;  %v4292_v19 = vld [vmem:[#allocation7 + $0x4d8] sm:$0xf0]  ;;  %v5161_v63 = vld [vmem:[#allocation7 + $0x30c] sm:$0xf] }
 0x189   :  { %2533 = vmatpush.bf16.msrb.mxu3 %v4167_v28  ;;  %v4407_v28 = vor.u32 %v5245_v13, %v4404_v14  ;;  %v4295_v10 = vor.u32 %v5217_v60, %v4292_v19  ;;  %v5317_v3 = vld [vmem:[#allocation7 + $0x7ec] sm:$0xf] }
 0x18a   :  { %2512 = vmatpush.bf16.msra.mxu1 %v3831_v27  ;;  %2498 = vmatpush.bf16.msrb.mxu0 %v3719_v34  ;;  %v2204_v27 = vadd.f32 %v6112_v41, %v6114_v21  ;;  %v4388_v34 = vld [vmem:[#allocation7 + $0x598] sm:$0xf0]  ;;  %v6127_v4 = vpop.f32.mrf.mxu2  ;;  %v4103_v41 = vor.u32 %v5169_v33, %v4100_v15  ;;  %v5277_v21 = vld [vmem:[#allocation7 + $0x6ac] sm:$0xf]  ;;  %v2244_v44 = vpop.f32.mrf.mxu0 }
 0x18b   :  { %v2231_v17 = vpop.f32.mrf.mxu3  ;;  %v4535_v48 = vor.u32 %v5277_v21, %v4532_v51  ;;  %v5229_v60 = vld [vmem:[#allocation7 + $0x52c] sm:$0xf]  ;;  %v4660_v21 = vld [vmem:[#allocation7 + $0x7b8] sm:$0xf0] }
 0x18c   :  { %2524 = vmatpush.bf16.msra.mxu2 %v3975_v38  ;;  %v2217_v24 = vadd.f32 %v6116_v23, %v2204_v27  ;;  %v4276_v38 = vld [vmem:[#allocation7 + $0x4b8] sm:$0xf0]  ;;  %v5201_v27 = vld [vmem:[#allocation7 + $0x44c] sm:$0xf] }
 0x18d   :  { %2534 = vmatpush.bf16.msrb.mxu3 %v4151_v42  ;;  %v4084_v23 = vld [vmem:[#allocation7 + $0x338] sm:$0xf0]  ;;  %v4279_v42 = vor.u32 %v5213_v36, %v4276_v38  ;;  %v5265_v15 = vld [vmem:[#allocation7 + $0x64c] sm:$0xf] }
 0x18e   :  { %2513 = vmatpush.bf16.msra.mxu1 %v3815_v31  ;;  %2499 = vmatpush.bf16.msrb.mxu0 %v3703_v52  ;;  %v2230_v40 = vadd.f32 %v2229_v35, %v2217_v24  ;;  %v5165_v31 = vld [vmem:[#allocation7 + $0x32c] sm:$0xf]  ;;  %v4372_v52 = vld [vmem:[#allocation7 + $0x578] sm:$0xf0]  ;;  %v6131_v9 = vpop.f32.mrf.mxu1 }
 0x18f   :  { %v4500_v35 = vld [vmem:[#allocation7 + $0x678] sm:$0xf0]  ;;  %v5225_v24 = vld [vmem:[#allocation7 + $0x50c] sm:$0xf] }
 0x190   :  { %2525 = vmatpush.bf16.msra.mxu2 %v3959_v58  ;;  %v4087_v58 = vor.u32 %v5165_v31, %v4084_v23  ;;  %v2243_v47 = vadd.f32 %v6121_v62, %v2230_v40  ;;  %v4324_v38 = vld [vmem:[#allocation7 + $0x518] sm:$0xf0]  ;;  %v5197_v44 = vld [vmem:[#allocation7 + $0x42c] sm:$0xf] }
 0x191   :  { %2514 = vmatmul.bf16.vlgmr.msra.gmra.mxu1 %v6017_v6  ;;  %2535 = vmatpush.bf16.msrb.mxu3 %v4135_v0  ;;  %v5241_v6 = vld [vmem:[#allocation7 + $0x58c] sm:$0xf]  ;;  %v4356_v0 = vld [vmem:[#allocation7 + $0x558] sm:$0xf0] }
 0x192   :  { %2558 = vmatpush.bf16.msrb.mxu1 %v4439_v55  ;;  %2500 = vmatpush.bf16.msrb.mxu0 %v3687_v50  ;;  %v4391_v46 = vor.u32 %v5241_v6, %v4388_v34  ;;  %v5237_v55 = vld [vmem:[#allocation7 + $0x56c] sm:$0xf]  ;;  %v2270_v45 = vpop.f32.mrf.mxu2  ;;  %v2256_v62 = vadd.f32 %v6119_v1, %v2243_v47  ;;  %v6135_v13 = vpop.f32.mrf.mxu0  ;;  %v4359_v14 = vor.u32 %v5233_v32, %v4356_v0  ;;  %v4468_v23 = vld [vmem:[#allocation7 + $0x638] sm:$0xf0]  ;;  %v4754_v32 = vld [vmem:[#allocation8 + $0x70] sm:$0xf] }
 0x193   :  { %v4375_v5 = vor.u32 %v5237_v55, %v4372_v52  ;;  %v5205_v50 = vld [vmem:[#allocation7 + $0x46c] sm:$0xf]  ;;  %v4343_v6 = vor.u32 %v5229_v60, %v4340_v11  ;;  %v4327_v55 = vor.u32 %v5225_v24, %v4324_v38  ;;  %v4612_v60 = vld [vmem:[#allocation7 + $0x758] sm:$0xf0] }
 0x194   :  { %2526 = vmatpush.bf16.msra.mxu2 %v3943_v29  ;;  %v4071_v29 = vor.u32 %v5161_v63, %v4068_v39  ;;  %v4247_v19 = vor.u32 %v5205_v50, %v4244_v7  ;;  %v2269_v1 = vadd.f32 %v6127_v4, %v2256_v62  ;;  %v5261_v31 = vld [vmem:[#allocation7 + $0x62c] sm:$0xf]  ;;  %v5335_v63 = vld [vmem:[#allocation8 + $0x74] sm:$0xf0] }
 0x195   :  { %2501 = vmatmul.bf16.vlgmr.msrb.gmra.mxu0 %v6041_v20  ;;  %2536 = vmatpush.bf16.msrb.mxu3 %v4119_v18  ;;  %v5209_v20 = vld [vmem:[#allocation7 + $0x48c] sm:$0xf]  ;;  %v4755_v45 = vor.u32 %v5335_v63, %v4754_v32 }
 0x196   :  { %2559 = vmatpush.bf16.msrb.mxu1 %v4423_v25  ;;  %2545 = vmatpush.bf16.msra.mxu0 %v4311_v59  ;;  %v4263_v49 = vor.u32 %v5209_v20, %v4260_v43  ;;  %v5269_v59 = vld [vmem:[#allocation7 + $0x66c] sm:$0xf]  ;;  %v2309_v33 = vpop.f32.mrf.mxu1  ;;  %v4644_v43 = vld [vmem:[#allocation7 + $0x798] sm:$0xf0] }
 0x197   :  { %2527 = vmatmul.bf16.vlgmr.msra.gmra.mxu2 %v6045_v54  ;;  %v4516_v54 = vld [vmem:[#allocation7 + $0x698] sm:$0xf0]  ;;  %v5313_v18 = vld [vmem:[#allocation7 + $0x7cc] sm:$0xf]  ;;  %v4503_v22 = vor.u32 %v5269_v59, %v4500_v35  ;;  %v4746_v59 = vld [vmem:[#allocation8 + $0x60] sm:$0xf] }
 0x198   :  { %2571 = vmatpush.bf16.msrb.mxu2 %v4567_v16  ;;  %v4519_v25 = vor.u32 %v5273_v53, %v4516_v54  ;;  %v4695_v16 = vor.u32 %v5317_v3, %v4692_v37  ;;  %v4679_v34 = vor.u32 %v5313_v18, %v4676_v30  ;;  %v5305_v20 = vld [vmem:[#allocation7 + $0x78c] sm:$0xf]  ;;  %v4196_v54 = vld [vmem:[#allocation7 + $0x418] sm:$0xf0]  ;;  %v5333_v35 = vld [vmem:[#allocation8 + $0x64] sm:$0xf0] }
 0x199   :  { %2537 = vmatpush.bf16.msrb.mxu3 %v4103_v41  ;;  %v5309_v41 = vld [vmem:[#allocation7 + $0x7ac] sm:$0xf]  ;;  %v4747_v11 = vor.u32 %v5333_v35, %v4746_v59  ;;  %v4738_v18 = vld [vmem:[#allocation8 + $0x50] sm:$0xf]  ;;  %v5331_v30 = vld [vmem:[#allocation8 + $0x54] sm:$0xf0] }
 0x19a   :  { %2560 = vmatpush.bf16.msrb.mxu1 %v4407_v28  ;;  %2546 = vmatpush.bf16.msra.mxu0 %v4295_v10  ;;  %v4228_v28 = vld [vmem:[#allocation7 + $0x458] sm:$0xf0]  ;;  %v6141_v4 = vpop.f32.mrf.mxu2  ;;  %v2296_v17 = vpop.f32.mrf.mxu0  ;;  %v4663_v52 = vor.u32 %v5309_v41, %v4660_v21  ;;  %v5193_v53 = vld [vmem:[#allocation7 + $0x40c] sm:$0xf]  ;;  %v4722_v41 = vld [vmem:[#allocation8 + $0x30] sm:$0xf] }
 0x19b   :  { %v4484_v10 = vld [vmem:[#allocation7 + $0x658] sm:$0xf0]  ;;  %v4231_v36 = vor.u32 %v5201_v27, %v4228_v28  ;;  %v5257_v47 = vld [vmem:[#allocation7 + $0x60c] sm:$0xf]  ;;  %v4199_v3 = vor.u32 %v5193_v53, %v4196_v54  ;;  %v5327_v21 = vld [vmem:[#allocation8 + $0x34] sm:$0xf0]  ;;  %v2308_v54 = vadd.f32 %v6131_v9, %v6135_v13 }
 0x19c   :  { %2572 = vmatpush.bf16.msrb.mxu2 %v4551_v56  ;;  %v2281_v56 = vpop.f32.mrf.mxu3  ;;  %v4487_v40 = vor.u32 %v5265_v15, %v4484_v10  ;;  %v5301_v37 = vld [vmem:[#allocation7 + $0x76c] sm:$0xf]  ;;  %v4596_v33 = vld [vmem:[#allocation7 + $0x738] sm:$0xf0]  ;;  %v4739_v10 = vor.u32 %v5331_v30, %v4738_v18  ;;  %v5325_v17 = vld [vmem:[#allocation8 + $0x24] sm:$0xf0] }
 0x19d   :  { %2538 = vmatpush.bf16.msrb.mxu3 %v4087_v58  ;;  %v6138_v51 = vadd.f32 %v2281_v56, %v2269_v1  ;;  %v4471_v58 = vor.u32 %v5261_v31, %v4468_v23  ;;  %v5293_v28 = vld [vmem:[#allocation7 + $0x72c] sm:$0xf]  ;;  %v4730_v1 = vld [vmem:[#allocation8 + $0x40] sm:$0xf]  ;;  %v4723_v23 = vor.u32 %v5327_v21, %v4722_v41  ;;  %v2321_v63 = vadd.f32 %v6141_v4, %v2308_v54  ;;  %v5332_v9 = vld [vmem:[#allocation8 + $0x64] sm:$0xf] }
 0x19e   :  { %2561 = vmatpush.bf16.msrb.mxu1 %v4391_v46  ;;  %2547 = vmatpush.bf16.msra.mxu0 %v4279_v42  ;;  %v4212_v46 = vld [vmem:[#allocation7 + $0x438] sm:$0xf0]  ;;  %v5289_v56 = vld [vmem:[#allocation7 + $0x70c] sm:$0xf]  ;;  %v5330_v4 = vld [vmem:[#allocation8 + $0x54] sm:$0xf] }
 0x19f   :  { %v2601_v42 = vrot.slane %v6138_v51, 4  ;;  %v4748_v13 = vld [vmem:[#allocation8 + $0x68] sm:$0xf0]  ;;  %v5328_v30 = vld [vmem:[#allocation8 + $0x44] sm:$0xf] }
 0x1a0   :  { %2573 = vmatpush.bf16.msrb.mxu2 %v4535_v48  ;;  %v4215_v48 = vor.u32 %v5197_v44, %v4212_v46  ;;  %v4751_v59 = vor.u32 %v5332_v9, %v4748_v13  ;;  %v5349_v41 = vld [vmem:[#allocation8 + $0xe4] sm:$0xf0]  ;;  %v5320_v9 = vld [vmem:[#allocation8 + $0x4] sm:$0xf] }
 0x1a1   :  { %2539 = vmatpush.bf16.msrb.mxu3 %v4071_v29 }
 0x1a2   :  { %2562 = vmatpush.bf16.msrb.mxu1 %v4375_v5  ;;  %2548 = vmatpush.bf16.msra.mxu0 %v4263_v49  ;;  %v4452_v5 = vld [vmem:[#allocation7 + $0x618] sm:$0xf0]  ;;  %v4647_v49 = vor.u32 %v5305_v20, %v4644_v43  ;;  %v2322_v29 = vpop.f32.mrf.mxu2  ;;  %v4706_v43 = vld [vmem:[#allocation8 + $0x10] sm:$0xf] }
 0x1a3   :  { %v4455_v7 = vor.u32 %v5257_v47, %v4452_v5 }
 0x1a4   :  { %2574 = vmatpush.bf16.msrb.mxu2 %v4519_v25  ;;  %2540 = vmatmul.bf16.vlgmr.msrb.gmra.mxu3 %v6070_v8  ;;  %v2602_v8 = vadd.f32 %v2601_v42, %v6138_v51  ;;  %v2283_v0 = vpop.f32.mrf.mxu3  ;;  %v4628_v25 = vld [vmem:[#allocation7 + $0x778] sm:$0xf0]  ;;  %v4714_v42 = vld [vmem:[#allocation8 + $0x20] sm:$0xf] }
 0x1a5   :  { %2584 = vmatpush.bf16.msra.mxu3 %v4695_v16  ;;  %v5297_v16 = vld [vmem:[#allocation7 + $0x74c] sm:$0xf]  ;;  %v4715_v20 = vor.u32 %v5325_v17, %v4714_v42 }
 0x1a6   :  { %2563 = vmatpush.bf16.msrb.mxu1 %v4359_v14  ;;  %2549 = vmatpush.bf16.msra.mxu0 %v4247_v19  ;;  %v2603_v39 = vrot.slane %v2602_v8, 2  ;;  %v4631_v14 = vor.u32 %v5301_v37, %v4628_v25  ;;  %v4756_v37 = vld [vmem:[#allocation8 + $0x78] sm:$0xf0] }
 0x1a8   :  { %2575 = vmatpush.bf16.msrb.mxu2 %v4503_v22  ;;  %v2604_v50 = vadd.f32 %v2603_v39, %v2602_v8  ;;  %v5323_v8 = vld [vmem:[#allocation8 + $0x14] sm:$0xf0]  ;;  %v4698_v39 = vld [vmem:[#allocation8] sm:$0xf] }
 0x1a9   :  { %2585 = vmatpush.bf16.msra.mxu3 %v4679_v34  ;;  %v4707_v32 = vor.u32 %v5323_v8, %v4706_v43  ;;  %v4802_v43 = vld [vmem:[#allocation8 + $0xd0] sm:$0xf]  ;;  %v5347_v8 = vld [vmem:[#allocation8 + $0xd4] sm:$0xf0] }
 0x1aa   :  { %2564 = vmatpush.bf16.msrb.mxu1 %v4343_v6  ;;  %2550 = vmatpush.bf16.msra.mxu0 %v4231_v36  ;;  %v2605_v62 = vrot.slane %v2604_v50, 1  ;;  %v5329_v6 = vld [vmem:[#allocation8 + $0x44] sm:$0xf0]  ;;  %v4580_v36 = vld [vmem:[#allocation7 + $0x718] sm:$0xf0]  ;;  %v4803_v54 = vor.u32 %v5347_v8, %v4802_v43 }
 0x1ac   :  { %2576 = vmatpush.bf16.msrb.mxu2 %v4487_v40  ;;  %v2606_v19 = vadd.f32 %v2605_v62, %v2604_v50  ;;  %v2333_v27 = vpop.f32.mrf.mxu3  ;;  %v4740_v62 = vld [vmem:[#allocation8 + $0x58] sm:$0xf0] }
 0x1ad   :  { %2586 = vmatpush.bf16.msra.mxu3 %v4663_v52  ;;  %v4743_v18 = vor.u32 %v5330_v4, %v4740_v62 }
 0x1ae   :  { %2565 = vmatpush.bf16.msrb.mxu1 %v4327_v55  ;;  %2551 = vmatpush.bf16.msra.mxu0 %v4215_v48  ;;  %v2625_v22 = vmul.f32 %v2606_v19, %v5777_v26  ;;  %v2359_v24 = vpop.f32.mrf.mxu1 }
 0x1b0   :  { %2577 = vmatpush.bf16.msrb.mxu2 %v4471_v58  ;;  %v6150_v15 = vsub.f32 %v6138_v51, %v2625_v22  ;;  %v4583_v51 = vor.u32 %v5289_v56, %v4580_v36  ;;  %v4732_v22 = vld [vmem:[#allocation8 + $0x48] sm:$0xf0]  ;;  %v6163_v56 = vld [vmem:[#allocation13 + $0x3] ss:$8 sm:$0xf] }
 0x1b1   :  { %2566 = vmatmul.bf16.vlgmr.msrb.gmra.mxu1 %v6068_v57  ;;  %2587 = vmatpush.bf16.msra.mxu3 %v4647_v49  ;;  %v4615_v57 = vor.u32 %v5297_v16, %v4612_v60  ;;  %v5321_v49 = vld [vmem:[#allocation8 + $0x4] sm:$0xf0]  ;;  %v5326_v36 = vld [vmem:[#allocation8 + $0x34] sm:$0xf]  ;;  %v2727_v17 = vperm.slane %v6163_v56, 0 }
 0x1b2   :  { %2552 = vmatpush.bf16.msra.mxu0 %v4199_v3  ;;  %v2633_v34 = vmul.f32 %v6150_v15, %v6150_v15  ;;  %v2346_v44 = vpop.f32.mrf.mxu0  ;;  %v5334_v3 = vld [vmem:[#allocation8 + $0x74] sm:$0xf]  ;;  %v4699_v25 = vor.u32 %v5321_v49, %v4698_v39  ;;  %v4708_v49 = vld [vmem:[#allocation8 + $0x18] sm:$0xf0] }
 0x1b4   :  { %2578 = vmatpush.bf16.msrb.mxu2 %v4455_v7  ;;  %v2637_v38 = vrot.slane %v2633_v34, 4  ;;  %v2335_v46 = vpop.f32.mrf.mxu3  ;;  %v4759_v7 = vor.u32 %v5334_v3, %v4756_v37  ;;  %v5345_v3 = vld [vmem:[#allocation8 + $0xc4] sm:$0xf0] }
 0x1b5   :  { %2553 = vmatmul.bf16.vlgmr.msra.gmra.mxu0 %v6081_v61  ;;  %2588 = vmatpush.bf16.msra.mxu3 %v4631_v14  ;;  %v4599_v61 = vor.u32 %v5293_v28, %v4596_v33 }
 0x1b6   :  { %3131 = vmatpush.bf16.msrb.mxu0 %v4755_v45  ;;  %v2638_v40 = vadd.f32 %v2637_v38, %v2633_v34  ;;  %v2361_v52 = vpop.f32.mrf.mxu1  ;;  %v4724_v38 = vld [vmem:[#allocation8 + $0x38] sm:$0xf0] }
 0x1b7   :  { %2579 = vmatmul.bf16.vlgmr.msrb.gmra.mxu2 %v6079_v2  ;;  %v4731_v2 = vor.u32 %v5329_v6, %v4730_v1  ;;  %v6161_v6 = vld [vmem:[#allocation13 + $0x2] ss:$8 sm:$0xf]  ;;  %v5324_v52 = vld [vmem:[#allocation8 + $0x24] sm:$0xf] }
 0x1b8   :  { %v2639_v31 = vrot.slane %v2638_v40, 2 }
 0x1b9   :  { %2589 = vmatpush.bf16.msra.mxu3 %v4615_v57  ;;  %v4818_v57 = vld [vmem:[#allocation8 + $0xf0] sm:$0xf] }
 0x1ba   :  { %3132 = vmatpush.bf16.msrb.mxu0 %v4747_v11  ;;  %v2640_v55 = vadd.f32 %v2639_v31, %v2638_v40  ;;  %v2372_v53 = vpop.f32.mrf.mxu2  ;;  %v2348_v47 = vpop.f32.mrf.mxu0 }
 0x1bc   :  { %v2641_v48 = vrot.slane %v2640_v55, 1 }
 0x1bd   :  { %2590 = vmatpush.bf16.msra.mxu3 %v4599_v61  ;;  %v4735_v61 = vor.u32 %v5328_v30, %v4732_v22 }
 0x1be   :  { %3133 = vmatpush.bf16.msrb.mxu0 %v4739_v10  ;;  %v2642_v58 = vadd.f32 %v2641_v48, %v2640_v55  ;;  %v4727_v55 = vor.u32 %v5326_v36, %v4724_v38 }
 0x1c0   :  { %v2661_v5 = vmul.f32 %v2642_v58, %v5777_v26 }
 0x1c1   :  { %2591 = vmatpush.bf16.msra.mxu3 %v4583_v51 }
 0x1c2   :  { %3134 = vmatpush.bf16.msrb.mxu0 %v4731_v2  ;;  %v2665_v0 = vadd.f32 1e-05, %v2661_v5  ;;  %v2374_v45 = vpop.f32.mrf.mxu2  ;;  %v4810_v2 = vld [vmem:[#allocation8 + $0xe0] sm:$0xf] }
 0x1c3   :  { %v4811_v51 = vor.u32 %v5349_v41, %v4810_v2 }
 0x1c4   :  { %2592 = vmatmul.bf16.vlgmr.msra.gmra.mxu3 %v6095_v12  ;;  %v2334_v12 = vadd.f32 %v2333_v27, %v2321_v63  ;;  %5444 = vrsqrt.f32 %v2665_v0  ;;  %v5351_v27 = vld [vmem:[#allocation8 + $0xf4] sm:$0xf0]  ;;  %vm2675_vm11 = vweird.f32 %v2665_v0  ;;  %v5322_v63 = vld [vmem:[#allocation8 + $0x14] sm:$0xf] }
 0x1c5   :  { %v4819_v1 = vor.u32 %v5351_v27, %v4818_v57  ;;  %v4711_v45 = vor.u32 %v5322_v63, %v4708_v49  ;;  %v4770_v57 = vld [vmem:[#allocation8 + $0x90] sm:$0xf]  ;;  %v5339_v27 = vld [vmem:[#allocation8 + $0x94] sm:$0xf0] }
 0x1c6   :  { %3135 = vmatpush.bf16.msrb.mxu0 %v4723_v23  ;;  %v2347_v50 = vadd.f32 %v2346_v44, %v2334_v12  ;;  %v2714_v44 = vperm.slane %v6161_v6, 0 }
 0x1c7   :  { %v2385_v60 = vpop.f32.mrf.mxu3  ;;  %3144 = vmatpush.bf16.msra.mxu1 %v4819_v1  ;;  %v5337_v1 = vld [vmem:[#allocation8 + $0x84] sm:$0xf0] }
 0x1c8   :  { %v2360_v29 = vadd.f32 %v2359_v24, %v2347_v50 }
 0x1ca   :  { %3136 = vmatpush.bf16.msrb.mxu0 %v4715_v20  ;;  %v5445_v35 = vpop.eup %5444  ;;  %v2373_v16 = vadd.f32 %v2372_v53, %v2360_v29  ;;  %v4716_v20 = vld [vmem:[#allocation8 + $0x28] sm:$0xf0] }
 0x1cb   :  { %v2670_v14 = vmul.f32 %v5445_v35, %v2665_v0  ;;  %vm2676_vm10 = vweird.f32 %v5445_v35  ;;  %3145 = vmatpush.bf16.msra.mxu1 %v4811_v51  ;;  %v4794_v0 = vld [vmem:[#allocation8 + $0xc0] sm:$0xf]  ;;  %v4700_v29 = vld [vmem:[#allocation8 + $0x8] sm:$0xf0] }
 0x1cc   :  { %v2386_v11 = vadd.f32 %v2385_v60, %v2373_v16  ;;  %vm2677_vm12 = vmor %vm2675_vm11, %vm2676_vm10  ;;  %v4703_v16 = vor.u32 %v5320_v9, %v4700_v29  ;;  %v4778_v60 = vld [vmem:[#allocation8 + $0xa0] sm:$0xf]  ;;  %v4812_v51 = vld [vmem:[#allocation8 + $0xe8] sm:$0xf0] }
 0x1cd   :  { %v2671_v19 = vmul.f32 %v5445_v35, %v2670_v14  ;;  %v5340_v9 = vld [vmem:[#allocation8 + $0xa4] sm:$0xf] }
 0x1ce   :  { %3137 = vmatpush.bf16.msrb.mxu0 %v4707_v32  ;;  %v2607_v33 = vrot.slane %v2386_v11, 4  ;;  %v6159_v10 = vpop.f32.mrf.mxu1  ;;  %v4719_v32 = vor.u32 %v5324_v52, %v4716_v20  ;;  %v5346_v52 = vld [vmem:[#allocation8 + $0xd4] sm:$0xf] }
 0x1cf   :  { %v2672_v28 = vmul.f32 0.5, %v2671_v19  ;;  %v2387_v31 = vpop.f32.mrf.mxu3  ;;  %3146 = vmatpush.bf16.msra.mxu1 %v4803_v54  ;;  %v5341_v19 = vld [vmem:[#allocation8 + $0xa4] sm:$0xf0] }
 0x1d0   :  { %v2608_v24 = vadd.f32 %v2607_v33, %v2386_v11  ;;  %v4779_v30 = vor.u32 %v5341_v19, %v4778_v60  ;;  %v4762_v33 = vld [vmem:[#allocation8 + $0x80] sm:$0xf] }
 0x1d1   :  { %v2673_v34 = vsub.f32 1.5, %v2672_v28  ;;  %v4771_v28 = vor.u32 %v5339_v27, %v4770_v57  ;;  %v4763_v2 = vor.u32 %v5337_v1, %v4762_v33  ;;  %v5336_v57 = vld [vmem:[#allocation8 + $0x84] sm:$0xf]  ;;  %v4764_v27 = vld [vmem:[#allocation8 + $0x88] sm:$0xf0] }
 0x1d2   :  { %3138 = vmatpush.bf16.msrb.mxu0 %v4699_v25  ;;  %v2609_v40 = vrot.slane %v2608_v24, 2  ;;  %v6166_v46 = vpop.f32.mrf.mxu0  ;;  %v4882_v33 = vld [vmem:[#allocation8 + $0x170] sm:$0xf]  ;;  %v5367_v1 = vld [vmem:[#allocation8 + $0x174] sm:$0xf0] }
 0x1d3   :  { %v2674_v21 = vmul.f32 %v5445_v35, %v2673_v34 }
 0x1d4   :  { %v2610_v42 = vadd.f32 %v2609_v40, %v2608_v24  ;;  %v5350_v24 = vld [vmem:[#allocation8 + $0xf4] sm:$0xf]  ;;  %v5348_v40 = vld [vmem:[#allocation8 + $0xe4] sm:$0xf] }
 0x1d5   :  { %v2678_v23 = vsel %vm2677_vm12, %v5445_v35, %v2674_v21  ;;  %v5343_v35 = vld [vmem:[#allocation8 + $0xb4] sm:$0xf0] }
 0x1d6   :  { %3183 = vmatpush.bf16.msra.mxu0 %v4759_v7  ;;  %v2709_v48 = vmul.f32 %v2678_v23, %v6150_v15  ;;  %v2611_v58 = vrot.slane %v2610_v42, 1  ;;  %v2413_v53 = vpop.f32.mrf.mxu1  ;;  %v4795_v15 = vor.u32 %v5345_v3, %v4794_v0  ;;  %v4815_v23 = vor.u32 %v5348_v40, %v4812_v51  ;;  %v5342_v0 = vld [vmem:[#allocation8 + $0xb4] sm:$0xf]  ;;  %v4788_v3 = vld [vmem:[#allocation8 + $0xb8] sm:$0xf0] }
 0x1d7   :  { %v4796_v53 = vld [vmem:[#allocation8 + $0xc8] sm:$0xf0] }
 0x1d8   :  { %v2722_v47 = vmul.f32 %v2714_v44, %v2709_v48  ;;  %v2612_v5 = vadd.f32 %v2611_v58, %v2610_v42  ;;  %3147 = vmatpush.bf16.msra.mxu1 %v4795_v15  ;;  %v4804_v48 = vld [vmem:[#allocation8 + $0xd8] sm:$0xf0]  ;;  %v5344_v58 = vld [vmem:[#allocation8 + $0xc4] sm:$0xf]  ;;  %v4791_v15 = vor.u32 %v5342_v0, %v4788_v3  ;;  %v4842_v0 = vld [vmem:[#allocation8 + $0x120] sm:$0xf] }
 0x1d9   :  { %v4807_v43 = vor.u32 %v5346_v52, %v4804_v48  ;;  %v5357_v3 = vld [vmem:[#allocation8 + $0x124] sm:$0xf0] }
 0x1da   :  { %3184 = vmatpush.bf16.msra.mxu0 %v4751_v59  ;;  %v2735_v39 = vadd.f32 %v2727_v17, %v2722_v47  ;;  %v2626_v37 = vmul.f32 %v2612_v5, %v5777_v26  ;;  %v6171_v12 = vpop.f32.mrf.mxu2  ;;  %v2400_v25 = vpop.f32.mrf.mxu0  ;;  %v4786_v59 = vld [vmem:[#allocation8 + $0xb0] sm:$0xf]  ;;  %v4799_v5 = vor.u32 %v5344_v58, %v4796_v53 }
 0x1db   :  { %v4787_v62 = vor.u32 %v5343_v35, %v4786_v59 }
 0x1dc   :  { %v2739_v50 = vmax.f32 %v2735_v39, 0.0  ;;  %v6173_v7 = vsub.f32 %v2386_v11, %v2626_v37 }
 0x1dd   :  { %3148 = vmatpush.bf16.msra.mxu1 %v4787_v62  ;;  %v2728_v62 = vperm.slane %v6163_v56, 1 }
 0x1de   :  { %3185 = vmatpush.bf16.msra.mxu0 %v4743_v18  ;;  %v2743_v13 = vpack.c.bf16 %v2739_v50, %v2739_v50  ;;  %v2634_v4 = vmul.f32 %v6173_v7, %v6173_v7 }
 0x1e0   :  { %3139 = vmatmul.bf16.vlgmr.msrb.gmra.mxu0 %v2743_v13  ;;  %v2643_v14 = vrot.slane %v2634_v4, 4 }
 0x1e1   :  { %3149 = vmatpush.bf16.msra.mxu1 %v4779_v30 }
 0x1e2   :  { %3186 = vmatpush.bf16.msra.mxu0 %v4735_v61  ;;  %v2644_v11 = vadd.f32 %v2643_v14, %v2634_v4  ;;  %v2426_v18 = vpop.f32.mrf.mxu2  ;;  %v4820_v61 = vld [vmem:[#allocation8 + $0xf8] sm:$0xf0]  ;;  %v5338_v14 = vld [vmem:[#allocation8 + $0x94] sm:$0xf] }
 0x1e3   :  { %v4823_v41 = vor.u32 %v5350_v24, %v4820_v61  ;;  %v4883_v61 = vor.u32 %v5367_v1, %v4882_v33  ;;  %v4868_v33 = vld [vmem:[#allocation8 + $0x158] sm:$0xf0] }
 0x1e4   :  { %v2645_v22 = vrot.slane %v2644_v11, 2 }
 0x1e5   :  { %3150 = vmatpush.bf16.msra.mxu1 %v4771_v28  ;;  %v4767_v28 = vor.u32 %v5336_v57, %v4764_v27  ;;  %3157 = vmatpush.bf16.msra.mxu2 %v4883_v61  ;;  %v5360_v61 = vld [vmem:[#allocation8 + $0x144] sm:$0xf] }
 0x1e6   :  { %3187 = vmatpush.bf16.msra.mxu0 %v4727_v55  ;;  %v2646_v34 = vadd.f32 %v2645_v22, %v2644_v11 }
 0x1e7   :  { %v2437_v38 = vpop.f32.mrf.mxu3 }
 0x1e8   :  { %v2647_v36 = vrot.slane %v2646_v34, 1 }
 0x1e9   :  { %3151 = vmatpush.bf16.msra.mxu1 %v4763_v2  ;;  %v4874_v2 = vld [vmem:[#allocation8 + $0x160] sm:$0xf] }
 0x1ea   :  { %3188 = vmatpush.bf16.msra.mxu0 %v4719_v32  ;;  %v2648_v21 = vadd.f32 %v2647_v36, %v2646_v34  ;;  %v2412_v32 = vadd.f32 %v6159_v10, %v6166_v46  ;;  %v2715_v46 = vperm.slane %v6161_v6, 1 }
 0x1ec   :  { %v2662_v31 = vmul.f32 %v2648_v21, %v5777_v26  ;;  %v2425_v49 = vadd.f32 %v6171_v12, %v2412_v32  ;;  %v5359_v32 = vld [vmem:[#allocation8 + $0x134] sm:$0xf0] }
 0x1ed   :  { %3196 = vmatpush.bf16.msrb.mxu1 %v4823_v41  ;;  %v5365_v41 = vld [vmem:[#allocation8 + $0x164] sm:$0xf0] }
 0x1ee   :  { %3189 = vmatpush.bf16.msra.mxu0 %v4711_v45  ;;  %v2463_v44 = vpop.f32.mrf.mxu1  ;;  %v2666_v42 = vadd.f32 1e-05, %v2662_v31  ;;  %v2438_v25 = vadd.f32 %v2437_v38, %v2425_v49  ;;  %v4875_v40 = vor.u32 %v5365_v41, %v4874_v2 }
 0x1ef   :  { %v2439_v55 = vpop.f32.mrf.mxu3 }
 0x1f0   :  { %5446 = vrsqrt.f32 %v2666_v42  ;;  %vm2685_vm14 = vweird.f32 %v2666_v42  ;;  %3158 = vmatpush.bf16.msra.mxu2 %v4875_v40 }
 0x1f1   :  { %3197 = vmatpush.bf16.msrb.mxu1 %v4815_v23  ;;  %v4866_v23 = vld [vmem:[#allocation8 + $0x150] sm:$0xf] }
 0x1f2   :  { %3190 = vmatpush.bf16.msra.mxu0 %v4703_v16  ;;  %v2450_v17 = vpop.f32.mrf.mxu0  ;;  %v4772_v16 = vld [vmem:[#allocation8 + $0x98] sm:$0xf0] }
 0x1f3   :  { %v2451_v45 = vadd.f32 %v2450_v17, %v2438_v25  ;;  %v4775_v60 = vor.u32 %v5338_v14, %v4772_v16  ;;  %v4843_v25 = vor.u32 %v5357_v3, %v4842_v0 }
 0x1f5   :  { %3191 = vmatmul.bf16.vlgmr.msra.gmra.mxu0 %v2743_v13  ;;  %3198 = vmatpush.bf16.msrb.mxu1 %v4807_v43  ;;  %v4780_v13 = vld [vmem:[#allocation8 + $0xa8] sm:$0xf0]  ;;  %v2464_v4 = vadd.f32 %v2463_v44, %v2451_v45  ;;  %v5361_v43 = vld [vmem:[#allocation8 + $0x144] sm:$0xf0]  ;;  %v4834_v45 = vld [vmem:[#allocation8 + $0x110] sm:$0xf] }
 0x1f6   :  { %v2465_v20 = vpop.f32.mrf.mxu1  ;;  %v5447_v8 = vpop.eup %5446  ;;  %v4783_v10 = vor.u32 %v5340_v9, %v4780_v13  ;;  %v5355_v9 = vld [vmem:[#allocation8 + $0x114] sm:$0xf0] }
 0x1f7   :  { %v2680_v54 = vmul.f32 %v5447_v8, %v2666_v42  ;;  %vm2686_vm13 = vweird.f32 %v5447_v8  ;;  %v5363_v42 = vld [vmem:[#allocation8 + $0x154] sm:$0xf0]  ;;  %v4858_v20 = vld [vmem:[#allocation8 + $0x140] sm:$0xf]  ;;  %v4835_v13 = vor.u32 %v5355_v9, %v4834_v45  ;;  %v5352_v45 = vld [vmem:[#allocation8 + $0x104] sm:$0xf] }
 0x1f8   :  { %vm2687_vm15 = vmor %vm2685_vm14, %vm2686_vm13  ;;  %v4867_v52 = vor.u32 %v5363_v42, %v4866_v23  ;;  %v4859_v53 = vor.u32 %v5361_v43, %v4858_v20  ;;  %v5358_v23 = vld [vmem:[#allocation8 + $0x134] sm:$0xf]  ;;  %v4852_v42 = vld [vmem:[#allocation8 + $0x138] sm:$0xf0] }
 0x1f9   :  { %v2681_v39 = vmul.f32 %v5447_v8, %v2680_v54  ;;  %3199 = vmatpush.bf16.msrb.mxu1 %v4799_v5  ;;  %v4850_v5 = vld [vmem:[#allocation8 + $0x130] sm:$0xf]  ;;  %v5356_v43 = vld [vmem:[#allocation8 + $0x124] sm:$0xf]  ;;  %v4828_v9 = vld [vmem:[#allocation8 + $0x108] sm:$0xf0] }
 0x1fa   :  { %v2476_v47 = vpop.f32.mrf.mxu2  ;;  %v2452_v63 = vpop.f32.mrf.mxu0  ;;  %3159 = vmatpush.bf16.msra.mxu2 %v4867_v52 }
 0x1fb   :  { %v2682_v37 = vmul.f32 0.5, %v2681_v39  ;;  %v2477_v11 = vadd.f32 %v2476_v47, %v2464_v4  ;;  %v4851_v39 = vor.u32 %v5359_v32, %v4850_v5 }
 0x1fd   :  { %v2683_v50 = vsub.f32 1.5, %v2682_v37  ;;  %3200 = vmatpush.bf16.msrb.mxu1 %v4791_v15 }
 0x1fe   :  { %3160 = vmatpush.bf16.msra.mxu2 %v4859_v53 }
 0x1ff   :  { %v2684_v29 = vmul.f32 %v5447_v8, %v2683_v50 }
 0x201   :  { %v2688_v35 = vsel %vm2687_vm15, %v5447_v8, %v2684_v29  ;;  %3201 = vmatpush.bf16.msrb.mxu1 %v4783_v10  ;;  %v4826_v29 = vld [vmem:[#allocation8 + $0x100] sm:$0xf] }
 0x202   :  { %v2478_v59 = vpop.f32.mrf.mxu2  ;;  %v2710_v12 = vmul.f32 %v2688_v35, %v6173_v7  ;;  %3161 = vmatpush.bf16.msra.mxu2 %v4851_v39  ;;  %v4884_v35 = vld [vmem:[#allocation8 + $0x178] sm:$0xf0]  ;;  %v5354_v39 = vld [vmem:[#allocation8 + $0x114] sm:$0xf] }
 0x203   :  { %v5353_v59 = vld [vmem:[#allocation8 + $0x104] sm:$0xf0] }
 0x204   :  { %v2723_v19 = vmul.f32 %v2715_v46, %v2710_v12  ;;  %v5366_v46 = vld [vmem:[#allocation8 + $0x174] sm:$0xf] }
 0x205   :  { %3202 = vmatpush.bf16.msrb.mxu1 %v4775_v60  ;;  %v4887_v14 = vor.u32 %v5366_v46, %v4884_v35  ;;  %v5364_v60 = vld [vmem:[#allocation8 + $0x164] sm:$0xf] }
 0x206   :  { %v2736_v22 = vadd.f32 %v2728_v62, %v2723_v19  ;;  %3162 = vmatpush.bf16.msra.mxu2 %v4843_v25  ;;  %v4827_v62 = vor.u32 %v5353_v59, %v4826_v29  ;;  %v4876_v19 = vld [vmem:[#allocation8 + $0x168] sm:$0xf0]  ;;  %v4946_v29 = vld [vmem:[#allocation8 + $0x1f0] sm:$0xf]  ;;  %v5383_v59 = vld [vmem:[#allocation8 + $0x1f4] sm:$0xf0] }
 0x207   :  { %v2489_v18 = vpop.f32.mrf.mxu3 }
 0x208   :  { %v2490_v30 = vadd.f32 %v2489_v18, %v2477_v11  ;;  %v2740_v7 = vmax.f32 %v2736_v22, 0.0 }
 0x209   :  { %3203 = vmatpush.bf16.msrb.mxu1 %v4767_v28  ;;  %v5362_v28 = vld [vmem:[#allocation8 + $0x154] sm:$0xf] }
 0x20a   :  { %v2613_v34 = vrot.slane %v2490_v30, 4  ;;  %v2744_v38 = vpack.c.bf16 %v2740_v7, %v2740_v7  ;;  %3163 = vmatpush.bf16.msra.mxu2 %v4835_v13  ;;  %v4831_v13 = vor.u32 %v5352_v45, %v4828_v9  ;;  %v5374_v9 = vld [vmem:[#allocation8 + $0x1b4] sm:$0xf] }
 0x20c   :  { %v2614_v36 = vadd.f32 %v2613_v34, %v2490_v30  ;;  %3152 = vmatmul.bf16.vlgmr.msra.gmra.mxu1 %v2744_v38  ;;  %v4871_v34 = vor.u32 %v5362_v28, %v4868_v33  ;;  %v5377_v28 = vld [vmem:[#allocation8 + $0x1c4] sm:$0xf0] }
 0x20e   :  { %v6184_v24 = vpop.f32.mrf.mxu1  ;;  %v2615_v21 = vrot.slane %v2614_v36, 2  ;;  %3164 = vmatpush.bf16.msra.mxu2 %v4827_v62  ;;  %v5381_v62 = vld [vmem:[#allocation8 + $0x1e4] sm:$0xf0] }
 0x20f   :  { %v2491_v44 = vpop.f32.mrf.mxu3 }
 0x210   :  { %v2616_v31 = vadd.f32 %v2615_v21, %v2614_v36  ;;  %v4860_v36 = vld [vmem:[#allocation8 + $0x148] sm:$0xf0] }
 0x211   :  { %v4863_v41 = vor.u32 %v5360_v61, %v4860_v36  ;;  %v5375_v61 = vld [vmem:[#allocation8 + $0x1b4] sm:$0xf0] }
 0x212   :  { %v6186_v51 = vpop.f32.mrf.mxu0  ;;  %v2617_v17 = vrot.slane %v2616_v31, 1  ;;  %3209 = vmatpush.bf16.msrb.mxu2 %v4887_v14 }
 0x213   :  { %v2516_v21 = vadd.f32 %v6184_v24, %v6186_v51  ;;  %v2716_v24 = vperm.slane %v6161_v6, 2 }
 0x214   :  { %v2618_v48 = vadd.f32 %v2617_v17, %v2616_v31 }
 0x216   :  { %v2517_v55 = vpop.f32.mrf.mxu1  ;;  %v2627_v8 = vmul.f32 %v2618_v48, %v5777_v26 }
 0x217   :  { %v4855_v55 = vor.u32 %v5358_v23, %v4852_v42  ;;  %v4898_v23 = vld [vmem:[#allocation8 + $0x190] sm:$0xf]  ;;  %v5371_v42 = vld [vmem:[#allocation8 + $0x194] sm:$0xf0] }
 0x218   :  { %v6189_v47 = vsub.f32 %v2490_v30, %v2627_v8  ;;  %v4879_v30 = vor.u32 %v5364_v60, %v4876_v19  ;;  %v4844_v8 = vld [vmem:[#allocation8 + $0x128] sm:$0xf0] }
 0x219   :  { %v4847_v5 = vor.u32 %v5356_v43, %v4844_v8  ;;  %v4948_v43 = vld [vmem:[#allocation8 + $0x1f8] sm:$0xf0] }
 0x21a   :  { %v2528_v58 = vpop.f32.mrf.mxu2  ;;  %v2504_v54 = vpop.f32.mrf.mxu0  ;;  %v2635_v63 = vmul.f32 %v6189_v47, %v6189_v47  ;;  %3210 = vmatpush.bf16.msrb.mxu2 %v4879_v30 }
 0x21b   :  { %v2529_v31 = vadd.f32 %v2528_v58, %v2516_v21  ;;  %v5373_v21 = vld [vmem:[#allocation8 + $0x1a4] sm:$0xf0] }
 0x21c   :  { %v2649_v49 = vrot.slane %v2635_v63, 4  ;;  %3204 = vmatmul.bf16.vlgmr.msrb.gmra.mxu1 %v2744_v38 }
 0x21e   :  { %v2650_v37 = vadd.f32 %v2649_v49, %v2635_v63  ;;  %3211 = vmatpush.bf16.msrb.mxu2 %v4871_v34  ;;  %v2729_v63 = vperm.slane %v6163_v56, 2  ;;  %v4836_v49 = vld [vmem:[#allocation8 + $0x118] sm:$0xf0] }
 0x21f   :  { %v4839_v0 = vor.u32 %v5354_v39, %v4836_v49  ;;  %v5378_v49 = vld [vmem:[#allocation8 + $0x1d4] sm:$0xf] }
 0x220   :  { %v2651_v50 = vrot.slane %v2650_v37, 2 }
 0x222   :  { %v2530_v15 = vpop.f32.mrf.mxu2  ;;  %v2652_v10 = vadd.f32 %v2651_v50, %v2650_v37  ;;  %3212 = vmatpush.bf16.msrb.mxu2 %v4863_v41  ;;  %v4906_v41 = vld [vmem:[#allocation8 + $0x1a0] sm:$0xf] }
 0x224   :  { %v2653_v12 = vrot.slane %v2652_v10, 1 }
 0x226   :  { %v2654_v16 = vadd.f32 %v2653_v12, %v2652_v10  ;;  %3213 = vmatpush.bf16.msrb.mxu2 %v4855_v55  ;;  %v4890_v55 = vld [vmem:[#allocation8 + $0x180] sm:$0xf] }
 0x227   :  { %v2541_v4 = vpop.f32.mrf.mxu3 }
 0x228   :  { %v2663_v18 = vmul.f32 %v2654_v16, %v5777_v26  ;;  %v2542_v52 = vadd.f32 %v2541_v4, %v2529_v31  ;;  %v4938_v4 = vld [vmem:[#allocation8 + $0x1e0] sm:$0xf] }
 0x229   :  { %v4939_v16 = vor.u32 %v5381_v62, %v4938_v4 }
 0x22a   :  { %v2667_v22 = vadd.f32 1e-05, %v2663_v18  ;;  %3214 = vmatpush.bf16.msrb.mxu2 %v4847_v5  ;;  %v5379_v18 = vld [vmem:[#allocation8 + $0x1d4] sm:$0xf0] }
 0x22c   :  { %5448 = vrsqrt.f32 %v2667_v22  ;;  %vm2695_vm1 = vweird.f32 %v2667_v22 }
 0x22e   :  { %v2567_v11 = vpop.f32.mrf.mxu1  ;;  %3215 = vmatpush.bf16.msrb.mxu2 %v4839_v0  ;;  %v4932_v0 = vld [vmem:[#allocation8 + $0x1d8] sm:$0xf0] }
 0x22f   :  { %v2543_v27 = vpop.f32.mrf.mxu3 }
 0x230   :  { %v4922_v27 = vld [vmem:[#allocation8 + $0x1c0] sm:$0xf] }
 0x232   :  { %v2554_v57 = vpop.f32.mrf.mxu0  ;;  %v5449_v7 = vpop.eup %5448  ;;  %3216 = vmatpush.bf16.msrb.mxu2 %v4831_v13  ;;  %v4916_v13 = vld [vmem:[#allocation8 + $0x1b8] sm:$0xf0] }
 0x233   :  { %v2690_v38 = vmul.f32 %v5449_v7, %v2667_v22  ;;  %vm2696_vm0 = vweird.f32 %v5449_v7  ;;  %v2555_v20 = vadd.f32 %v2554_v57, %v2542_v52  ;;  %v5369_v52 = vld [vmem:[#allocation8 + $0x184] sm:$0xf0] }
 0x234   :  { %vm2697_vm2 = vmor %vm2695_vm1, %vm2696_vm0 }
 0x235   :  { %v2691_v44 = vmul.f32 %v5449_v7, %v2690_v38  ;;  %v2568_v32 = vadd.f32 %v2567_v11, %v2555_v20  ;;  %v4930_v11 = vld [vmem:[#allocation8 + $0x1d0] sm:$0xf]  ;;  %v5382_v20 = vld [vmem:[#allocation8 + $0x1f4] sm:$0xf] }
 0x236   :  { %v2569_v1 = vpop.f32.mrf.mxu1  ;;  %v4931_v22 = vor.u32 %v5379_v18, %v4930_v11  ;;  %v4951_v5 = vor.u32 %v5382_v20, %v4948_v43 }
 0x237   :  { %v2692_v17 = vmul.f32 0.5, %v2691_v44  ;;  %v4923_v1 = vor.u32 %v5377_v28, %v4922_v27  ;;  %v4907_v44 = vor.u32 %v5373_v21, %v4906_v41  ;;  %v5368_v27 = vld [vmem:[#allocation8 + $0x184] sm:$0xf]  ;;  %v4892_v28 = vld [vmem:[#allocation8 + $0x188] sm:$0xf0] }
 0x239   :  { %v2693_v48 = vsub.f32 1.5, %v2692_v17  ;;  %v4899_v17 = vor.u32 %v5371_v42, %v4898_v23 }
 0x23a   :  { %v2580_v2 = vpop.f32.mrf.mxu2  ;;  %v2556_v40 = vpop.f32.mrf.mxu0 }
 0x23b   :  { %v2694_v53 = vmul.f32 %v5449_v7, %v2693_v48  ;;  %v2581_v37 = vadd.f32 %v2580_v2, %v2568_v32 }
 0x23d   :  { %v2698_v51 = vsel %vm2697_vm2, %v5449_v7, %v2694_v53  ;;  %v4914_v7 = vld [vmem:[#allocation8 + $0x1b0] sm:$0xf] }
 0x23e   :  { %v2711_v58 = vmul.f32 %v2698_v51, %v6189_v47  ;;  %v4947_v47 = vor.u32 %v5383_v59, %v4946_v29  ;;  %v4915_v38 = vor.u32 %v5375_v61, %v4914_v7  ;;  %v5380_v51 = vld [vmem:[#allocation8 + $0x1e4] sm:$0xf] }
 0x240   :  { %v2724_v3 = vmul.f32 %v2716_v24, %v2711_v58  ;;  %3170 = vmatpush.bf16.msrb.mxu3 %v4947_v47  ;;  %v4940_v58 = vld [vmem:[#allocation8 + $0x1e8] sm:$0xf0]  ;;  %v5372_v47 = vld [vmem:[#allocation8 + $0x1a4] sm:$0xf] }
 0x242   :  { %v2582_v54 = vpop.f32.mrf.mxu2  ;;  %v2737_v50 = vadd.f32 %v2729_v63, %v2724_v3  ;;  %v4943_v63 = vor.u32 %v5380_v51, %v4940_v58  ;;  %v5391_v51 = vld [vmem:[#allocation10 + $0x38] sm:$0xff] }
 0x243   :  { %v4891_v54 = vor.u32 %v5369_v52, %v4890_v55  ;;  %3441 = vmatpush.bf16.msrb.mxu0 %v5391_v51 }
 0x244   :  { %v2741_v46 = vmax.f32 %v2737_v50, 0.0  ;;  %3171 = vmatpush.bf16.msrb.mxu3 %v4939_v16  ;;  %v4900_v16 = vld [vmem:[#allocation8 + $0x198] sm:$0xf0] }
 0x246   :  { %v2745_v12 = vpack.c.bf16 %v2741_v46, %v2741_v46  ;;  %v4919_v46 = vor.u32 %v5374_v9, %v4916_v13 }
 0x247   :  { %v2593_v15 = vpop.f32.mrf.mxu3 }
 0x248   :  { %v2594_v25 = vadd.f32 %v2593_v15, %v2581_v37  ;;  %3165 = vmatmul.bf16.vlgmr.msra.gmra.mxu2 %v2745_v12  ;;  %3172 = vmatpush.bf16.msrb.mxu3 %v4931_v22  ;;  %v4935_v37 = vor.u32 %v5378_v49, %v4932_v0  ;;  %v5376_v15 = vld [vmem:[#allocation8 + $0x1c4] sm:$0xf]  ;;  %v5390_v49 = vld [vmem:[#allocation10 + $0x30] sm:$0xff] }
 0x249   :  { %3442 = vmatpush.bf16.msrb.mxu0 %v5390_v49 }
 0x24a   :  { %v2619_v10 = vrot.slane %v2594_v25, 4 }
 0x24c   :  { %v2620_v35 = vadd.f32 %v2619_v10, %v2594_v25  ;;  %3173 = vmatpush.bf16.msrb.mxu3 %v4923_v1  ;;  %v4895_v1 = vor.u32 %v5368_v27, %v4892_v28 }
 0x24e   :  { %v2621_v14 = vrot.slane %v2620_v35, 2 }
 0x24f   :  { %v2595_v60 = vpop.f32.mrf.mxu3 }
 0x250   :  { %v2622_v19 = vadd.f32 %v2621_v14, %v2620_v35  ;;  %3174 = vmatpush.bf16.msrb.mxu3 %v4915_v38  ;;  %v4908_v35 = vld [vmem:[#allocation8 + $0x1a8] sm:$0xf0]  ;;  %v5370_v14 = vld [vmem:[#allocation8 + $0x194] sm:$0xf] }
 0x251   :  { %v4911_v62 = vor.u32 %v5372_v47, %v4908_v35 }
 0x252   :  { %v2623_v30 = vrot.slane %v2622_v19, 1 }
 0x254   :  { %v2624_v57 = vadd.f32 %v2623_v30, %v2622_v19  ;;  %3175 = vmatpush.bf16.msrb.mxu3 %v4907_v44  ;;  %v2717_v19 = vperm.slane %v6161_v6, 3  ;;  %v4903_v30 = vor.u32 %v5370_v14, %v4900_v16 }
 0x256   :  { %v2628_v33 = vmul.f32 %v2624_v57, %v5777_v26  ;;  %v2730_v57 = vperm.slane %v6163_v56, 3 }
 0x258   :  { %v6200_v34 = vsub.f32 %v2594_v25, %v2628_v33  ;;  %3217 = vmatmul.bf16.vlgmr.msrb.gmra.mxu2 %v2745_v12  ;;  %3176 = vmatpush.bf16.msrb.mxu3 %v4899_v17  ;;  %v4924_v25 = vld [vmem:[#allocation8 + $0x1c8] sm:$0xf0] }
 0x259   :  { %v4927_v50 = vor.u32 %v5376_v15, %v4924_v25 }
 0x25a   :  { %v2636_v36 = vmul.f32 %v6200_v34, %v6200_v34 }
 0x25c   :  { %v2655_v2 = vrot.slane %v2636_v36, 4  ;;  %3177 = vmatpush.bf16.msrb.mxu3 %v4891_v54 }
 0x25d   :  { %v3140_v53 = vpop.f32.mrf.mxu0 }
 0x25e   :  { %v2656_v40 = vadd.f32 %v2655_v2, %v2636_v36 }
 0x260   :  { %v2657_v31 = vrot.slane %v2656_v40, 2  ;;  %3222 = vmatpush.bf16.msra.mxu3 %v4951_v5 }
 0x262   :  { %v2658_v48 = vadd.f32 %v2657_v31, %v2656_v40 }
 0x264   :  { %v2659_v8 = vrot.slane %v2658_v48, 1  ;;  %3223 = vmatpush.bf16.msra.mxu3 %v4943_v63 }
 0x265   :  { %v3142_v3 = vpop.f32.mrf.mxu0 }
 0x266   :  { %v2660_v24 = vadd.f32 %v2659_v8, %v2658_v48 }
 0x268   :  { %v2664_v32 = vmul.f32 %v2660_v24, %v5777_v26  ;;  %3224 = vmatpush.bf16.msra.mxu3 %v4935_v37 }
 0x26a   :  { %v2668_v39 = vadd.f32 1e-05, %v2664_v32 }
 0x26c   :  { %5450 = vrsqrt.f32 %v2668_v39  ;;  %3225 = vmatpush.bf16.msra.mxu3 %v4927_v50  ;;  %vm2705_vm4 = vweird.f32 %v2668_v39  ;;  %v5389_v50 = vld [vmem:[#allocation10 + $0x28] sm:$0xff] }
 0x26d   :  { %3443 = vmatpush.bf16.msrb.mxu0 %v5389_v50 }
 0x270   :  { %3226 = vmatpush.bf16.msra.mxu3 %v4919_v46 }
 0x272   :  { %v5451_v45 = vpop.eup %5450  ;;  %v3192_v59 = vpop.f32.mrf.mxu0 }
 0x273   :  { %v2700_v29 = vmul.f32 %v5451_v45, %v2668_v39  ;;  %vm2706_vm3 = vweird.f32 %v5451_v45 }
 0x274   :  { %vm2707_vm5 = vmor %vm2705_vm4, %vm2706_vm3  ;;  %3227 = vmatpush.bf16.msra.mxu3 %v4911_v62 }
 0x275   :  { %v2701_v10 = vmul.f32 %v5451_v45, %v2700_v29 }
 0x277   :  { %v2702_v12 = vmul.f32 0.5, %v2701_v10 }
 0x278   :  { %3228 = vmatpush.bf16.msra.mxu3 %v4903_v30 }
 0x279   :  { %v2703_v4 = vsub.f32 1.5, %v2702_v12  ;;  %v5387_v12 = vld [vmem:[#allocation10 + $0x18] sm:$0xff] }
 0x27a   :  { %v3194_v11 = vpop.f32.mrf.mxu0 }
 0x27b   :  { %v2704_v60 = vmul.f32 %v5451_v45, %v2703_v4  ;;  %v5399_v4 = vld [vmem:[#allocation10 + $0x78] sm:$0xff]  ;;  %v5398_v11 = vld [vmem:[#allocation10 + $0x70] sm:$0xff] }
 0x27c   :  { %3229 = vmatpush.bf16.msra.mxu3 %v4895_v1  ;;  %3454 = vmatpush.bf16.msra.mxu1 %v5399_v4 }
 0x27d   :  { %v2708_v18 = vsel %vm2707_vm5, %v5451_v45, %v2704_v60 }
 0x27e   :  { %v2712_v22 = vmul.f32 %v2708_v18, %v6200_v34 }
 0x280   :  { %v2725_v33 = vmul.f32 %v2717_v19, %v2712_v22  ;;  %v5386_v19 = vld [vmem:[#allocation10 + $0x10] sm:$0xff]  ;;  %3455 = vmatpush.bf16.msra.mxu1 %v5398_v11  ;;  %v5385_v22 = vld [vmem:[#allocation10 + $0x8] sm:$0xff] }
 0x282   :  { %v2738_v7 = vadd.f32 %v2730_v57, %v2725_v33  ;;  %v5397_v57 = vld [vmem:[#allocation10 + $0x68] sm:$0xff] }
 0x284   :  { %v2742_v61 = vmax.f32 %v2738_v7, 0.0  ;;  %3456 = vmatpush.bf16.msra.mxu1 %v5397_v57  ;;  %v5384_v7 = vld [vmem:[#allocation10] sm:$0xff] }
 0x286   :  { %v2746_v36 = vpack.c.bf16 %v2742_v61, %v2742_v61  ;;  %v5396_v61 = vld [vmem:[#allocation10 + $0x60] sm:$0xff] }
 0x288   :  { %3178 = vmatmul.bf16.vlgmr.msrb.gmra.mxu3 %v2746_v36  ;;  %3457 = vmatpush.bf16.msra.mxu1 %v5396_v61  ;;  %v5402_v61 = vld [vmem:[#allocation11 + $0x10] sm:$0xff] }
 0x289   :  { %v3153_v38 = vpop.f32.mrf.mxu1 }
 0x28a   :  { %v3154_v6 = vadd.f32 %v3153_v38, %v3140_v53 }
 0x291   :  { %v3155_v2 = vpop.f32.mrf.mxu1 }
 0x298   :  { %3230 = vmatmul.bf16.vlgmr.msra.gmra.mxu3 %v2746_v36 }
 0x299   :  { %v3205_v41 = vpop.f32.mrf.mxu1 }
 0x29a   :  { %v3206_v21 = vadd.f32 %v3205_v41, %v3192_v59  ;;  %v5388_v59 = vld [vmem:[#allocation10 + $0x20] sm:$0xff] }
 0x29b   :  { %3444 = vmatpush.bf16.msrb.mxu0 %v5388_v59 }
 0x29f   :  { %3445 = vmatpush.bf16.msrb.mxu0 %v5387_v12 }
 0x2a1   :  { %v3207_v40 = vpop.f32.mrf.mxu1 }
 0x2a2   :  { %v3236_v40 = vld [vmem:[#allocation13 + $0x4] ss:$8 sm:$0x3] }
 0x2a3   :  { %3446 = vmatpush.bf16.msrb.mxu0 %v5386_v19  ;;  %v3297_v49 = vperm.slane %v3236_v40, 1  ;;  %v5406_v19 = vld [vmem:[#allocation11 + $0x30] sm:$0xff] }
 0x2a7   :  { %3447 = vmatpush.bf16.msrb.mxu0 %v5385_v22 }
 0x2ab   :  { %3448 = vmatpush.bf16.msrb.mxu0 %v5384_v7 }
 0x2cb   :  { %v3166_v34 = vpop.f32.mrf.mxu2 }
 0x2cc   :  { %v3167_v23 = vadd.f32 %v3166_v34, %v3154_v6  ;;  %v5395_v6 = vld [vmem:[#allocation10 + $0x58] sm:$0xff] }
 0x2cd   :  { %3458 = vmatpush.bf16.msra.mxu1 %v5395_v6  ;;  %v5400_v6 = vld [vmem:[#allocation11] sm:$0xff] }
 0x2d3   :  { %v3168_v44 = vpop.f32.mrf.mxu2 }
 0x2d4   :  { %v5394_v44 = vld [vmem:[#allocation10 + $0x50] sm:$0xff] }
 0x2d5   :  { %3459 = vmatpush.bf16.msra.mxu1 %v5394_v44 }
 0x2db   :  { %v3218_v56 = vpop.f32.mrf.mxu2 }
 0x2dc   :  { %v3219_v53 = vadd.f32 %v3218_v56, %v3206_v21 }
 0x2e3   :  { %v3220_v31 = vpop.f32.mrf.mxu2 }
 0x30b   :  { %v3179_v42 = vpop.f32.mrf.mxu3 }
 0x30c   :  { %v3180_v17 = vadd.f32 %v3179_v42, %v3167_v23  ;;  %v3238_v23 = vld [vmem:[#allocation13 + $0x5] ss:$8 sm:$0x3]  ;;  %v3296_v42 = vperm.slane %v3236_v40, 0 }
 0x30e   :  { %v3239_v55 = vrot.slane %v3180_v17, 4 }
 0x310   :  { %v3240_v52 = vadd.f32 %v3239_v55, %v3180_v17  ;;  %v5393_v55 = vld [vmem:[#allocation10 + $0x48] sm:$0xff] }
 0x311   :  { %3460 = vmatpush.bf16.msra.mxu1 %v5393_v55 }
 0x312   :  { %v3241_v48 = vrot.slane %v3240_v52, 2 }
 0x313   :  { %v3181_v20 = vpop.f32.mrf.mxu3 }
 0x314   :  { %v3242_v43 = vadd.f32 %v3241_v48, %v3240_v52  ;;  %v3303_v48 = vperm.slane %v3238_v23, 0 }
 0x316   :  { %v3243_v8 = vrot.slane %v3242_v43, 1 }
 0x318   :  { %v3244_v54 = vadd.f32 %v3243_v8, %v3242_v43  ;;  %v5392_v43 = vld [vmem:[#allocation10 + $0x40] sm:$0xff] }
 0x319   :  { %3461 = vmatpush.bf16.msra.mxu1 %v5392_v43 }
 0x31a   :  { %v3251_v5 = vmul.f32 %v3244_v54, %v5777_v26 }
 0x31b   :  { %v3231_v24 = vpop.f32.mrf.mxu3 }
 0x31c   :  { %v6209_v58 = vsub.f32 %v3180_v17, %v3251_v5  ;;  %v3232_v32 = vadd.f32 %v3231_v24, %v3219_v53 }
 0x31e   :  { %v3255_v63 = vmul.f32 %v6209_v58, %v6209_v58  ;;  %v3245_v39 = vrot.slane %v3232_v32, 4 }
 0x320   :  { %v3257_v0 = vrot.slane %v3255_v63, 4  ;;  %v3246_v3 = vadd.f32 %v3245_v39, %v3232_v32 }
 0x322   :  { %v3258_v37 = vadd.f32 %v3257_v0, %v3255_v63  ;;  %v3247_v15 = vrot.slane %v3246_v3, 2 }
 0x323   :  { %v3233_v25 = vpop.f32.mrf.mxu3 }
 0x324   :  { %v3259_v45 = vrot.slane %v3258_v37, 2  ;;  %v3248_v9 = vadd.f32 %v3247_v15, %v3246_v3  ;;  %v3304_v3 = vperm.slane %v3238_v23, 1  ;;  %v3468_v23 = vld [vmem:[#allocation13 + $0x7] ss:$0 sm:$0xff] }
 0x326   :  { %v3260_v13 = vadd.f32 %v3259_v45, %v3258_v37  ;;  %v3249_v29 = vrot.slane %v3248_v9, 1 }
 0x328   :  { %v3261_v10 = vrot.slane %v3260_v13, 1  ;;  %v3250_v46 = vadd.f32 %v3249_v29, %v3248_v9 }
 0x32a   :  { %v3262_v47 = vadd.f32 %v3261_v10, %v3260_v13  ;;  %v3252_v35 = vmul.f32 %v3250_v46, %v5777_v26 }
 0x32c   :  { %v3269_v62 = vmul.f32 %v3262_v47, %v5777_v26  ;;  %v6215_v14 = vsub.f32 %v3232_v32, %v3252_v35 }
 0x32e   :  { %v3271_v16 = vadd.f32 1e-05, %v3269_v62  ;;  %v3256_v60 = vmul.f32 %v6215_v14, %v6215_v14 }
 0x330   :  { %5452 = vrsqrt.f32 %v3271_v16  ;;  %v3263_v18 = vrot.slane %v3256_v60, 4  ;;  %vm3279_vm7 = vweird.f32 %v3271_v16 }
 0x332   :  { %v3264_v30 = vadd.f32 %v3263_v18, %v3256_v60 }
 0x334   :  { %v3265_v27 = vrot.slane %v3264_v30, 2 }
 0x336   :  { %v5453_v28 = vpop.eup %5452  ;;  %v3266_v33 = vadd.f32 %v3265_v27, %v3264_v30  ;;  %v5405_v30 = vld [vmem:[#allocation11 + $0x28] sm:$0xff]  ;;  %v5404_v27 = vld [vmem:[#allocation11 + $0x20] sm:$0xff] }
 0x337   :  { %v3274_v1 = vmul.f32 %v5453_v28, %v3271_v16  ;;  %vm3280_vm6 = vweird.f32 %v5453_v28 }
 0x338   :  { %v3267_v36 = vrot.slane %v3266_v33, 1  ;;  %vm3281_vm8 = vmor %vm3279_vm7, %vm3280_vm6 }
 0x339   :  { %v3275_v38 = vmul.f32 %v5453_v28, %v3274_v1 }
 0x33a   :  { %v3268_v2 = vadd.f32 %v3267_v36, %v3266_v33  ;;  %v5403_v33 = vld [vmem:[#allocation11 + $0x18] sm:$0xff] }
 0x33b   :  { %v3276_v41 = vmul.f32 0.5, %v3275_v38  ;;  %v5401_v38 = vld [vmem:[#allocation11 + $0x8] sm:$0xff] }
 0x33c   :  { %v3270_v21 = vmul.f32 %v3268_v2, %v5777_v26 }
 0x33d   :  { %v3277_v34 = vsub.f32 1.5, %v3276_v41 }
 0x33e   :  { %v3272_v56 = vadd.f32 1e-05, %v3270_v21 }
 0x33f   :  { %v3278_v31 = vmul.f32 %v5453_v28, %v3277_v34 }
 0x340   :  { %5454 = vrsqrt.f32 %v3272_v56  ;;  %vm3289_vm10 = vweird.f32 %v3272_v56 }
 0x341   :  { %v3282_v17 = vsel %vm3281_vm8, %v5453_v28, %v3278_v31 }
 0x342   :  { %v3293_v52 = vmul.f32 %v3282_v17, %v6209_v58 }
 0x344   :  { %v3300_v20 = vmul.f32 %v3296_v42, %v3293_v52 }
 0x346   :  { %v5455_v8 = vpop.eup %5454  ;;  %v3307_v54 = vadd.f32 %v3303_v48, %v3300_v20  ;;  %v3517_v48 = vld [vmem:[#allocation13 + $0x40] ss:$0 sm:$0xff] }
 0x347   :  { %v3284_v53 = vmul.f32 %v5455_v8, %v3272_v56  ;;  %vm3290_vm9 = vweird.f32 %v5455_v8  ;;  %v3467_v56 = vld [vmem:[#allocation13 + $0x6] ss:$0 sm:$0xff] }
 0x348   :  { %v3309_v5 = vmax.f32 %v3307_v54, 0.0  ;;  %vm3291_vm11 = vmor %vm3289_vm10, %vm3290_vm9 }
 0x349   :  { %v3285_v24 = vmul.f32 %v5455_v8, %v3284_v53 }
 0x34a   :  { %v3311_v51 = vpack.c.bf16 %v3309_v5, %v3309_v5 }
 0x34b   :  { %v3286_v32 = vmul.f32 0.5, %v3285_v24 }
 0x34c   :  { %3449 = vmatmul.bf16.vlgmr.msrb.gmra.mxu0 %v3311_v51 }
 0x34d   :  { %v3287_v63 = vsub.f32 1.5, %v3286_v32 }
 0x34f   :  { %v3288_v39 = vmul.f32 %v5455_v8, %v3287_v63 }
 0x351   :  { %v3292_v58 = vsel %vm3291_vm11, %v5455_v8, %v3288_v39 }
 0x352   :  { %v3294_v0 = vmul.f32 %v3292_v58, %v6215_v14  ;;  %v5407_v14 = vld [vmem:[#allocation11 + $0x38] sm:$0xff] }
 0x353   :  { %3566 = vmatpush.bf16.msra.mxu2 %v5407_v14 }
 0x354   :  { %v3301_v37 = vmul.f32 %v3297_v49, %v3294_v0 }
 0x356   :  { %v3308_v15 = vadd.f32 %v3304_v3, %v3301_v37 }
 0x357   :  { %3567 = vmatpush.bf16.msra.mxu2 %v5406_v19 }
 0x358   :  { %v3310_v25 = vmax.f32 %v3308_v15, 0.0 }
 0x35a   :  { %v3312_v50 = vpack.c.bf16 %v3310_v25, %v3310_v25 }
 0x35b   :  { %3568 = vmatpush.bf16.msra.mxu2 %v5405_v30 }
 0x35c   :  { %3462 = vmatmul.bf16.vlgmr.msra.gmra.mxu1 %v3312_v50 }
 0x35f   :  { %3569 = vmatpush.bf16.msra.mxu2 %v5404_v27 }
 0x363   :  { %3570 = vmatpush.bf16.msra.mxu2 %v5403_v33 }
 0x367   :  { %3571 = vmatpush.bf16.msra.mxu2 %v5402_v61 }
 0x36b   :  { %3572 = vmatpush.bf16.msra.mxu2 %v5401_v38 }
 0x36f   :  { %3573 = vmatpush.bf16.msra.mxu2 %v5400_v6 }
 0x3c9   :  { %v3450_v45 = vpop.f32.mrf.mxu0 }
 0x3d1   :  { %v3452_v9 = vpop.f32.mrf.mxu0 }
 0x3d9   :  { %v3463_v13 = vpop.f32.mrf.mxu1 }
 0x3da   :  { %v3464_v29 = vadd.f32 %v3463_v13, %v3450_v45 }
 0x3dc   :  { %v3469_v59 = vrot.slane %v3464_v29, 4 }
 0x3de   :  { %v3470_v10 = vadd.f32 %v3469_v59, %v3464_v29 }
 0x3e0   :  { %v3471_v46 = vrot.slane %v3470_v10, 2 }
 0x3e1   :  { %v3465_v47 = vpop.f32.mrf.mxu1 }
 0x3e2   :  { %v3472_v35 = vadd.f32 %v3471_v46, %v3470_v10 }
 0x3e4   :  { %v3473_v12 = vrot.slane %v3472_v35, 1 }
 0x3e6   :  { %v3474_v4 = vadd.f32 %v3473_v12, %v3472_v35 }
 0x3e8   :  { %v3475_v62 = vmul.f32 %v3474_v4, %v5777_v26 }
 0x3ea   :  { %v3476_v16 = vsub.f32 %v3464_v29, %v3475_v62 }
 0x3ec   :  { %v3477_v60 = vmul.f32 %v3476_v16, %v3476_v16 }
 0x3ee   :  { %v3478_v11 = vrot.slane %v3477_v60, 4 }
 0x3f0   :  { %v3479_v18 = vadd.f32 %v3478_v11, %v3477_v60 }
 0x3f2   :  { %v3480_v22 = vrot.slane %v3479_v18, 2 }
 0x3f4   :  { %v3481_v57 = vadd.f32 %v3480_v22, %v3479_v18 }
 0x3f6   :  { %v3482_v28 = vrot.slane %v3481_v57, 1 }
 0x3f8   :  { %v3483_v1 = vadd.f32 %v3482_v28, %v3481_v57 }
 0x3fa   :  { %v3484_v7 = vmul.f32 %v3483_v1, %v5777_v26 }
 0x3fc   :  { %v3485_v36 = vadd.f32 1e-05, %v3484_v7 }
 0x3fe   :  { %5456 = vrsqrt.f32 %v3485_v36  ;;  %vm3492_vm13 = vweird.f32 %v3485_v36 }
 0x404   :  { %v5457_v2 = vpop.eup %5456 }
 0x405   :  { %v3487_v41 = vmul.f32 %v5457_v2, %v3485_v36  ;;  %vm3493_vm12 = vweird.f32 %v5457_v2 }
 0x406   :  { %vm3494_vm14 = vmor %vm3492_vm13, %vm3493_vm12 }
 0x407   :  { %v3488_v21 = vmul.f32 %v5457_v2, %v3487_v41 }
 0x409   :  { %v3489_v40 = vmul.f32 0.5, %v3488_v21 }
 0x40b   :  { %v3490_v34 = vsub.f32 1.5, %v3489_v40 }
 0x40d   :  { %v3491_v44 = vmul.f32 %v5457_v2, %v3490_v34 }
 0x40f   :  { %v3495_v26 = vsel %vm3494_vm14, %v5457_v2, %v3491_v44 }
 0x410   :  { %v3496_v31 = vmul.f32 %v3495_v26, %v3476_v16 }
 0x412   :  { %v3497_v42 = vmul.f32 %v3496_v31, %v3467_v56 }
 0x414   :  { %v3498_v17 = vadd.f32 %v3497_v42, %v3468_v23 }
 0x416   :  { %v3499_v55 = vmax.f32 %v3498_v17, 0.0 }
 0x418   :  { %v3500_v52 = vpack.c.bf16 %v3499_v55, %v3499_v55 }
 0x41a   :  { %3574 = vmatmul.bf16.vlgmr.msra.gmra.mxu2 %v3500_v52 }
 0x49d   :  { %v3575_v20 = vpop.f32.mrf.mxu2 }
 0x49e   :  { %v3576_v43 = vadd.f32 %v3575_v20, %v3517_v48 }
 0x4a0   :  { %3579 = vst [vmem:[#allocation14] sm:$0xff] %v3576_v43 }
 0x4a1   :  { %3590 = dma.vmem_to_hbm [thread:$0]  %s3586_s6, 128, %s3588_s18, [#allocation4]  }
 0x4a5   :  { %v3577_v8 = vpop.f32.mrf.mxu2 }
 0x4a6   :  { %5658 = dma.done.wait [#allocation4], 128  }
 0x4a7   :  { %5659 = vsyncadd [#allocation4], 4294967168 }
 0x4a8   :  { %3595 = vsyncpa [#allocation3], 1 }
 0x4a9   :  { %3596 = vsyncpa [#allocation6], 1 }
 0x4aa   :  { %3597 = vsyncpa [#allocation9], 1 }
 0x4ab   :  { %3598 = vsyncpa [#allocation12], 1 }
 0x4ac   :  { %3599 = vsyncpa [#allocation4], 1 }

</bundles_post_ra>
